<compile_context>
chip_gen: v6e
topology: v6e:2x2x1
jax: 0.10.0
libtpu: 0.0.40
codegen_flags: <defaults>
</compile_context>

<pallas_src>
import functools

import jax
import jax.numpy as jnp
from jax import lax
from jax.experimental import pallas as pl
from jax.experimental.pallas import tpu as pltpu


def _round_up(x, m):
    return (x + m - 1) // m * m


# --------------------- fused direct-conv kernel (stride 1) -------------------
def _pinet_fused_conv_kernel(x_ref, w1_ref, w2_ref, o_ref, *, k, oh, ow):
    """One (image, Cout-tile): direct conv via unrolled tap loop + epilogue.

    x_ref : (1, Hp, Wp, Cin)   bf16 spatially pre-padded image
    w*_ref: (k*k, Cin, TN)     bf16
    o_ref : (1, OH*OW, TN)     bf16
    """
    cin = x_ref.shape[-1]
    tn = o_ref.shape[-1]
    x = x_ref[0]                                        # (Hp, Wp, Cin)
    acc1 = jnp.zeros((oh * ow, tn), jnp.float32)
    acc2 = jnp.zeros((oh * ow, tn), jnp.float32)
    for kh in range(k):                                 # unrolled tap loop
        for kw in range(k):
            tap = kh * k + kw
            xs = x[kh:kh + oh, kw:kw + ow, :].reshape(oh * ow, cin)
            acc1 += jnp.dot(xs, w1_ref[tap], preferred_element_type=jnp.float32)
            acc2 += jnp.dot(xs, w2_ref[tap], preferred_element_type=jnp.float32)
    o_ref[0] = (acc1 * acc2 + acc1).astype(o_ref.dtype)


def _pinet_conv_fused_s1(x_nhwc, w1_hwio, w2_hwio, k, pad):
    n, h, w, cin = x_nhwc.shape
    cout = w1_hwio.shape[-1]
    hp, wp = h + 2 * pad, w + 2 * pad
    oh, ow = hp - k + 1, wp - k + 1
    cin_p = _round_up(max(cin, 8), 8)        # keep per-tap MXU K >= 8
    cp = _round_up(cout, 128)                # lane-dense output tiles
    tn = 128

    # bf16 BEFORE the pad: one pad covers spatial halo + channel round-up.
    xp = jnp.pad(x_nhwc.astype(jnp.bfloat16),
                 ((0, 0), (pad, pad), (pad, pad), (0, cin_p - cin)))

    def prep(w_hwio):
        wb = jnp.pad(w_hwio.astype(jnp.bfloat16),
                     ((0, 0), (0, 0), (0, cin_p - cin), (0, cp - cout)))
        return wb.reshape(k * k, cin_p, cp)

    w1, w2 = prep(w1_hwio), prep(w2_hwio)

    kernel = functools.partial(_pinet_fused_conv_kernel, k=k, oh=oh, ow=ow)
    m = n * oh * ow
    cost = pl.CostEstimate(
        flops=2 * 2 * m * (k * k * cin_p) * cp + 3 * m * cp,
        transcendentals=0,
        bytes_accessed=2 * (xp.size + w1.size + w2.size + m * cp))

    out = pl.pallas_call(
        kernel,
        out_shape=jax.ShapeDtypeStruct((n, oh * ow, cp), jnp.bfloat16),
        grid_spec=pltpu.PrefetchScalarGridSpec(
            num_scalar_prefetch=0,
            grid=(n, cp // tn),
            in_specs=[
                pl.BlockSpec((1, hp, wp, cin_p), lambda i, j: (i, 0, 0, 0)),
                pl.BlockSpec((k * k, cin_p, tn), lambda i, j: (0, 0, j)),
                pl.BlockSpec((k * k, cin_p, tn), lambda i, j: (0, 0, j)),
            ],
            out_specs=pl.BlockSpec((1, oh * ow, tn), lambda i, j: (i, 0, j)),
        ),
        compiler_params=pltpu.CompilerParams(
            dimension_semantics=("parallel", "parallel")),
        cost_estimate=cost,
    )(xp, w1, w2)
    return out[:, :, :cout].reshape(n, oh, ow, cout)


# ------------------- im2col + fused matmul kernel (stride >= 2) --------------
def _pinet_matmul_kernel(p_ref, w1_ref, w2_ref, o_ref):
    """y1 = P@W1, y2 = P@W2 (bf16 operands, f32 acc); store y1*y2 + y1 (bf16)."""
    p = p_ref[...]
    y1 = jnp.dot(p, w1_ref[...], preferred_element_type=jnp.float32)
    y2 = jnp.dot(p, w2_ref[...], preferred_element_type=jnp.float32)
    o_ref[...] = (y1 * y2 + y1).astype(o_ref.dtype)


def _pick_tile_m(m):
    """Single block for small M; 128-row tiles (>=2 steps/core on dual-core
    v7x) up to 2K rows; 512-row tiles beyond (v5e/v6e ~85% HBM roofline).
    Prefer a tile that divides M so no M-pad copy is needed."""
    if m <= 256:
        return _round_up(m, 16)
    preferred = 128 if m <= 2048 else 512
    for tm in (preferred, preferred // 2, 64):
        if m % tm == 0:
            return tm
    return preferred


def _pinet_conv_im2col(x_nhwc, w1_hwio, w2_hwio, k, stride, pad):
    n, h, w, cin = x_nhwc.shape
    cout = w1_hwio.shape[-1]
    oh = (h + 2 * pad - k) // stride + 1
    ow = (w + 2 * pad - k) // stride + 1

    # bf16 BEFORE padding / patch extraction (halves patch HBM traffic).
    xp = jnp.pad(x_nhwc.astype(jnp.bfloat16),
                 ((0, 0), (pad, pad), (pad, pad), (0, 0)))
    cols = [xp[:, kh:kh + stride * oh:stride, kw:kw + stride * ow:stride, :]
            for kh in range(k) for kw in range(k)]
    patches = jnp.stack(cols, axis=3).reshape(n * oh * ow, k * k * cin)

    kd = k * k * cin
    kd_p = _round_up(kd, 16)          # bf16 sublane pack only (NOT 128)
    cp = _round_up(cout, 128)         # lane-dense output tiles
    tn = 128
    if kd_p != kd:
        patches = jnp.pad(patches, ((0, 0), (0, kd_p - kd)))

    def prep(w_hwio):
        wm = w_hwio.astype(jnp.bfloat16).reshape(kd, cout)
        return jnp.pad(wm, ((0, kd_p - kd), (0, cp - cout)))

    w1, w2 = prep(w1_hwio), prep(w2_hwio)

    m = n * oh * ow
    tm = _pick_tile_m(m)
    m_pad = _round_up(m, tm)
    if m_pad != m:
        patches = jnp.pad(patches, ((0, m_pad - m), (0, 0)))

    cost = pl.CostEstimate(
        flops=2 * 2 * m * kd_p * cp + 3 * m * cp,
        transcendentals=0,
        bytes_accessed=2 * (patches.size + w1.size + w2.size + m_pad * cp))

    out = pl.pallas_call(
        _pinet_matmul_kernel,
        out_shape=jax.ShapeDtypeStruct((m_pad, cp), jnp.bfloat16),
        grid_spec=pltpu.PrefetchScalarGridSpec(
            num_scalar_prefetch=0,
            # Cout innermost: the (large) patch tile stays resident across the
            # inner axis; only the small weight tile is re-fetched.
            grid=(m_pad // tm, cp // tn),
            in_specs=[
                pl.BlockSpec((tm, kd_p), lambda i, j: (i, 0)),
                pl.BlockSpec((kd_p, tn), lambda i, j: (0, j)),
                pl.BlockSpec((kd_p, tn), lambda i, j: (0, j)),
            ],
            out_specs=pl.BlockSpec((tm, tn), lambda i, j: (i, j)),
        ),
        compiler_params=pltpu.CompilerParams(
            dimension_semantics=("parallel", "parallel")),
        cost_estimate=cost,
    )(patches, w1, w2)
    return out[:m, :cout].reshape(n, oh, ow, cout)


# --------------------------------- public API --------------------------------
def pinet_conv2d(x_nchw, w1_oihw, w2_oihw, *, stride=1, padding=0):
    """PiNetConv2d forward (NCHW input, OIHW weights like nn.Conv2d, bias=False).

    Returns bf16 NCHW activations:  conv1(x) * conv2(x) + conv1(x).
    """
    k = w1_oihw.shape[-1]
    x = jnp.transpose(x_nchw, (0, 2, 3, 1))           # NCHW -> NHWC
    w1 = jnp.transpose(w1_oihw, (2, 3, 1, 0))         # OIHW -> HWIO
    w2 = jnp.transpose(w2_oihw, (2, 3, 1, 0))

    cin = x.shape[-1]
    hp, wp = x.shape[1] + 2 * padding, x.shape[2] + 2 * padding
    oh, ow = hp - k + 1, wp - k + 1
    cin_p = _round_up(max(cin, 8), 8)
    # Fused direct-conv path: stride 1 and the padded image + f32 accumulators
    # comfortably fit in VMEM (CIFAR-scale spatial dims).
    fused_ok = (stride == 1 and oh >= 1 and ow >= 1
                and hp * wp * cin_p * 2 <= (4 << 20)
                and oh * ow * 128 * 4 * 2 <= (8 << 20))
    if fused_ok:
        out = _pinet_conv_fused_s1(x, w1, w2, k, padding)
    else:
        # TODO(synk): fuse im2col for stride>=2 / large images as well (needs
        # strided in-kernel window loads or halo DMA); im2col stays JAX glue.
        out = _pinet_conv_im2col(x, w1, w2, k, stride, padding)
    return jnp.transpose(out, (0, 3, 1, 2))           # NHWC -> NCHW


# ------------------------- reference (for sanity) ----------------------------
def _ref_pinet_conv2d(x_nchw, w1_oihw, w2_oihw, stride, pad):
    conv = functools.partial(
        lax.conv_general_dilated, window_strides=(stride, stride),
        padding=[(pad, pad), (pad, pad)],
        dimension_numbers=('NCHW', 'OIHW', 'NCHW'))
    y1 = conv(x_nchw, w1_oihw)
    y2 = conv(x_nchw, w2_oihw)
    return y1 * y2 + y1


# ----------------------------------- main -------------------------------------
if __name__ == "__main__":
    key = jax.random.PRNGKey(0)
    kx, k1, k2, k3, k4 = jax.random.split(key, 5)

    # PiNetConv2d(4, 32, kernel_size=3, stride=1, padding=1) -- fused path.
    N, CIN, H, W = 2, 4, 16, 16
    COUT, K, S, P = 32, 3, 1, 1
    x = jax.random.normal(kx, (N, CIN, H, W), jnp.float32)
    std = 1.0 / float(CIN * K * K) ** 0.5
    w1 = jax.random.normal(k1, (COUT, CIN, K, K), jnp.float32) * std
    w2 = jax.random.normal(k2, (COUT, CIN, K, K), jnp.float32) * std

    fwd = jax.jit(functools.partial(pinet_conv2d, stride=S, padding=P))
    out = jax.block_until_ready(fwd(x, w1, w2))
    assert out.shape == (N, COUT, H, W), out.shape
    ref = jax.block_until_ready(_ref_pinet_conv2d(x, w1, w2, S, P))
    err = float(jnp.max(jnp.abs(out.astype(jnp.float32) - ref))
                / (jnp.max(jnp.abs(ref)) + 1e-6))
    assert err < 3e-2, f"stride-1 (fused) path error {err}"

    # PiNetConv2d(4, 16, kernel_size=4, stride=2, padding=1) -- im2col path.
    COUT2, K2, S2, P2 = 16, 4, 2, 1
    std2 = 1.0 / float(CIN * K2 * K2) ** 0.5
    w3 = jax.random.normal(k3, (COUT2, CIN, K2, K2), jnp.float32) * std2
    w4 = jax.random.normal(k4, (COUT2, CIN, K2, K2), jnp.float32) * std2
    fwd2 = jax.jit(functools.partial(pinet_conv2d, stride=S2, padding=P2))
    out2 = jax.block_until_ready(fwd2(x, w3, w4))
    assert out2.shape == (N, COUT2, 8, 8), out2.shape
    ref2 = jax.block_until_ready(_ref_pinet_conv2d(x, w3, w4, S2, P2))
    err2 = float(jnp.max(jnp.abs(out2.astype(jnp.float32) - ref2))
                 / (jnp.max(jnp.abs(ref2)) + 1e-6))
    assert err2 < 3e-2, f"stride-2 (im2col) path error {err2}"

    print("KERNEL_OK")
</pallas_src>

<mosaic_0001>
module attributes {stable_mosaic.version = 11 : i64} {
  func.func @_pinet_fused_conv_kernel(%arg0: i32, %arg1: i32, %arg2: memref<1x18x18x8xbf16, #tpu.memory_space<vmem>>, %arg3: memref<9x8x128xbf16, #tpu.memory_space<vmem>>, %arg4: memref<9x8x128xbf16, #tpu.memory_space<vmem>>, %arg5: memref<1x256x128xbf16, #tpu.memory_space<vmem>>) attributes {dimension_semantics = [#tpu.dimension_semantics<parallel>, #tpu.dimension_semantics<parallel>], iteration_bounds = array<i64: 2, 1>, scalar_prefetch = 0 : i64, scratch_operands = 0 : i64, tpu.core_type = #tpu.core_type<tc>, window_params = [{transform_indices = @transform_0, window_bounds = array<i64: 1, 18, 18, 8>}, {transform_indices = @transform_1, window_bounds = array<i64: 9, 8, 128>}, {transform_indices = @transform_2, window_bounds = array<i64: 9, 8, 128>}, {transform_indices = @transform_3, window_bounds = array<i64: 1, 256, 128>}]} {
    %c0 = arith.constant 0 : index
    %c0_0 = arith.constant 0 : index
    %c0_1 = arith.constant 0 : index
    %c0_2 = arith.constant 0 : index
    %0 = vector.load %arg2[%c0, %c0_0, %c0_1, %c0_2] : memref<1x18x18x8xbf16, #tpu.memory_space<vmem>>, vector<1x18x18x8xbf16>
    %1 = vector.shape_cast %0 : vector<1x18x18x8xbf16> to vector<18x18x8xbf16>
    %cst = arith.constant 0.000000e+00 : f32
    %2 = vector.broadcast %cst : f32 to vector<256x128xf32>
    %cst_3 = arith.constant 0.000000e+00 : f32
    %3 = vector.broadcast %cst_3 : f32 to vector<256x128xf32>
    %4 = vector.extract_strided_slice %1 {offsets = [0, 0, 0], sizes = [16, 16, 8], strides = [1, 1, 1]} : vector<18x18x8xbf16> to vector<16x16x8xbf16>
    %5 = vector.shape_cast %4 : vector<16x16x8xbf16> to vector<256x8xbf16>
    %c0_4 = arith.constant 0 : index
    %c0_5 = arith.constant 0 : index
    %c0_6 = arith.constant 0 : index
    %6 = vector.load %arg3[%c0_4, %c0_5, %c0_6] : memref<9x8x128xbf16, #tpu.memory_space<vmem>>, vector<1x8x128xbf16>
    %7 = vector.shape_cast %6 : vector<1x8x128xbf16> to vector<8x128xbf16>
    %cst_7 = arith.constant dense<0.000000e+00> : vector<256x128xf32>
    %8 = tpu.matmul %5, %7, %cst_7 {dimension_numbers = #tpu.dot_dimension_numbers<[1], [0], [0], [1], [0, 0, 1, 1], [], []>} : vector<256x8xbf16>, vector<8x128xbf16>, vector<256x128xf32> -> vector<256x128xf32>
    %9 = arith.addf %2, %8 : vector<256x128xf32>
    %c0_8 = arith.constant 0 : index
    %c0_9 = arith.constant 0 : index
    %c0_10 = arith.constant 0 : index
    %10 = vector.load %arg4[%c0_8, %c0_9, %c0_10] : memref<9x8x128xbf16, #tpu.memory_space<vmem>>, vector<1x8x128xbf16>
    %11 = vector.shape_cast %10 : vector<1x8x128xbf16> to vector<8x128xbf16>
    %cst_11 = arith.constant dense<0.000000e+00> : vector<256x128xf32>
    %12 = tpu.matmul %5, %11, %cst_11 {dimension_numbers = #tpu.dot_dimension_numbers<[1], [0], [0], [1], [0, 0, 1, 1], [], []>} : vector<256x8xbf16>, vector<8x128xbf16>, vector<256x128xf32> -> vector<256x128xf32>
    %13 = arith.addf %3, %12 : vector<256x128xf32>
    %14 = vector.extract_strided_slice %1 {offsets = [0, 1, 0], sizes = [16, 16, 8], strides = [1, 1, 1]} : vector<18x18x8xbf16> to vector<16x16x8xbf16>
    %15 = vector.shape_cast %14 : vector<16x16x8xbf16> to vector<256x8xbf16>
    %c1 = arith.constant 1 : index
    %c0_12 = arith.constant 0 : index
    %c0_13 = arith.constant 0 : index
    %16 = vector.load %arg3[%c1, %c0_12, %c0_13] : memref<9x8x128xbf16, #tpu.memory_space<vmem>>, vector<1x8x128xbf16>
    %17 = vector.shape_cast %16 : vector<1x8x128xbf16> to vector<8x128xbf16>
    %cst_14 = arith.constant dense<0.000000e+00> : vector<256x128xf32>
    %18 = tpu.matmul %15, %17, %cst_14 {dimension_numbers = #tpu.dot_dimension_numbers<[1], [0], [0], [1], [0, 0, 1, 1], [], []>} : vector<256x8xbf16>, vector<8x128xbf16>, vector<256x128xf32> -> vector<256x128xf32>
    %19 = arith.addf %9, %18 : vector<256x128xf32>
    %c1_15 = arith.constant 1 : index
    %c0_16 = arith.constant 0 : index
    %c0_17 = arith.constant 0 : index
    %20 = vector.load %arg4[%c1_15, %c0_16, %c0_17] : memref<9x8x128xbf16, #tpu.memory_space<vmem>>, vector<1x8x128xbf16>
    %21 = vector.shape_cast %20 : vector<1x8x128xbf16> to vector<8x128xbf16>
    %cst_18 = arith.constant dense<0.000000e+00> : vector<256x128xf32>
    %22 = tpu.matmul %15, %21, %cst_18 {dimension_numbers = #tpu.dot_dimension_numbers<[1], [0], [0], [1], [0, 0, 1, 1], [], []>} : vector<256x8xbf16>, vector<8x128xbf16>, vector<256x128xf32> -> vector<256x128xf32>
    %23 = arith.addf %13, %22 : vector<256x128xf32>
    %24 = vector.extract_strided_slice %1 {offsets = [0, 2, 0], sizes = [16, 16, 8], strides = [1, 1, 1]} : vector<18x18x8xbf16> to vector<16x16x8xbf16>
    %25 = vector.shape_cast %24 : vector<16x16x8xbf16> to vector<256x8xbf16>
    %c2 = arith.constant 2 : index
    %c0_19 = arith.constant 0 : index
    %c0_20 = arith.constant 0 : index
    %26 = vector.load %arg3[%c2, %c0_19, %c0_20] : memref<9x8x128xbf16, #tpu.memory_space<vmem>>, vector<1x8x128xbf16>
    %27 = vector.shape_cast %26 : vector<1x8x128xbf16> to vector<8x128xbf16>
    %cst_21 = arith.constant dense<0.000000e+00> : vector<256x128xf32>
    %28 = tpu.matmul %25, %27, %cst_21 {dimension_numbers = #tpu.dot_dimension_numbers<[1], [0], [0], [1], [0, 0, 1, 1], [], []>} : vector<256x8xbf16>, vector<8x128xbf16>, vector<256x128xf32> -> vector<256x128xf32>
    %29 = arith.addf %19, %28 : vector<256x128xf32>
    %c2_22 = arith.constant 2 : index
    %c0_23 = arith.constant 0 : index
    %c0_24 = arith.constant 0 : index
    %30 = vector.load %arg4[%c2_22, %c0_23, %c0_24] : memref<9x8x128xbf16, #tpu.memory_space<vmem>>, vector<1x8x128xbf16>
    %31 = vector.shape_cast %30 : vector<1x8x128xbf16> to vector<8x128xbf16>
    %cst_25 = arith.constant dense<0.000000e+00> : vector<256x128xf32>
    %32 = tpu.matmul %25, %31, %cst_25 {dimension_numbers = #tpu.dot_dimension_numbers<[1], [0], [0], [1], [0, 0, 1, 1], [], []>} : vector<256x8xbf16>, vector<8x128xbf16>, vector<256x128xf32> -> vector<256x128xf32>
    %33 = arith.addf %23, %32 : vector<256x128xf32>
    %34 = vector.extract_strided_slice %1 {offsets = [1, 0, 0], sizes = [16, 16, 8], strides = [1, 1, 1]} : vector<18x18x8xbf16> to vector<16x16x8xbf16>
    %35 = vector.shape_cast %34 : vector<16x16x8xbf16> to vector<256x8xbf16>
    %c3 = arith.constant 3 : index
    %c0_26 = arith.constant 0 : index
    %c0_27 = arith.constant 0 : index
    %36 = vector.load %arg3[%c3, %c0_26, %c0_27] : memref<9x8x128xbf16, #tpu.memory_space<vmem>>, vector<1x8x128xbf16>
    %37 = vector.shape_cast %36 : vector<1x8x128xbf16> to vector<8x128xbf16>
    %cst_28 = arith.constant dense<0.000000e+00> : vector<256x128xf32>
    %38 = tpu.matmul %35, %37, %cst_28 {dimension_numbers = #tpu.dot_dimension_numbers<[1], [0], [0], [1], [0, 0, 1, 1], [], []>} : vector<256x8xbf16>, vector<8x128xbf16>, vector<256x128xf32> -> vector<256x128xf32>
    %39 = arith.addf %29, %38 : vector<256x128xf32>
    %c3_29 = arith.constant 3 : index
    %c0_30 = arith.constant 0 : index
    %c0_31 = arith.constant 0 : index
    %40 = vector.load %arg4[%c3_29, %c0_30, %c0_31] : memref<9x8x128xbf16, #tpu.memory_space<vmem>>, vector<1x8x128xbf16>
    %41 = vector.shape_cast %40 : vector<1x8x128xbf16> to vector<8x128xbf16>
    %cst_32 = arith.constant dense<0.000000e+00> : vector<256x128xf32>
    %42 = tpu.matmul %35, %41, %cst_32 {dimension_numbers = #tpu.dot_dimension_numbers<[1], [0], [0], [1], [0, 0, 1, 1], [], []>} : vector<256x8xbf16>, vector<8x128xbf16>, vector<256x128xf32> -> vector<256x128xf32>
    %43 = arith.addf %33, %42 : vector<256x128xf32>
    %44 = vector.extract_strided_slice %1 {offsets = [1, 1, 0], sizes = [16, 16, 8], strides = [1, 1, 1]} : vector<18x18x8xbf16> to vector<16x16x8xbf16>
    %45 = vector.shape_cast %44 : vector<16x16x8xbf16> to vector<256x8xbf16>
    %c4 = arith.constant 4 : index
    %c0_33 = arith.constant 0 : index
    %c0_34 = arith.constant 0 : index
    %46 = vector.load %arg3[%c4, %c0_33, %c0_34] : memref<9x8x128xbf16, #tpu.memory_space<vmem>>, vector<1x8x128xbf16>
    %47 = vector.shape_cast %46 : vector<1x8x128xbf16> to vector<8x128xbf16>
    %cst_35 = arith.constant dense<0.000000e+00> : vector<256x128xf32>
    %48 = tpu.matmul %45, %47, %cst_35 {dimension_numbers = #tpu.dot_dimension_numbers<[1], [0], [0], [1], [0, 0, 1, 1], [], []>} : vector<256x8xbf16>, vector<8x128xbf16>, vector<256x128xf32> -> vector<256x128xf32>
    %49 = arith.addf %39, %48 : vector<256x128xf32>
    %c4_36 = arith.constant 4 : index
    %c0_37 = arith.constant 0 : index
    %c0_38 = arith.constant 0 : index
    %50 = vector.load %arg4[%c4_36, %c0_37, %c0_38] : memref<9x8x128xbf16, #tpu.memory_space<vmem>>, vector<1x8x128xbf16>
    %51 = vector.shape_cast %50 : vector<1x8x128xbf16> to vector<8x128xbf16>
    %cst_39 = arith.constant dense<0.000000e+00> : vector<256x128xf32>
    %52 = tpu.matmul %45, %51, %cst_39 {dimension_numbers = #tpu.dot_dimension_numbers<[1], [0], [0], [1], [0, 0, 1, 1], [], []>} : vector<256x8xbf16>, vector<8x128xbf16>, vector<256x128xf32> -> vector<256x128xf32>
    %53 = arith.addf %43, %52 : vector<256x128xf32>
    %54 = vector.extract_strided_slice %1 {offsets = [1, 2, 0], sizes = [16, 16, 8], strides = [1, 1, 1]} : vector<18x18x8xbf16> to vector<16x16x8xbf16>
    %55 = vector.shape_cast %54 : vector<16x16x8xbf16> to vector<256x8xbf16>
    %c5 = arith.constant 5 : index
    %c0_40 = arith.constant 0 : index
    %c0_41 = arith.constant 0 : index
    %56 = vector.load %arg3[%c5, %c0_40, %c0_41] : memref<9x8x128xbf16, #tpu.memory_space<vmem>>, vector<1x8x128xbf16>
    %57 = vector.shape_cast %56 : vector<1x8x128xbf16> to vector<8x128xbf16>
    %cst_42 = arith.constant dense<0.000000e+00> : vector<256x128xf32>
    %58 = tpu.matmul %55, %57, %cst_42 {dimension_numbers = #tpu.dot_dimension_numbers<[1], [0], [0], [1], [0, 0, 1, 1], [], []>} : vector<256x8xbf16>, vector<8x128xbf16>, vector<256x128xf32> -> vector<256x128xf32>
    %59 = arith.addf %49, %58 : vector<256x128xf32>
    %c5_43 = arith.constant 5 : index
    %c0_44 = arith.constant 0 : index
    %c0_45 = arith.constant 0 : index
    %60 = vector.load %arg4[%c5_43, %c0_44, %c0_45] : memref<9x8x128xbf16, #tpu.memory_space<vmem>>, vector<1x8x128xbf16>
    %61 = vector.shape_cast %60 : vector<1x8x128xbf16> to vector<8x128xbf16>
    %cst_46 = arith.constant dense<0.000000e+00> : vector<256x128xf32>
    %62 = tpu.matmul %55, %61, %cst_46 {dimension_numbers = #tpu.dot_dimension_numbers<[1], [0], [0], [1], [0, 0, 1, 1], [], []>} : vector<256x8xbf16>, vector<8x128xbf16>, vector<256x128xf32> -> vector<256x128xf32>
    %63 = arith.addf %53, %62 : vector<256x128xf32>
    %64 = vector.extract_strided_slice %1 {offsets = [2, 0, 0], sizes = [16, 16, 8], strides = [1, 1, 1]} : vector<18x18x8xbf16> to vector<16x16x8xbf16>
    %65 = vector.shape_cast %64 : vector<16x16x8xbf16> to vector<256x8xbf16>
    %c6 = arith.constant 6 : index
    %c0_47 = arith.constant 0 : index
    %c0_48 = arith.constant 0 : index
    %66 = vector.load %arg3[%c6, %c0_47, %c0_48] : memref<9x8x128xbf16, #tpu.memory_space<vmem>>, vector<1x8x128xbf16>
    %67 = vector.shape_cast %66 : vector<1x8x128xbf16> to vector<8x128xbf16>
    %cst_49 = arith.constant dense<0.000000e+00> : vector<256x128xf32>
    %68 = tpu.matmul %65, %67, %cst_49 {dimension_numbers = #tpu.dot_dimension_numbers<[1], [0], [0], [1], [0, 0, 1, 1], [], []>} : vector<256x8xbf16>, vector<8x128xbf16>, vector<256x128xf32> -> vector<256x128xf32>
    %69 = arith.addf %59, %68 : vector<256x128xf32>
    %c6_50 = arith.constant 6 : index
    %c0_51 = arith.constant 0 : index
    %c0_52 = arith.constant 0 : index
    %70 = vector.load %arg4[%c6_50, %c0_51, %c0_52] : memref<9x8x128xbf16, #tpu.memory_space<vmem>>, vector<1x8x128xbf16>
    %71 = vector.shape_cast %70 : vector<1x8x128xbf16> to vector<8x128xbf16>
    %cst_53 = arith.constant dense<0.000000e+00> : vector<256x128xf32>
    %72 = tpu.matmul %65, %71, %cst_53 {dimension_numbers = #tpu.dot_dimension_numbers<[1], [0], [0], [1], [0, 0, 1, 1], [], []>} : vector<256x8xbf16>, vector<8x128xbf16>, vector<256x128xf32> -> vector<256x128xf32>
    %73 = arith.addf %63, %72 : vector<256x128xf32>
    %74 = vector.extract_strided_slice %1 {offsets = [2, 1, 0], sizes = [16, 16, 8], strides = [1, 1, 1]} : vector<18x18x8xbf16> to vector<16x16x8xbf16>
    %75 = vector.shape_cast %74 : vector<16x16x8xbf16> to vector<256x8xbf16>
    %c7 = arith.constant 7 : index
    %c0_54 = arith.constant 0 : index
    %c0_55 = arith.constant 0 : index
    %76 = vector.load %arg3[%c7, %c0_54, %c0_55] : memref<9x8x128xbf16, #tpu.memory_space<vmem>>, vector<1x8x128xbf16>
    %77 = vector.shape_cast %76 : vector<1x8x128xbf16> to vector<8x128xbf16>
    %cst_56 = arith.constant dense<0.000000e+00> : vector<256x128xf32>
    %78 = tpu.matmul %75, %77, %cst_56 {dimension_numbers = #tpu.dot_dimension_numbers<[1], [0], [0], [1], [0, 0, 1, 1], [], []>} : vector<256x8xbf16>, vector<8x128xbf16>, vector<256x128xf32> -> vector<256x128xf32>
    %79 = arith.addf %69, %78 : vector<256x128xf32>
    %c7_57 = arith.constant 7 : index
    %c0_58 = arith.constant 0 : index
    %c0_59 = arith.constant 0 : index
    %80 = vector.load %arg4[%c7_57, %c0_58, %c0_59] : memref<9x8x128xbf16, #tpu.memory_space<vmem>>, vector<1x8x128xbf16>
    %81 = vector.shape_cast %80 : vector<1x8x128xbf16> to vector<8x128xbf16>
    %cst_60 = arith.constant dense<0.000000e+00> : vector<256x128xf32>
    %82 = tpu.matmul %75, %81, %cst_60 {dimension_numbers = #tpu.dot_dimension_numbers<[1], [0], [0], [1], [0, 0, 1, 1], [], []>} : vector<256x8xbf16>, vector<8x128xbf16>, vector<256x128xf32> -> vector<256x128xf32>
    %83 = arith.addf %73, %82 : vector<256x128xf32>
    %84 = vector.extract_strided_slice %1 {offsets = [2, 2, 0], sizes = [16, 16, 8], strides = [1, 1, 1]} : vector<18x18x8xbf16> to vector<16x16x8xbf16>
    %85 = vector.shape_cast %84 : vector<16x16x8xbf16> to vector<256x8xbf16>
    %c8 = arith.constant 8 : index
    %c0_61 = arith.constant 0 : index
    %c0_62 = arith.constant 0 : index
    %86 = vector.load %arg3[%c8, %c0_61, %c0_62] : memref<9x8x128xbf16, #tpu.memory_space<vmem>>, vector<1x8x128xbf16>
    %87 = vector.shape_cast %86 : vector<1x8x128xbf16> to vector<8x128xbf16>
    %cst_63 = arith.constant dense<0.000000e+00> : vector<256x128xf32>
    %88 = tpu.matmul %85, %87, %cst_63 {dimension_numbers = #tpu.dot_dimension_numbers<[1], [0], [0], [1], [0, 0, 1, 1], [], []>} : vector<256x8xbf16>, vector<8x128xbf16>, vector<256x128xf32> -> vector<256x128xf32>
    %89 = arith.addf %79, %88 : vector<256x128xf32>
    %c8_64 = arith.constant 8 : index
    %c0_65 = arith.constant 0 : index
    %c0_66 = arith.constant 0 : index
    %90 = vector.load %arg4[%c8_64, %c0_65, %c0_66] : memref<9x8x128xbf16, #tpu.memory_space<vmem>>, vector<1x8x128xbf16>
    %91 = vector.shape_cast %90 : vector<1x8x128xbf16> to vector<8x128xbf16>
    %cst_67 = arith.constant dense<0.000000e+00> : vector<256x128xf32>
    %92 = tpu.matmul %85, %91, %cst_67 {dimension_numbers = #tpu.dot_dimension_numbers<[1], [0], [0], [1], [0, 0, 1, 1], [], []>} : vector<256x8xbf16>, vector<8x128xbf16>, vector<256x128xf32> -> vector<256x128xf32>
    %93 = arith.addf %83, %92 : vector<256x128xf32>
    %94 = arith.mulf %89, %93 : vector<256x128xf32>
    %95 = arith.addf %94, %89 : vector<256x128xf32>
    %96 = arith.truncf %95 : vector<256x128xf32> to vector<256x128xbf16>
    %c0_68 = arith.constant 0 : index
    %c0_69 = arith.constant 0 : index
    %c0_70 = arith.constant 0 : index
    %97 = vector.load %arg5[%c0_68, %c0_69, %c0_70] : memref<1x256x128xbf16, #tpu.memory_space<vmem>>, vector<1x256x128xbf16>
    %98 = vector.shape_cast %97 : vector<1x256x128xbf16> to vector<256x128xbf16>
    %99 = vector.shape_cast %96 : vector<256x128xbf16> to vector<1x256x128xbf16>
    tpu.vector_store %arg5[%c0_68, %c0_69, %c0_70], %99 {strides = array<i32>} : memref<1x256x128xbf16, #tpu.memory_space<vmem>>, vector<1x256x128xbf16>,
    return
  }
  func.func @transform_0(%arg0: i32, %arg1: i32) -> (i32, i32, i32, i32) {
    %c0_i32 = arith.constant 0 : i32
    %c0_i32_0 = arith.constant 0 : i32
    %c0_i32_1 = arith.constant 0 : i32
    %c0_i32_2 = arith.constant 0 : i32
    return %arg0, %c0_i32, %c0_i32_0, %c0_i32_1 : i32, i32, i32, i32
  }
  func.func @transform_1(%arg0: i32, %arg1: i32) -> (i32, i32, i32) {
    %c0_i32 = arith.constant 0 : i32
    %c0_i32_0 = arith.constant 0 : i32
    %c0_i32_1 = arith.constant 0 : i32
    return %c0_i32, %c0_i32_0, %arg1 : i32, i32, i32
  }
  func.func @transform_2(%arg0: i32, %arg1: i32) -> (i32, i32, i32) {
    %c0_i32 = arith.constant 0 : i32
    %c0_i32_0 = arith.constant 0 : i32
    %c0_i32_1 = arith.constant 0 : i32
    return %c0_i32, %c0_i32_0, %arg1 : i32, i32, i32
  }
  func.func @transform_3(%arg0: i32, %arg1: i32) -> (i32, i32, i32) {
    %c0_i32 = arith.constant 0 : i32
    %c0_i32_0 = arith.constant 0 : i32
    return %arg0, %c0_i32, %arg1 : i32, i32, i32
  }
}

</mosaic_0001>

<bundles_post_ra>
// kernel: pinet_conv2d.1
= control target key start
LH: loop header
LB: loop body
LE: loop exit
PB: predicated region body
PF: predicated region fallthrough
CT: control target
= control target key end

     0   :  { %8 = vsyncpa [#allocation3], 0  ;;  %s9518_s0 = inlined_call_operand.vmem [shape: bf16[2,18,18,8], index: 0, kind: input, shape index: {}]   ;;  %s9519_s1 = inlined_call_operand.vmem [shape: bf16[9,8,128], index: 1, kind: input, shape index: {}]   ;;  %s9520_s2 = inlined_call_operand.vmem [shape: bf16[9,8,128], index: 2, kind: input, shape index: {}]   ;;  %s9521_s3 = inlined_call_operand.hbm [shape: bf16[2,256,128], index: 3, kind: output, shape index: {}]  }
   0x1   :  { %10 = vsyncpa [#allocation3 + $0x1], 0  ;;  %s6654_s12 = smov 0   ;;  %s6656_s13 = smov 0  }
   0x2   :  { %s6658_s14 = smov 0   ;;  %s6660_s15 = smov 0  }
   0x3   :  { %s6662_s16 = smov 0   ;;  %s6664_s17 = smov 0  }
   0x4 LB: > { %s4991_s18 = sadd.s32 4294967295, %s6629_s17   ;;  %s4992_s19 = sadd.s32 4294967294, %s6629_s17   ;;  %s6629_s17 = sphi %s6664_s17, %s16_s17   ;;  %s6625_s16 = sphi %s6662_s16, %s10170_s16   ;;  %s6621_s15 = sphi %s6660_s15, %s10169_s15   ;;  %s6617_s14 = sphi %s6658_s14, %s10168_s14   ;;  %s6613_s13 = sphi %s6656_s13, %s10167_s13   ;;  %s6609_s12 = sphi %s6654_s12, %s10166_s12  }
   0x5   : > { %s28_s20 = sadd.s32 1, %s6625_s16  ;;  %s115_s21 = sadd.s32 1, %s6617_s14 }
   0x6   : > { %p30_p0 = scmp.ge.s32.totalorder %s28_s20, 2  ;;  %p125_p1 = scmp.ne.s32.totalorder %s6617_s14, %s6613_s13 }
   0x7   : > { %p126_p2 = scmp.eq.s32.totalorder %s4991_s18, 1  ;;  %p131_p3 = scmp.ne.s32.totalorder %s6613_s13, %s6609_s12 }
   0x8   : > { %s10172_s20 = smov (%p30_p0, %s28_s20), 0  ;;  %p132_p5 = scmp.eq.s32.totalorder %s4992_s19, 1 }
   0x9   : > { %p6694_p4 = por %p126_p2, %p125_p1  ;;  %s110_s23 = ssub.s32 %s6625_s16, %s10172_s20 }
   0xa   : > { %p4997_p6 = scmp.ge.s32.totalorder %s6629_s17, 1  ;;  %p113_p7 = scmp.eq.s32.totalorder %s110_s23, 0 }
   0xb   : > { %p6701_p8 = por %p132_p5, %p131_p3  ;;  %p172_p9 = scmp.lt.s32.totalorder %s6629_s17, 3 }
   0xc   : > { %s6707_s25 = scalar_select %p113_p7, %s6617_s14, %s115_s21  }
   0xd   : > { %p173_p10 = pnand %p4997_p6, %p172_p9 }
   0xf   : > { %176 = sbr.rel (%p173_p10) target bundleno = 842 (0x34a), region = 32 }
  0x14   : > { %v272_v0 = vld [vmem:[%s9519_s1] sm:$0xf]  ;;  %vm760_vm0 = vcmask 1043456   ;;  %p204_p11 = scmp.lt.s32.totalorder %s6621_s15, 1  ;;  %v5000_v2 = vld [vmem:[%s9519_s1 + $0x4] sm:$0xf] }
  0x15   : > { %6460 = vmatprep.subr.msk.bf16.mxu1 %vm760_vm0, %v272_v0  ;;  %v1054_v1 = vsel %vm760_vm0, %v272_v0, 0  ;;  %6459 = vmatprep.subr.msk.bf16.mxu0 %vm760_vm0, %v5000_v2  ;;  %v762_v3 = vsel %vm760_vm0, %v5000_v2, 0  ;;  %v5065_v4 = vld [vmem:[%s9520_s2 + $0x4] sm:$0xf]  ;;  %v273_v5 = vld [vmem:[%s9520_s2] sm:$0xf] }
  0x16   : > { %5882 = vmatpush3.bf16.msra.mxu1 %v1054_v1  ;;  %s205_s30 = scalar_select %p204_p11, %s6621_s15, 1  ;;  %5848 = vmatpush3.bf16.msra.mxu0 %v762_v3  ;;  %v5147_v6 = vld [vmem:[%s9520_s2 + $0x8] sm:$0xf]  ;;  %vm711_vm1 = vcmask 64512   ;;  %vm274_vm2 = vsmask.f32 3328 }
  0x17   : > { %6461 = vmatprep.subr.msk.bf16.mxu0 %vm760_vm0, %v5065_v4  ;;  %6462 = vmatprep.subr.msk.bf16.mxu1 %vm760_vm0, %v273_v5  ;;  %vm275_vm3 = vsmask.f32 7440  ;;  %v6738_v7 = vsel %vm760_vm0, %v5065_v4, 0  ;;  %v1384_v8 = vsel %vm760_vm0, %v273_v5, 0  ;;  %v6742_v9 = vsel %vm760_vm0, %v5147_v6, 0  ;;  %s5445_s9 = sshll.u32 %s6621_s15, 11 }
  0x18   : > { %s6477_s8 = smul.u32 216, %s205_s30  ;;  %vm6822_vm4 = vmor %vm274_vm2, %vm275_vm3  ;;  %v9683_v48 = vmov 0  ;;  %vm1563_vm5 = vcmask 1042432   ;;  %vm1564_vm6 = vcmask 1046532   ;;  %s9465_s21 = scalar_lea.hbm %s9521_s3, %s5445_s9 }
  0x19   : > { %v9684_v48 = vsel %vm6822_vm4, 4294967295, %v9683_v48  ;;  %vm7224_vm7 = vmor %vm1563_vm5, %vm1564_vm6  ;;  %s6631_s26 = smov [#allocation2]  }
  0x1a   : > { %s6735_s19 = scalar_lea.vmem %s9518_s0, %s6477_s8  ;;  %9685 = vst [vmem:[#allocation10_spill] sm:$0xff] %v9684_v48  ;;  %s6557_s27 = sshll.u32 %s6631_s26, 4  ;;  %s6558_s27 = int_to_ptr.vmem [resolvable:$false] %s6557_s27 }
  0x1b   : > { %v6745_v10 = vld [vmem:[%s6735_s19] sm:$0xf]  ;;  %v6748_v11 = vld [vmem:[%s6735_s19 + $0x4] sm:$0xf]  ;;  %v6751_v12 = vld [vmem:[%s6735_s19 + $0xc] sm:$0xf] }
  0x1c   : > { %v278_v13 = vshrl.u32 %v6745_v10, 16  ;;  %v281_v14 = vshll.u32 %v6745_v10, 16  ;;  %v291_v15 = vshrl.u32 %v6748_v11, 16  ;;  %v6758_v16 = vcombine.low %v6745_v10, %v6748_v11  ;;  %v6761_v17 = vld [vmem:[%s6735_s19 + $0x10] sm:$0xf]  ;;  %s6559_s28 = scalar_lea.vmem %s6558_s27, 4096 }
  0x1d   : > { %v9523_v19 = vrot.slane %v6748_v11, 5  ;;  %v302_v20 = vshrl.u32 %v6751_v12, 16  ;;  %v305_v21 = vshll.u32 %v6751_v12, 16  ;;  %v6768_v22 = vld [vmem:[%s6735_s19 + $0x18] sm:$0xf]  ;;  %v315_v23 = vshrl.u32 %v6761_v17, 16 }
  0x1e   : > { %9678 = vst [vmem:[#allocation5_spill] sm:$0xff] %v6768_v22  ;;  %5883 = vmatprep.mubr.msk.bf16.mxu1 %vm711_vm1, %v6758_v16  ;;  %v6775_v24 = vcombine.low %v6751_v12, %v6761_v17  ;;  %v9522_v26 = vrot.slane %v6761_v17, 5  ;;  %v6780_v27 = vld [vmem:[%s6735_s19 + $0x1c] sm:$0xf]  ;;  %v326_v29 = vshrl.u32 %v6768_v22, 16  ;;  %v329_v30 = vshll.u32 %v6768_v22, 16 }
  0x1f   : > { %9679 = vst [vmem:[#allocation6_spill] sm:$0xff] %v6780_v27  ;;  %v6784_v28 = vrot.slane %v9523_v19, 4  ;;  %v339_v31 = vshrl.u32 %v6780_v27, 16  ;;  %v6790_v32 = vld [vmem:[%s6735_s19 + $0x8] sm:$0x1]  ;;  %v6800_v34 = vcombine.low %v6768_v22, %v6780_v27  ;;  %v280_v35 = vrot.slane %v278_v13, 4 }
  0x20   : > { %5884 = vmatmul.mubr.msk.bf16.vlgmr.msra.gmra.mxu1 %vm711_vm1, %v6775_v24  ;;  %v6796_v33 = vrot.slane %v9522_v26, 4  ;;  %v283_v36 = vrot.slane %v281_v14, 5  ;;  %v6803_v37 = vld [vmem:[%s6735_s19 + $0x24] sm:$0xf]  ;;  %v287_v38 = vshll.u32 %v6748_v11, 16  ;;  %v293_v39 = vrot.slane %v291_v15, 4 }
  0x21   : > { %9680 = vst [vmem:[#allocation7_spill] sm:$0xff] %v6800_v34  ;;  %9681 = vst [vmem:[#allocation8_spill] sm:$0xff] %v6803_v37  ;;  %v297_v40 = vshll.u32 %v6790_v32, 16  ;;  %v6809_v42 = vld [vmem:[%s6735_s19 + $0x28] sm:$0xf]  ;;  %5950 = vmatpush3.bf16.msra.mxu1 %v1384_v8  ;;  %5887 = vmatprep.mubr.msk.bf16.mxu1 %vm711_vm1, %v6800_v34  ;;  %v350_v44 = vshrl.u32 %v6803_v37, 16 }
  0x22   : > { %9682 = vst [vmem:[#allocation9_spill] sm:$0xff] %v6809_v42  ;;  %v284_v43 = vor.u32 %v283_v36, %v280_v35  ;;  %v353_v45 = vshll.u32 %v6803_v37, 16  ;;  %v363_v46 = vshrl.u32 %v6809_v42, 16  ;;  %v6817_v47 = vld [vmem:[%s6735_s19 + $0x14] sm:$0x1]  ;;  %6464 = vmatprep.subr.msk.bf16.mxu1 %vm760_vm0, %v5147_v6  ;;  %v289_v49 = vrot.slane %v287_v38, 5 }
  0x23   : > { %v299_v50 = vrot.slane %v297_v40, 5  ;;  %v6828_v51 = vcombine.low %v6803_v37, %v6809_v42  ;;  %v304_v52 = vrot.slane %v302_v20, 4  ;;  %v6831_v53 = vld [vmem:[%s6735_s19 + $0x30] sm:$0xf]  ;;  %v307_v55 = vrot.slane %v305_v21, 5 }
  0x24   : > { %9687 = vst [vmem:[#allocation12_spill] sm:$0xff] %v6831_v53  ;;  %v285_v54 = vrot.slane %v284_v43, 4  ;;  %v311_v56 = vshll.u32 %v6761_v17, 16  ;;  %v317_v57 = vrot.slane %v315_v23, 4  ;;  %v6835_v58 = vld [vmem:[%s6735_s19 + $0x34] sm:$0xf]  ;;  %v294_v59 = vor.u32 %v293_v39, %v289_v49 }
  0x25   : > { %9686 = vst [vmem:[#allocation11_spill] sm:$0xff] %v6828_v51  ;;  %9688 = vst [vmem:[#allocation13_spill] sm:$0xff] %v6835_v58  ;;  %v321_v60 = vshll.u32 %v6817_v47, 16  ;;  %v374_v62 = vshrl.u32 %v6831_v53, 16  ;;  %v308_v0 = vor.u32 %v307_v55, %v304_v52  ;;  %v377_v2 = vshll.u32 %v6831_v53, 16 }
  0x26   : > { %v290_v63 = vsel %vm6822_vm4, %v285_v54, %v289_v49  ;;  %v313_v1 = vrot.slane %v311_v56, 5  ;;  %v6844_v3 = vld [vmem:[%s6735_s19 + $0x20] sm:$0x1]  ;;  %v295_v4 = vrot.slane %v294_v59, 4  ;;  %v387_v6 = vshrl.u32 %v6835_v58, 16 }
  0x27   : > { %9689 = vst [vmem:[#allocation14_spill] sm:$0xff] %v6844_v3  ;;  %v323_v5 = vrot.slane %v321_v60, 5  ;;  %v6849_v8 = vcombine.low %v6831_v53, %v6835_v58  ;;  %v309_v13 = vrot.slane %v308_v0, 4  ;;  %v328_v15 = vrot.slane %v326_v29, 4  ;;  %v6854_v21 = vld [vmem:[%s6735_s19 + $0x3c] sm:$0xf] }
  0x28   : > { %5888 = vmatmul.mubr.msk.bf16.gmra.mxu1 %vm711_vm1, %v6828_v51  ;;  %v318_v14 = vor.u32 %v317_v57, %v313_v1  ;;  %v331_v20 = vrot.slane %v329_v30, 5  ;;  %v300_v23 = vsel %vm6822_vm4, %v295_v4, %v299_v50  ;;  %v335_v35 = vshll.u32 %v6780_v27, 16  ;;  %v6863_v39 = vld [vmem:[%s6735_s19 + $0x40] sm:$0xf]  ;;  %v6884_v60 = vld [vmem:[%s6735_s19 + $0x48] sm:$0xf] }
  0x29   : > { %9690 = vst [vmem:[#allocation15_spill] sm:$0xff] %v6849_v8  ;;  %5891 = vmatprep.mubr.msk.bf16.mxu1 %vm711_vm1, %v6849_v8  ;;  %v341_v36 = vrot.slane %v339_v31, 4  ;;  %v345_v38 = vshll.u32 %v6844_v3, 16  ;;  %v6865_v40 = vcombine.low %v290_v63, %v300_v23  ;;  %v314_v29 = vsel %vm6822_vm4, %v309_v13, %v313_v1  ;;  %v6872_v31 = vld [vmem:[%s6735_s19 + $0x2c] sm:$0x1] }
  0x2a   : > { %v319_v30 = vrot.slane %v318_v14, 4  ;;  %v332_v43 = vor.u32 %v331_v20, %v328_v15  ;;  %v337_v49 = vrot.slane %v335_v35, 5  ;;  %v398_v52 = vshrl.u32 %v6854_v21, 16  ;;  %9691 = vst [vmem:[#allocation16_spill] sm:$0xff] %v6872_v31  ;;  %v6889_v13 = vld [vmem:[%s6735_s19 + $0x4c] sm:$0xf] }
  0x2b   : > { %v347_v50 = vrot.slane %v345_v38, 5  ;;  %v401_v54 = vshll.u32 %v6854_v21, 16  ;;  %5849 = vmatprep.mubr.msk.bf16.mxu0 %vm711_vm1, %v6865_v40  ;;  %v411_v57 = vshrl.u32 %v6863_v39, 16  ;;  %v6881_v59 = vcombine.low %v6854_v21, %v6863_v39  ;;  %v6898_v23 = vld [vmem:[%s9519_s1 + $0x8] sm:$0xf] }
  0x2c   : > { %v324_v55 = vsel %vm6822_vm4, %v319_v30, %v323_v5  ;;  %v333_v56 = vrot.slane %v332_v43, 4  ;;  %v342_v0 = vor.u32 %v341_v36, %v337_v49  ;;  %v352_v1 = vrot.slane %v350_v44, 4  ;;  %v6905_v38 = vld [vmem:[%s6735_s19 + $0x38] sm:$0x1]  ;;  %v6939_v25 = vld [vmem:[%s6735_s19 + $0x44] sm:$0x1] }
  0x2d   : > { %9692 = vst [vmem:[#allocation17_spill] sm:$0xff] %v6881_v59  ;;  %v6886_v63 = vcombine.low %v314_v29, %v324_v55  ;;  %v355_v4 = vrot.slane %v353_v45, 5  ;;  %v359_v14 = vshll.u32 %v6809_v42, 16  ;;  %v365_v15 = vrot.slane %v363_v46, 4  ;;  %9694 = vst [vmem:[#allocation19_spill] sm:$0xff] %v6905_v38 }
  0x2e   : > { %v338_v5 = vsel %vm6822_vm4, %v333_v56, %v337_v49  ;;  %v369_v20 = vshll.u32 %v6872_v31, 16  ;;  %v343_v44 = vrot.slane %v342_v0, 4  ;;  %v422_v35 = vshrl.u32 %v6884_v60, 16  ;;  %v6916_v49 = vld [vmem:[%s6735_s19 + $0x54] sm:$0xf] }
  0x2f   : > { %9693 = vst [vmem:[#allocation18_spill] sm:$0xff] %v6886_v63  ;;  %5850 = vmatmul.mubr.msk.bf16.vlgmr.msra.gmra.mxu0 %vm711_vm1, %v6886_v63  ;;  %v356_v45 = vor.u32 %v355_v4, %v352_v1  ;;  %v361_v46 = vrot.slane %v359_v14, 5  ;;  %v435_v30 = vshrl.u32 %v6889_v13, 16  ;;  %v6913_v43 = vcombine.low %v6884_v60, %v6889_v13  ;;  %v6952_v18 = vld [vmem:[%s6735_s19 + $0x64] sm:$0xf] }
  0x30   : > { %5916 = vmatpush3.bf16.msra.mxu0 %v6738_v7  ;;  %5892 = vmatmul.mubr.msk.bf16.gmra.mxu1 %vm711_vm1, %v6881_v59  ;;  %v371_v29 = vrot.slane %v369_v20, 5  ;;  %v348_v55 = vsel %vm6822_vm4, %v343_v44, %v347_v50  ;;  %v376_v0 = vrot.slane %v374_v62, 4  ;;  %v379_v1 = vrot.slane %v377_v2, 5  ;;  %v6921_v7 = vld [vmem:[%s6735_s19 + $0x58] sm:$0xf] }
  0x31   : > { %9695 = vst [vmem:[#allocation20_spill] sm:$0xff] %v6913_v43  ;;  %v357_v56 = vrot.slane %v356_v45, 4  ;;  %6463 = vmatprep.subr.msk.bf16.mxu0 %vm760_vm0, %v6898_v23  ;;  %v6925_v4 = vcombine.low %v338_v5, %v348_v55  ;;  %v366_v14 = vor.u32 %v365_v15, %v361_v46  ;;  %5895 = vmatprep.mubr.msk.bf16.mxu1 %vm711_vm1, %v6913_v43  ;;  %v383_v20 = vshll.u32 %v6835_v58, 16  ;;  %v7000_v42 = vld [vmem:[%s6735_s19 + $0x78] sm:$0xf] }
  0x32   : > { %v389_v61 = vrot.slane %v387_v6, 4  ;;  %v380_v2 = vor.u32 %v379_v1, %v376_v0  ;;  %v393_v50 = vshll.u32 %v6905_v38, 16  ;;  %v446_v44 = vshrl.u32 %v6916_v49, 16  ;;  %v6946_v0 = vld [vmem:[%s6735_s19 + $0x60] sm:$0xf]  ;;  %9703 = vst [vmem:[#allocation27_spill] sm:$0xff] %v7000_v42 }
  0x33   : > { %9696 = vst [vmem:[#allocation21_spill] sm:$0xff] %v6925_v4  ;;  %v362_v62 = vsel %vm6822_vm4, %v357_v56, %v361_v46  ;;  %5853 = vmatprep.mubr.msk.bf16.mxu0 %vm711_vm1, %v6925_v4  ;;  %v367_v5 = vrot.slane %v366_v14, 4  ;;  %v385_v15 = vrot.slane %v383_v20, 5  ;;  %v449_v45 = vshll.u32 %v6916_v49, 16  ;;  %v6979_v38 = vld [vmem:[%s6735_s19 + $0x70] sm:$0xf] }
  0x34   : > { %v459_v55 = vshrl.u32 %v6921_v7, 16  ;;  %v381_v6 = vrot.slane %v380_v2, 4  ;;  %v395_v26 = vrot.slane %v393_v50, 5  ;;  %v6943_v46 = vcombine.low %v6916_v49, %v6921_v7  ;;  %9700 = vst [vmem:[#allocation25_spill] sm:$0xff] %v6979_v38  ;;  %v7011_v27 = vld [vmem:[%s6735_s19 + $0x7c] sm:$0xf] }
  0x35   : > { %v400_v56 = vrot.slane %v398_v52, 4  ;;  %v372_v1 = vsel %vm6822_vm4, %v367_v5, %v371_v29  ;;  %v390_v14 = vor.u32 %v389_v61, %v385_v15  ;;  %v403_v20 = vrot.slane %v401_v54, 5  ;;  %v6963_v5 = vld [vmem:[%s6735_s19 + $0x50] sm:$0x1]  ;;  %9706 = vst [vmem:[#allocation30_spill] sm:$0xff] %v7011_v27 }
  0x36   : > { %9697 = vst [vmem:[#allocation22_spill] sm:$0xff] %v6943_v46  ;;  %v407_v41 = vshll.u32 %v6863_v39, 16  ;;  %v6954_v2 = vcombine.low %v362_v62, %v372_v1  ;;  %v386_v50 = vsel %vm6822_vm4, %v381_v6, %v385_v15  ;;  %v413_v19 = vrot.slane %v411_v57, 4  ;;  %v6974_v1 = vld [vmem:[%s6735_s19 + $0x6c] sm:$0xf]  ;;  %v9795_v48 = vld [vmem:[#allocation19_spill] sm:$0xff] }
  0x37   : > { %v417_v52 = vshll.u32 %v6939_v25, 16  ;;  %v391_v36 = vrot.slane %v390_v14, 4  ;;  %v404_v61 = vor.u32 %v403_v20, %v400_v56  ;;  %v470_v29 = vshrl.u32 %v6946_v0, 16  ;;  %v7077_v63 = vld [vmem:[%s6735_s19 + $0x80] sm:$0x1] }
  0x38   : > { %9698 = vst [vmem:[#allocation23_spill] sm:$0xff] %v6954_v2  ;;  %5896 = vmatmul.mubr.msk.bf16.gmra.mxu1 %vm711_vm1, %v6943_v46  ;;  %v409_v54 = vrot.slane %v407_v41, 5  ;;  %5854 = vmatmul.mubr.msk.bf16.gmra.mxu0 %vm711_vm1, %v6954_v2  ;;  %v473_v15 = vshll.u32 %v6946_v0, 16  ;;  %v483_v57 = vshrl.u32 %v6952_v18, 16  ;;  %v6971_v6 = vcombine.low %v6946_v0, %v6952_v18  ;;  %9715 = vst [vmem:[#allocation39_spill] sm:$0xff] %v7077_v63 }
  0x39   : > { %v419_v62 = vrot.slane %v417_v52, 5  ;;  %v396_v41 = vsel %vm6822_vm4, %v391_v36, %v395_v26  ;;  %v405_v56 = vrot.slane %v404_v61, 4  ;;  %v424_v20 = vrot.slane %v422_v35, 4 }
  0x3a   : > { %9699 = vst [vmem:[#allocation24_spill] sm:$0xff] %v6971_v6  ;;  %v414_v14 = vor.u32 %v413_v19, %v409_v54  ;;  %v6981_v52 = vcombine.low %v386_v50, %v396_v41  ;;  %5899 = vmatprep.mubr.msk.bf16.mxu1 %vm711_vm1, %v6971_v6  ;;  %v9702_v53 = vshll.u32 %v6884_v60, 16  ;;  %v431_v37 = vshll.u32 %v6889_v13, 16  ;;  %v6993_v50 = vld [vmem:[%s6735_s19 + $0x5c] sm:$0x1] }
  0x3b   : > { %v437_v58 = vrot.slane %v435_v30, 4  ;;  %v410_v26 = vsel %vm6822_vm4, %v405_v56, %v409_v54  ;;  %v441_v19 = vshll.u32 %v6963_v5, 16  ;;  %v494_v35 = vshrl.u32 %v6974_v1, 16  ;;  %v7032_v6 = vld [vmem:[%s6735_s19 + $0x84] sm:$0xf] }
  0x3c   : > { %9701 = vst [vmem:[#allocation26_spill] sm:$0xff] %v6981_v52  ;;  %v427_v31 = vrot.slane %v9702_v53, 5  ;;  %v415_v36 = vrot.slane %v414_v14, 4  ;;  %5857 = vmatprep.mubr.msk.bf16.mxu0 %vm711_vm1, %v6981_v52  ;;  %v433_v41 = vrot.slane %v431_v37, 5  ;;  %v497_v53 = vshll.u32 %v6974_v1, 16  ;;  %9708 = vst [vmem:[#allocation32_spill] sm:$0xff] %v7032_v6 }
  0x3d   : > { %v507_v30 = vshrl.u32 %v6979_v38, 16  ;;  %v443_v56 = vrot.slane %v441_v19, 5  ;;  %v7006_v14 = vcombine.low %v6974_v1, %v6979_v38  ;;  %v448_v3 = vrot.slane %v446_v44, 4 }
  0x3e   : > { %v428_v61 = vor.u32 %v427_v31, %v424_v20  ;;  %v420_v54 = vsel %vm6822_vm4, %v415_v36, %v419_v62  ;;  %v438_v37 = vor.u32 %v437_v58, %v433_v41  ;;  %v451_v20 = vrot.slane %v449_v45, 5 }
  0x3f   : > { %9704 = vst [vmem:[#allocation28_spill] sm:$0xff] %v7006_v14  ;;  %v7008_v22 = vcombine.low %v410_v26, %v420_v54  ;;  %v455_v62 = vshll.u32 %v6921_v7, 16  ;;  %v461_v36 = vrot.slane %v459_v55, 4  ;;  %v465_v19 = vshll.u32 %v6993_v50, 16 }
  0x40   : > { %v429_v31 = vrot.slane %v428_v61, 4  ;;  %5900 = vmatmul.mubr.msk.bf16.gmra.mxu1 %vm711_vm1, %v7006_v14  ;;  %v518_v52 = vshrl.u32 %v7000_v42, 16  ;;  %v439_v44 = vrot.slane %v438_v37, 4  ;;  %v452_v45 = vor.u32 %v451_v20, %v448_v3  ;;  %v7024_v61 = vld [vmem:[%s6735_s19 + $0x68] sm:$0x1] }
  0x41   : > { %9705 = vst [vmem:[#allocation29_spill] sm:$0xff] %v7008_v22  ;;  %5858 = vmatmul.mubr.msk.bf16.gmra.mxu0 %vm711_vm1, %v7008_v22  ;;  %v521_v26 = vshll.u32 %v7000_v42, 16  ;;  %v457_v54 = vrot.slane %v455_v62, 5  ;;  %v467_v14 = vrot.slane %v465_v19, 5  ;;  %v531_v55 = vshrl.u32 %v7011_v27, 16 }
  0x42   : > { %v434_v58 = vsel %vm6822_vm4, %v429_v31, %v433_v41  ;;  %v7029_v2 = vcombine.low %v7000_v42, %v7011_v27  ;;  %v444_v22 = vsel %vm6822_vm4, %v439_v44, %v443_v56  ;;  %v453_v41 = vrot.slane %v452_v45, 4  ;;  %v7037_v37 = vld [vmem:[%s6735_s19 + $0x88] sm:$0xf]  ;;  %v7053_v45 = vld [vmem:[%s6735_s19 + $0x74] sm:$0x1] }
  0x43   : > { %v472_v31 = vrot.slane %v470_v29, 4  ;;  %v475_v3 = vrot.slane %v473_v15, 5  ;;  %9709 = vst [vmem:[#allocation33_spill] sm:$0xff] %v7037_v37  ;;  %v7039_v20 = vcombine.low %v434_v58, %v444_v22  ;;  %v462_v62 = vor.u32 %v461_v36, %v457_v54  ;;  %9711 = vst [vmem:[#allocation35_spill] sm:$0xff] %v7053_v45  ;;  %v7066_v42 = vld [vmem:[%s6735_s19 + $0x94] sm:$0xf] }
  0x44   : > { %9707 = vst [vmem:[#allocation31_spill] sm:$0xff] %v7029_v2  ;;  %5903 = vmatprep.mubr.msk.bf16.mxu1 %vm711_vm1, %v7029_v2  ;;  %v479_v19 = vshll.u32 %v6952_v18, 16  ;;  %v485_v46 = vrot.slane %v483_v57, 4  ;;  %v458_v4 = vsel %vm6822_vm4, %v453_v41, %v457_v54  ;;  %v489_v29 = vshll.u32 %v7024_v61, 16 }
  0x45   : > { %9710 = vst [vmem:[#allocation34_spill] sm:$0xff] %v7039_v20  ;;  %v476_v56 = vor.u32 %v475_v3, %v472_v31  ;;  %v542_v15 = vshrl.u32 %v7032_v6, 16  ;;  %5861 = vmatprep.mubr.msk.bf16.mxu0 %vm711_vm1, %v7039_v20  ;;  %v463_v22 = vrot.slane %v462_v62, 4  ;;  %v545_v58 = vshll.u32 %v7032_v6, 16  ;;  %v7060_v31 = vld [vmem:[%s6735_s19 + $0x90] sm:$0xf] }
  0x46   : > { %v481_v36 = vrot.slane %v479_v19, 5  ;;  %v555_v44 = vshrl.u32 %v7037_v37, 16  ;;  %v491_v2 = vrot.slane %v489_v29, 5  ;;  %v7057_v54 = vcombine.low %v7032_v6, %v7037_v37  ;;  %9713 = vst [vmem:[#allocation37_spill] sm:$0xff] %v7060_v31 }
  0x47   : > { %v477_v57 = vrot.slane %v476_v56, 4  ;;  %v496_v41 = vrot.slane %v494_v35, 4  ;;  %v468_v3 = vsel %vm6822_vm4, %v463_v22, %v467_v14  ;;  %v499_v19 = vrot.slane %v497_v53, 5 }
  0x48   : > { %9712 = vst [vmem:[#allocation36_spill] sm:$0xff] %v7057_v54  ;;  %v486_v62 = vor.u32 %v485_v46, %v481_v36  ;;  %v503_v20 = vshll.u32 %v6979_v38, 16  ;;  %v7068_v56 = vcombine.low %v458_v4, %v468_v3  ;;  %5904 = vmatmul.mubr.msk.bf16.gmra.mxu1 %vm711_vm1, %v7057_v54  ;;  %v509_v35 = vrot.slane %v507_v30, 4  ;;  %v7088_v3 = vld [vmem:[%s6735_s19 + $0x9c] sm:$0xf] }
  0x49   : > { %v482_v29 = vsel %vm6822_vm4, %v477_v57, %v481_v36  ;;  %v513_v6 = vshll.u32 %v7053_v45, 16  ;;  %v500_v46 = vor.u32 %v499_v19, %v496_v41  ;;  %v566_v22 = vshrl.u32 %v7060_v31, 16  ;;  %9717 = vst [vmem:[#allocation41_spill] sm:$0xff] %v7088_v3  ;;  %v7093_v54 = vld [vmem:[%s6735_s19 + $0xa0] sm:$0xf] }
  0x4a   : > { %9714 = vst [vmem:[#allocation38_spill] sm:$0xff] %v7068_v56  ;;  %v487_v14 = vrot.slane %v486_v62, 4  ;;  %v505_v53 = vrot.slane %v503_v20, 5  ;;  %5862 = vmatmul.mubr.msk.bf16.gmra.mxu0 %vm711_vm1, %v7068_v56  ;;  %v569_v36 = vshll.u32 %v7060_v31, 16  ;;  %v579_v57 = vshrl.u32 %v7066_v42, 16 }
  0x4b   : > { %v515_v4 = vrot.slane %v513_v6, 5  ;;  %v7085_v30 = vcombine.low %v7060_v31, %v7066_v42  ;;  %v501_v41 = vrot.slane %v500_v46, 4  ;;  %v520_v19 = vrot.slane %v518_v52, 4  ;;  %v7112_v46 = vld [vmem:[%s6735_s19 + $0xa8] sm:$0xf] }
  0x4c   : > { %v492_v20 = vsel %vm6822_vm4, %v487_v14, %v491_v2  ;;  %v510_v62 = vor.u32 %v509_v35, %v505_v53  ;;  %v523_v56 = vrot.slane %v521_v26, 5  ;;  %v527_v31 = vshll.u32 %v7011_v27, 16  ;;  %v7105_v35 = vld [vmem:[%s6735_s19 + $0x8c] sm:$0x1]  ;;  %9720 = vst [vmem:[#allocation44_spill] sm:$0xff] %v7112_v46 }
  0x4d   : > { %9716 = vst [vmem:[#allocation40_spill] sm:$0xff] %v7085_v30  ;;  %v7095_v6 = vcombine.low %v482_v29, %v492_v20  ;;  %5907 = vmatprep.mubr.msk.bf16.mxu1 %vm711_vm1, %v7085_v30  ;;  %v533_v45 = vrot.slane %v531_v55, 4  ;;  %v506_v43 = vsel %vm6822_vm4, %v501_v41, %v505_v53  ;;  %v537_v2 = vshll.u32 %v7077_v63, 16  ;;  %9719 = vst [vmem:[#allocation43_spill] sm:$0xff] %v7105_v35 }
  0x4e   : > { %v511_v38 = vrot.slane %v510_v62, 4  ;;  %v590_v52 = vshrl.u32 %v7088_v3, 16  ;;  %v524_v29 = vor.u32 %v523_v56, %v520_v19  ;;  %v529_v14 = vrot.slane %v527_v31, 5 }
  0x4f   : > { %9718 = vst [vmem:[#allocation42_spill] sm:$0xff] %v7095_v6  ;;  %5865 = vmatprep.mubr.msk.bf16.mxu0 %vm711_vm1, %v7095_v6  ;;  %v593_v26 = vshll.u32 %v7088_v3, 16  ;;  %v603_v55 = vshrl.u32 %v7093_v54, 16  ;;  %v539_v20 = vrot.slane %v537_v2, 5  ;;  %v7118_v41 = vcombine.low %v7088_v3, %v7093_v54  ;;  %v7123_v6 = vld [vmem:[%s6735_s19 + $0xac] sm:$0xf] }
  0x50   : > { %v516_v53 = vsel %vm6822_vm4, %v511_v38, %v515_v4  ;;  %v544_v62 = vrot.slane %v542_v15, 4  ;;  %v525_v56 = vrot.slane %v524_v29, 4  ;;  %v534_v31 = vor.u32 %v533_v45, %v529_v14  ;;  %v7136_v29 = vld [vmem:[%s6735_s19 + $0x98] sm:$0x1] }
  0x51   : > { %9721 = vst [vmem:[#allocation45_spill] sm:$0xff] %v7118_v41  ;;  %v7120_v30 = vcombine.low %v506_v43, %v516_v53  ;;  %v547_v19 = vrot.slane %v545_v58, 5  ;;  %5908 = vmatmul.mubr.msk.bf16.gmra.mxu1 %vm711_vm1, %v7118_v41  ;;  %v551_v38 = vshll.u32 %v7037_v37, 16  ;;  %v557_v4 = vrot.slane %v555_v44, 4  ;;  %9723 = vst [vmem:[#allocation47_spill] sm:$0xff] %v7136_v29 }
  0x52   : > { %v561_v2 = vshll.u32 %v7105_v35, 16  ;;  %v614_v3 = vshrl.u32 %v7112_v46, 16  ;;  %v530_v43 = vsel %vm6822_vm4, %v525_v56, %v529_v14  ;;  %v535_v15 = vrot.slane %v534_v31, 4  ;;  %v7144_v37 = vld [vmem:[%s6735_s19 + $0xb4] sm:$0xf] }
  0x53   : > { %9722 = vst [vmem:[#allocation46_spill] sm:$0xff] %v7120_v30  ;;  %5866 = vmatmul.mubr.msk.bf16.gmra.mxu0 %vm711_vm1, %v7120_v30  ;;  %v548_v58 = vor.u32 %v547_v19, %v544_v62  ;;  %v617_v45 = vshll.u32 %v7112_v46, 16  ;;  %v553_v53 = vrot.slane %v551_v38, 5  ;;  %v627_v44 = vshrl.u32 %v7123_v6, 16  ;;  %9725 = vst [vmem:[#allocation49_spill] sm:$0xff] %v7144_v37 }
  0x54   : > { %v563_v41 = vrot.slane %v561_v2, 5  ;;  %v7141_v35 = vcombine.low %v7112_v46, %v7123_v6  ;;  %v540_v30 = vsel %vm6822_vm4, %v535_v15, %v539_v20  ;;  %v568_v56 = vrot.slane %v566_v22, 4  ;;  %v7149_v31 = vld [vmem:[%s6735_s19 + $0xb8] sm:$0xf]  ;;  %v7165_v15 = vld [vmem:[%s6735_s19 + $0xa4] sm:$0x1] }
  0x55   : > { %v549_v14 = vrot.slane %v548_v58, 4  ;;  %v571_v62 = vrot.slane %v569_v36, 5  ;;  %v7151_v19 = vcombine.low %v530_v43, %v540_v30  ;;  %v558_v38 = vor.u32 %v557_v4, %v553_v53 }
  0x56   : > { %9724 = vst [vmem:[#allocation48_spill] sm:$0xff] %v7141_v35  ;;  %5911 = vmatprep.mubr.msk.bf16.mxu1 %vm711_vm1, %v7141_v35  ;;  %v575_v2 = vshll.u32 %v7066_v42, 16  ;;  %v581_v46 = vrot.slane %v579_v57, 4  ;;  %v585_v20 = vshll.u32 %v7136_v29, 16  ;;  %v638_v22 = vshrl.u32 %v7144_v37, 16 }
  0x57   : > { %9726 = vst [vmem:[#allocation50_spill] sm:$0xff] %v7151_v19  ;;  %v554_v63 = vsel %vm6822_vm4, %v549_v14, %v553_v53  ;;  %v572_v27 = vor.u32 %v571_v62, %v568_v56  ;;  %5869 = vmatprep.mubr.msk.bf16.mxu0 %vm711_vm1, %v7151_v19  ;;  %v559_v36 = vrot.slane %v558_v38, 4  ;;  %v641_v4 = vshll.u32 %v7144_v37, 16 }
  0x58   : > { %v577_v30 = vrot.slane %v575_v2, 5  ;;  %v651_v43 = vshrl.u32 %v7149_v31, 16  ;;  %v587_v58 = vrot.slane %v585_v20, 5  ;;  %v7169_v53 = vcombine.low %v7144_v37, %v7149_v31  ;;  %v7182_v37 = vld [vmem:[%s6735_s19 + $0xb0] sm:$0x1] }
  0x59   : > { %v573_v57 = vrot.slane %v572_v27, 4  ;;  %v592_v14 = vrot.slane %v590_v52, 4  ;;  %v564_v56 = vsel %vm6822_vm4, %v559_v36, %v563_v41  ;;  %v595_v38 = vrot.slane %v593_v26, 5 }
  0x5a   : > { %9727 = vst [vmem:[#allocation51_spill] sm:$0xff] %v7169_v53  ;;  %v582_v62 = vor.u32 %v581_v46, %v577_v30  ;;  %v599_v2 = vshll.u32 %v7093_v54, 16  ;;  %v7174_v19 = vcombine.low %v554_v63, %v564_v56  ;;  %5912 = vmatmul.mubr.msk.bf16.gmra.mxu1 %vm711_vm1, %v7169_v53  ;;  %v605_v27 = vrot.slane %v603_v55, 4 }
  0x5b   : > { %v578_v35 = vsel %vm6822_vm4, %v573_v57, %v577_v30  ;;  %v609_v20 = vshll.u32 %v7165_v15, 16  ;;  %v596_v29 = vor.u32 %v595_v38, %v592_v14  ;;  %5951 = vmatprep.mubr.msk.bf16.mxu1 %vm711_vm1, %v6758_v16  ;;  %v616_v63 = vrot.slane %v614_v3, 4  ;;  %v7195_v3 = vld [vmem:[%s6735_s19 + $0xbc] sm:$0x1] }
  0x5c   : > { %9728 = vst [vmem:[#allocation52_spill] sm:$0xff] %v7174_v19  ;;  %v583_v52 = vrot.slane %v582_v62, 4  ;;  %v601_v46 = vrot.slane %v599_v2, 5  ;;  %5870 = vmatmul.mubr.msk.bf16.gmra.mxu0 %vm711_vm1, %v7174_v19  ;;  %v619_v41 = vrot.slane %v617_v45, 5  ;;  %v623_v36 = vshll.u32 %v7123_v6, 16 }
  0x5d   : > { %v611_v26 = vrot.slane %v609_v20, 5  ;;  %v629_v55 = vrot.slane %v627_v44, 4  ;;  %v597_v57 = vrot.slane %v596_v29, 4  ;;  %v633_v14 = vshll.u32 %v7182_v37, 16 }
  0x5e   : > { %v588_v30 = vsel %vm6822_vm4, %v583_v52, %v587_v58  ;;  %v606_v56 = vor.u32 %v605_v27, %v601_v46  ;;  %v620_v38 = vor.u32 %v619_v41, %v616_v63  ;;  %v625_v16 = vrot.slane %v623_v36, 5 }
  0x5f   : > { %v7192_v62 = vcombine.low %v578_v35, %v588_v30  ;;  %v640_v2 = vrot.slane %v638_v22, 4  ;;  %v602_v45 = vsel %vm6822_vm4, %v597_v57, %v601_v46  ;;  %v635_v19 = vrot.slane %v633_v14, 5  ;;  %v7208_v46 = vld [vmem:[%s9520_s2 + $0xc] sm:$0xf] }
  0x60   : > { %v607_v20 = vrot.slane %v606_v56, 4  ;;  %v643_v44 = vrot.slane %v641_v4, 5  ;;  %v621_v29 = vrot.slane %v620_v38, 4  ;;  %v630_v58 = vor.u32 %v629_v55, %v625_v16 }
  0x61   : > { %9729 = vst [vmem:[#allocation53_spill] sm:$0xff] %v7192_v62  ;;  %5873 = vmatprep.mubr.msk.bf16.mxu0 %vm711_vm1, %v7192_v62  ;;  %v647_v27 = vshll.u32 %v7149_v31, 16  ;;  %v653_v35 = vrot.slane %v651_v43, 4  ;;  %v657_v22 = vshll.u32 %v7195_v3, 16  ;;  %v9731_v56 = vmov 0 }
  0x62   : > { %v612_v52 = vsel %vm6822_vm4, %v607_v20, %v611_v26  ;;  %v644_v63 = vor.u32 %v643_v44, %v640_v2  ;;  %v626_v41 = vsel %vm6822_vm4, %v621_v29, %v625_v16  ;;  %v631_v36 = vrot.slane %v630_v58, 4  ;;  %5952 = vmatmul.mubr.msk.bf16.vlgmr.msra.gmra.mxu1 %vm711_vm1, %v6775_v24 }
  0x63   : > { %v7210_v4 = vcombine.low %v602_v45, %v612_v52  ;;  %v649_v43 = vrot.slane %v647_v27, 5  ;;  %5955 = vmatprep.mubr.msk.bf16.mxu1 %vm711_vm1, %v6800_v34  ;;  %6018 = vmatpush3.bf16.msra.mxu1 %v6742_v9  ;;  %v659_v57 = vrot.slane %v657_v22, 5  ;;  %v9732_v56 = vsel %vm7224_vm7, 4294967295, %v9731_v56 }
  0x64   : > { %v645_v26 = vrot.slane %v644_v63, 4  ;;  %v636_v55 = vsel %vm6822_vm4, %v631_v36, %v635_v19  ;;  %9733 = vst [vmem:[#allocation55_spill] sm:$0xff] %v9732_v56  ;;  %6466 = vmatprep.subr.msk.bf16.mxu1 %vm760_vm0, %v7208_v46  ;;  %v9735_v38 = vrot.slane %v6748_v11, 5  ;;  %v9736_v16 = vrot.slane %v6745_v10, 9 }
  0x65   : > { %9730 = vst [vmem:[#allocation54_spill] sm:$0xff] %v7210_v4  ;;  %5874 = vmatmul.mubr.msk.bf16.gmra.mxu0 %vm711_vm1, %v7210_v4  ;;  %v654_v30 = vor.u32 %v653_v35, %v649_v43  ;;  %v7230_v14 = vcombine.low %v626_v41, %v636_v55  ;;  %v9737_v2 = vrot.slane %v6790_v32, 5  ;;  %v9738_v29 = vrot.slane %v6761_v17, 5 }
  0x66   : > { %v650_v9 = vsel %vm6822_vm4, %v645_v26, %v649_v43  ;;  %v1569_v19 = vsel %vm7224_vm7, %v9736_v16, %v9735_v38  ;;  %v9739_v58 = vrot.slane %v6751_v12, 9  ;;  %v9740_v10 = vrot.slane %v6817_v47, 5  ;;  %v9745_v16 = vld [vmem:[#allocation20_spill] sm:$0xff] }
  0x67   : > { %9734 = vst [vmem:[#allocation56_spill] sm:$0xff] %v7230_v14  ;;  %v1572_v45 = vsel %vm7224_vm7, %v6784_v28, %v9737_v2  ;;  %v655_v20 = vrot.slane %v654_v30, 4  ;;  %5877 = vmatprep.mubr.msk.bf16.mxu0 %vm711_vm1, %v7230_v14  ;;  %v5103_v12 = vrot.slane %v6854_v21, 9  ;;  %v1606_v47 = vrot.slane %v6939_v25, 5  ;;  %v9747_v2 = vld [vmem:[#allocation35_spill] sm:$0xff] }
  0x68   : > { %v7245_v44 = vcombine.low %v1569_v19, %v1572_v45  ;;  %v1576_v11 = vsel %vm7224_vm7, %v9739_v58, %v9738_v29  ;;  %v1579_v32 = vsel %vm7224_vm7, %v6796_v33, %v9740_v10  ;;  %v1603_v33 = vrot.slane %v6863_v39, 5  ;;  %v9749_v58 = vld [vmem:[#allocation27_spill] sm:$0xff]  ;;  %v9750_v10 = vld [vmem:[#allocation30_spill] sm:$0xff] }
  0x69   : > { %v7260_v28 = vcombine.low %v1576_v11, %v1579_v32  ;;  %v660_v27 = vsel %vm6822_vm4, %v655_v20, %v659_v57  ;;  %v5104_v35 = vrot.slane %v6884_v60, 9  ;;  %v1610_v22 = vrot.slane %v6889_v13, 5  ;;  %v9748_v20 = vld [vmem:[#allocation18_spill] sm:$0xff] }
  0x6a   : > { %v7264_v17 = vcombine.low %v650_v9, %v660_v27  ;;  %5956 = vmatmul.mubr.msk.bf16.gmra.mxu1 %vm711_vm1, %v6828_v51  ;;  %v1604_v52 = vsel %vm7224_vm7, %v5103_v12, %v1603_v33  ;;  %v1605_v63 = vrot.slane %v1603_v33, 4  ;;  %v1613_v21 = vrot.slane %v6963_v5, 5  ;;  %v9751_v27 = vld [vmem:[#allocation21_spill] sm:$0xff]  ;;  %v9752_v33 = vld [vmem:[#allocation39_spill] sm:$0xff] }
  0x6b   : > { %5959 = vmatprep.mubr.msk.bf16.mxu1 %vm711_vm1, %v6849_v8  ;;  %v5105_v39 = vrot.slane %v6916_v49, 9  ;;  %v1617_v25 = vrot.slane %v6921_v7, 5  ;;  %v1777_v41 = vsel %vm760_vm0, %v6898_v23, 0  ;;  %v1612_v36 = vrot.slane %v1610_v22, 4 }
  0x6c   : > { %9741 = vst [vmem:[#allocation57_spill] sm:$0xff] %v7264_v17  ;;  %v1607_v60 = vsel %vm7224_vm7, %v1605_v63, %v1606_v47  ;;  %v1620_v49 = vrot.slane %v6993_v50, 5  ;;  %v5106_v23 = vrot.slane %v6946_v0, 9  ;;  %v1624_v26 = vrot.slane %v6952_v18, 5  ;;  %v9744_v50 = vld [vmem:[#allocation25_spill] sm:$0xff] }
  0x6d   : > { %5878 = vmatmul.mubr.msk.bf16.gmra.mxu0 %vm711_vm1, %v7264_v17  ;;  %v7290_v43 = vcombine.low %v1604_v52, %v1607_v60  ;;  %v1618_v13 = vsel %vm7224_vm7, %v5105_v39, %v1617_v25  ;;  %v1619_v5 = vrot.slane %v1617_v25, 4  ;;  %v1614_v7 = vsel %vm7224_vm7, %v1612_v36, %v1613_v21  ;;  %v7313_v18 = vld [vmem:[%s9519_s1 + $0xc] sm:$0xf]  ;;  %v9754_v63 = vld [vmem:[#allocation33_spill] sm:$0xff] }
  0x6e   : > { %5917 = vmatprep.mubr.msk.bf16.mxu0 %vm711_vm1, %v6865_v40  ;;  %v1611_v40 = vsel %vm7224_vm7, %v5104_v35, %v1610_v22  ;;  %v1627_v55 = vrot.slane %v7024_v61, 5  ;;  %v5107_v9 = vrot.slane %v6974_v1, 9  ;;  %v1631_v38 = vrot.slane %v9744_v50, 5  ;;  %v9753_v35 = vld [vmem:[#allocation32_spill] sm:$0xff] }
  0x6f   : > { %9742 = vst [vmem:[#allocation58_spill] sm:$0xff] %v7290_v43  ;;  %v7302_v30 = vcombine.low %v1611_v40, %v1614_v7  ;;  %v1621_v57 = vsel %vm7224_vm7, %v1619_v5, %v1620_v49  ;;  %v1625_v61 = vsel %vm7224_vm7, %v5106_v23, %v1624_v26  ;;  %v1626_v19 = vrot.slane %v1624_v26, 4  ;;  %v9758_v7 = vld [vmem:[#allocation37_spill] sm:$0xff] }
  0x70   : > { %v7315_v0 = vcombine.low %v1618_v13, %v1621_v57  ;;  %v1634_v45 = vrot.slane %v9747_v2, 5  ;;  %v1632_v1 = vsel %vm7224_vm7, %v5107_v9, %v1631_v38  ;;  %v1633_v29 = vrot.slane %v1631_v38, 4  ;;  %v9757_v13 = vld [vmem:[#allocation43_spill] sm:$0xff]  ;;  %v9761_v38 = vld [vmem:[#allocation41_spill] sm:$0xff]  ;;  %v9762_v2 = vld [vmem:[#allocation22_spill] sm:$0xff] }
  0x71   : > { %9743 = vst [vmem:[#allocation59_spill] sm:$0xff] %v7302_v30  ;;  %v5108_v11 = vrot.slane %v9749_v58, 9  ;;  %v1638_v32 = vrot.slane %v9750_v10, 5  ;;  %v1628_v12 = vsel %vm7224_vm7, %v1626_v19, %v1627_v55  ;;  %v1641_v47 = vrot.slane %v9752_v33, 5  ;;  %v9759_v55 = vld [vmem:[#allocation47_spill] sm:$0xff]  ;;  %v9764_v58 = vld [vmem:[#allocation24_spill] sm:$0xff] }
  0x72   : > { %5960 = vmatmul.mubr.msk.bf16.gmra.mxu1 %vm711_vm1, %v6881_v59  ;;  %9746 = vst [vmem:[#allocation25_spill] sm:$0xff] %v7315_v0  ;;  %v5109_v52 = vrot.slane %v9753_v35, 9  ;;  %v1645_v22 = vrot.slane %v9754_v63, 5  ;;  %v7335_v21 = vcombine.low %v1625_v61, %v1628_v12  ;;  %v1635_v39 = vsel %vm7224_vm7, %v1633_v29, %v1634_v45  ;;  %v9766_v33 = vld [vmem:[#allocation23_spill] sm:$0xff] }
  0x73   : > { %5963 = vmatprep.mubr.msk.bf16.mxu1 %vm711_vm1, %v9745_v16  ;;  %v1639_v25 = vsel %vm7224_vm7, %v5108_v11, %v1638_v32  ;;  %v7341_v60 = vcombine.low %v1632_v1, %v1635_v39  ;;  %v1648_v5 = vrot.slane %v9757_v13, 5  ;;  %v5110_v23 = vrot.slane %v9758_v7, 9 }
  0x74   : > { %9755 = vst [vmem:[#allocation35_spill] sm:$0xff] %v7335_v21  ;;  %v1646_v40 = vsel %vm7224_vm7, %v5109_v52, %v1645_v22  ;;  %v1647_v36 = vrot.slane %v1645_v22, 4  ;;  %v1652_v26 = vrot.slane %v7066_v42, 5  ;;  %v1655_v57 = vrot.slane %v9759_v55, 5  ;;  %v9768_v22 = vld [vmem:[#allocation26_spill] sm:$0xff]  ;;  %v9775_v55 = vld [vmem:[#allocation29_spill] sm:$0xff] }
  0x75   : > { %5918 = vmatmul.mubr.msk.bf16.vlgmr.msra.gmra.mxu0 %vm711_vm1, %v9748_v20  ;;  %9756 = vst [vmem:[#allocation18_spill] sm:$0xff] %v7341_v60  ;;  %v5111_v61 = vrot.slane %v9761_v38, 9  ;;  %v1659_v19 = vrot.slane %v7093_v54, 5  ;;  %v1662_v29 = vrot.slane %v7165_v15, 5  ;;  %v1666_v12 = vrot.slane %v7123_v6, 5  ;;  %v9767_v15 = vld [vmem:[#allocation49_spill] sm:$0xff] }
  0x76   : > { %5984 = vmatpush3.bf16.msra.mxu0 %v1777_v41  ;;  %5921 = vmatprep.mubr.msk.bf16.mxu0 %vm711_vm1, %v9751_v27  ;;  %v1640_v41 = vrot.slane %v1638_v32, 4  ;;  %v1649_v50 = vsel %vm7224_vm7, %v1647_v36, %v1648_v5  ;;  %v1653_v1 = vsel %vm7224_vm7, %v5110_v23, %v1652_v26  ;;  %v1654_v42 = vrot.slane %v1652_v26, 4  ;;  %v9765_v32 = vld [vmem:[#allocation44_spill] sm:$0xff]  ;;  %v9774_v26 = vld [vmem:[#allocation31_spill] sm:$0xff]  ;;  %v9779_v38 = vld [vmem:[#allocation38_spill] sm:$0xff] }
  0x77   : > { %6465 = vmatprep.subr.msk.bf16.mxu0 %vm760_vm0, %v7313_v18  ;;  %v7359_v45 = vcombine.low %v1646_v40, %v1649_v50  ;;  %v1660_v11 = vsel %vm7224_vm7, %v5111_v61, %v1659_v19  ;;  %v1661_v10 = vrot.slane %v1659_v19, 4  ;;  %v5112_v54 = vrot.slane %v9765_v32, 9  ;;  %v9773_v23 = vld [vmem:[#allocation28_spill] sm:$0xff]  ;;  %v9780_v61 = vld [vmem:[#allocation42_spill] sm:$0xff]  ;;  %v9781_v19 = vld [vmem:[#allocation45_spill] sm:$0xff] }
  0x78   : > { %v1642_v49 = vsel %vm7224_vm7, %v1640_v41, %v1641_v47  ;;  %v1656_v47 = vsel %vm7224_vm7, %v1654_v42, %v1655_v57  ;;  %v1669_v35 = vrot.slane %v7182_v37, 5  ;;  %v5113_v52 = vrot.slane %v9767_v15, 9  ;;  %v9777_v57 = vld [vmem:[#allocation36_spill] sm:$0xff]  ;;  %v9783_v42 = vld [vmem:[#allocation46_spill] sm:$0xff]  ;;  %v9786_v32 = vld [vmem:[#allocation5_spill] sm:$0xff] }
  0x79   : > { %v7351_v9 = vcombine.low %v1639_v25, %v1642_v49  ;;  %9763 = vst [vmem:[#allocation30_spill] sm:$0xff] %v7359_v45  ;;  %v1673_v63 = vrot.slane %v7149_v31, 5  ;;  %v7379_v39 = vcombine.low %v1653_v1, %v1656_v47  ;;  %v1663_v6 = vsel %vm7224_vm7, %v1661_v10, %v1662_v29  ;;  %v9778_v50 = vld [vmem:[#allocation40_spill] sm:$0xff]  ;;  %v9784_v29 = vld [vmem:[#allocation6_spill] sm:$0xff]  ;;  %v9788_v15 = vld [vmem:[#allocation9_spill] sm:$0xff] }
  0x7a   : > { %5964 = vmatmul.mubr.msk.bf16.gmra.mxu1 %vm711_vm1, %v9762_v2  ;;  %v1667_v25 = vsel %vm7224_vm7, %v5112_v54, %v1666_v12  ;;  %v1668_v41 = vrot.slane %v1666_v12, 4  ;;  %v7385_v40 = vcombine.low %v1660_v11, %v1663_v6  ;;  %v1676_v31 = vrot.slane %v7195_v3, 5  ;;  %v9776_v3 = vld [vmem:[#allocation34_spill] sm:$0xff]  ;;  %v9782_v1 = vld [vmem:[#allocation48_spill] sm:$0xff] }
  0x7b   : > { %9760 = vst [vmem:[#allocation27_spill] sm:$0xff] %v7351_v9  ;;  %5967 = vmatprep.mubr.msk.bf16.mxu1 %vm711_vm1, %v9764_v58  ;;  %9769 = vst [vmem:[#allocation39_spill] sm:$0xff] %v7379_v39  ;;  %v1674_v37 = vsel %vm7224_vm7, %v5113_v52, %v1673_v63  ;;  %v1675_v36 = vrot.slane %v1673_v63, 4  ;;  %v1582_v11 = vrot.slane %v9784_v29, 5  ;;  %v9785_v10 = vld [vmem:[#allocation50_spill] sm:$0xff]  ;;  %v5100_v54 = vrot.slane %v9786_v32, 9 }
  0x7c   : > { %9770 = vst [vmem:[#allocation32_spill] sm:$0xff] %v7385_v40  ;;  %v1670_v13 = vsel %vm7224_vm7, %v1668_v41, %v1669_v35  ;;  %v9787_v47 = vld [vmem:[#allocation14_spill] sm:$0xff]  ;;  %v1589_v52 = vrot.slane %v9788_v15, 5  ;;  %v9789_v63 = vld [vmem:[#allocation52_spill] sm:$0xff]  ;;  %v9790_v41 = vld [vmem:[#allocation13_spill] sm:$0xff] }
  0x7d   : > { %5922 = vmatmul.mubr.msk.bf16.gmra.mxu0 %vm711_vm1, %v9766_v33  ;;  %v7392_v5 = vcombine.low %v1667_v25, %v1670_v13  ;;  %v1677_v49 = vsel %vm7224_vm7, %v1675_v36, %v1676_v31  ;;  %v1584_v12 = vrot.slane %v1582_v11, 4  ;;  %v1585_v35 = vrot.slane %v9787_v47, 5  ;;  %v9792_v31 = vld [vmem:[#allocation8_spill] sm:$0xff] }
  0x7e   : > { %5925 = vmatprep.mubr.msk.bf16.mxu0 %vm711_vm1, %v9768_v22  ;;  %v7396_v7 = vcombine.low %v1674_v37, %v1677_v49  ;;  %v1583_v6 = vsel %vm7224_vm7, %v5100_v54, %v1582_v11  ;;  %v1596_v37 = vrot.slane %v9790_v41, 5  ;;  %v5101_v13 = vrot.slane %v9792_v31, 9  ;;  %v9793_v29 = vld [vmem:[#allocation16_spill] sm:$0xff]  ;;  %v5199_v31 = vld [vmem:[%s9519_s1 + $0x10] sm:$0xf] }
  0x7f   : > { %9771 = vst [vmem:[#allocation33_spill] sm:$0xff] %v7392_v5  ;;  %v1586_v25 = vsel %vm7224_vm7, %v1584_v12, %v1585_v35  ;;  %v1591_v49 = vrot.slane %v1589_v52, 4  ;;  %v1592_v32 = vrot.slane %v9793_v29, 5  ;;  %v2379_v47 = vsel %vm760_vm0, %v7208_v46, 0  ;;  %v9794_v15 = vld [vmem:[#allocation12_spill] sm:$0xff] }
  0x80   : > { %9772 = vst [vmem:[#allocation43_spill] sm:$0xff] %v7396_v7  ;;  %v7439_v36 = vcombine.low %v1583_v6, %v1586_v25  ;;  %v5102_v11 = vrot.slane %v9794_v15, 9  ;;  %v1598_v54 = vrot.slane %v1596_v37, 4  ;;  %v1599_v12 = vrot.slane %v9795_v48, 5  ;;  %v5217_v35 = vld [vmem:[%s9520_s2 + $0x10] sm:$0xf] }
  0x81   : > { %v1590_v6 = vsel %vm7224_vm7, %v5101_v13, %v1589_v52  ;;  %v1593_v46 = vsel %vm7224_vm7, %v1591_v49, %v1592_v32  ;;  %v7537_v49 = vld [vmem:[%s9520_s2 + $0x14] sm:$0xf] }
  0x82   : > { %5968 = vmatmul.mubr.msk.bf16.gmra.mxu1 %vm711_vm1, %v9773_v23  ;;  %9791 = vst [vmem:[#allocation37_spill] sm:$0xff] %v7439_v36  ;;  %v1597_v48 = vsel %vm7224_vm7, %v5102_v11, %v1596_v37  ;;  %v1600_v25 = vsel %vm7224_vm7, %v1598_v54, %v1599_v12  ;;  %v7467_v41 = vcombine.low %v1590_v6, %v1593_v46  ;;  %v2181_v37 = vsel %vm760_vm0, %v7313_v18, 0 }
  0x83   : > { %5971 = vmatprep.mubr.msk.bf16.mxu1 %vm711_vm1, %v9774_v26  ;;  %v7469_v52 = vcombine.low %v1597_v48, %v1600_v25  ;;  %v2805_v18 = vsel %vm760_vm0, %v5217_v35, 0 }
  0x84   : > { %9796 = vst [vmem:[#allocation47_spill] sm:$0xff] %v7467_v41 }
  0x85   : > { %5926 = vmatmul.mubr.msk.bf16.gmra.mxu0 %vm711_vm1, %v9775_v55  ;;  %9797 = vst [vmem:[#allocation41_spill] sm:$0xff] %v7469_v52 }
  0x86   : > { %5929 = vmatprep.mubr.msk.bf16.mxu0 %vm711_vm1, %v9776_v3 }
  0x8a   : > { %5972 = vmatmul.mubr.msk.bf16.gmra.mxu1 %vm711_vm1, %v9777_v57 }
  0x8b   : > { %5975 = vmatprep.mubr.msk.bf16.mxu1 %vm711_vm1, %v9778_v50 }
  0x8d   : > { %5930 = vmatmul.mubr.msk.bf16.gmra.mxu0 %vm711_vm1, %v9779_v38 }
  0x8e   : > { %5933 = vmatprep.mubr.msk.bf16.mxu0 %vm711_vm1, %v9780_v61 }
  0x92   : > { %5976 = vmatmul.mubr.msk.bf16.gmra.mxu1 %vm711_vm1, %v9781_v19 }
  0x93   : > { %5979 = vmatprep.mubr.msk.bf16.mxu1 %vm711_vm1, %v9782_v1 }
  0x95   : > { %5934 = vmatmul.mubr.msk.bf16.gmra.mxu0 %vm711_vm1, %v9783_v42 }
  0x96   : > { %5937 = vmatprep.mubr.msk.bf16.mxu0 %vm711_vm1, %v9785_v10 }
  0x9a   : > { %5980 = vmatmul.mubr.msk.bf16.gmra.mxu1 %vm711_vm1, %v7169_v53 }
  0x9b   : > { %6019 = vmatprep.mubr.msk.bf16.mxu1 %vm711_vm1, %v7245_v44 }
  0x9d   : > { %5938 = vmatmul.mubr.msk.bf16.gmra.mxu0 %vm711_vm1, %v9789_v63 }
  0x9e   : > { %5941 = vmatprep.mubr.msk.bf16.mxu0 %vm711_vm1, %v7192_v62 }
  0xa2   : > { %6020 = vmatmul.mubr.msk.bf16.vlgmr.msra.gmra.mxu1 %vm711_vm1, %v7260_v28 }
  0xa3   : > { %6023 = vmatprep.mubr.msk.bf16.mxu1 %vm711_vm1, %v7439_v36  ;;  %6086 = vmatpush3.bf16.msra.mxu1 %v2379_v47 }
  0xa4   : > { %6468 = vmatprep.subr.msk.bf16.mxu1 %vm760_vm0, %v5217_v35 }
  0xa5   : > { %5942 = vmatmul.mubr.msk.bf16.gmra.mxu0 %vm711_vm1, %v7210_v4 }
  0xa6   : > { %5945 = vmatprep.mubr.msk.bf16.mxu0 %vm711_vm1, %v7230_v14 }
  0xaa   : > { %6024 = vmatmul.mubr.msk.bf16.gmra.mxu1 %vm711_vm1, %v7467_v41 }
  0xab   : > { %6027 = vmatprep.mubr.msk.bf16.mxu1 %vm711_vm1, %v7469_v52 }
  0xad   : > { %5946 = vmatmul.mubr.msk.bf16.gmra.mxu0 %vm711_vm1, %v7264_v17 }
  0xae   : > { %5985 = vmatprep.mubr.msk.bf16.mxu0 %vm711_vm1, %v7245_v44 }
  0xb2   : > { %6028 = vmatmul.mubr.msk.bf16.gmra.mxu1 %vm711_vm1, %v7290_v43 }
  0xb3   : > { %6031 = vmatprep.mubr.msk.bf16.mxu1 %vm711_vm1, %v7302_v30 }
  0xb5   : > { %5986 = vmatmul.mubr.msk.bf16.vlgmr.msra.gmra.mxu0 %vm711_vm1, %v7260_v28 }
  0xb6   : > { %6052 = vmatpush3.bf16.msra.mxu0 %v2181_v37  ;;  %5989 = vmatprep.mubr.msk.bf16.mxu0 %vm711_vm1, %v7439_v36  ;;  %v2607_v37 = vsel %vm760_vm0, %v5199_v31, 0 }
  0xb7   : > { %6467 = vmatprep.subr.msk.bf16.mxu0 %vm760_vm0, %v5199_v31 }
  0xba   : > { %6032 = vmatmul.mubr.msk.bf16.gmra.mxu1 %vm711_vm1, %v7315_v0 }
  0xbb   : > { %6035 = vmatprep.mubr.msk.bf16.mxu1 %vm711_vm1, %v7335_v21 }
  0xbd   : > { %5990 = vmatmul.mubr.msk.bf16.gmra.mxu0 %vm711_vm1, %v7467_v41 }
  0xbe   : > { %5993 = vmatprep.mubr.msk.bf16.mxu0 %vm711_vm1, %v7469_v52 }
  0xc2   : > { %6036 = vmatmul.mubr.msk.bf16.gmra.mxu1 %vm711_vm1, %v7341_v60 }
  0xc3   : > { %6039 = vmatprep.mubr.msk.bf16.mxu1 %vm711_vm1, %v7351_v9 }
  0xc5   : > { %5994 = vmatmul.mubr.msk.bf16.gmra.mxu0 %vm711_vm1, %v7290_v43 }
  0xc6   : > { %5997 = vmatprep.mubr.msk.bf16.mxu0 %vm711_vm1, %v7302_v30 }
  0xca   : > { %6040 = vmatmul.mubr.msk.bf16.gmra.mxu1 %vm711_vm1, %v7359_v45 }
  0xcb   : > { %6043 = vmatprep.mubr.msk.bf16.mxu1 %vm711_vm1, %v7379_v39 }
  0xcd   : > { %5998 = vmatmul.mubr.msk.bf16.gmra.mxu0 %vm711_vm1, %v7315_v0 }
  0xce   : > { %6001 = vmatprep.mubr.msk.bf16.mxu0 %vm711_vm1, %v7335_v21 }
  0xd2   : > { %6044 = vmatmul.mubr.msk.bf16.gmra.mxu1 %vm711_vm1, %v7385_v40 }
  0xd3   : > { %6047 = vmatprep.mubr.msk.bf16.mxu1 %vm711_vm1, %v7392_v5 }
  0xd5   : > { %6002 = vmatmul.mubr.msk.bf16.gmra.mxu0 %vm711_vm1, %v7341_v60 }
  0xd6   : > { %6005 = vmatprep.mubr.msk.bf16.mxu0 %vm711_vm1, %v7351_v9 }
  0xda   : > { %6048 = vmatmul.mubr.msk.bf16.gmra.mxu1 %vm711_vm1, %v7396_v7 }
  0xdb   : > { %6087 = vmatprep.mubr.msk.bf16.mxu1 %vm711_vm1, %v6775_v24 }
  0xdd   : > { %6006 = vmatmul.mubr.msk.bf16.gmra.mxu0 %vm711_vm1, %v7359_v45 }
  0xde   : > { %6009 = vmatprep.mubr.msk.bf16.mxu0 %vm711_vm1, %v7379_v39 }
  0xe0   : > { %v5885_v44 = vpop.f32.mrf.mxu1 }
  0xe2   : > { %v1090_v13 = vpop.f32.mrf.mxu1  ;;  %6088 = vmatmul.mubr.msk.bf16.vlgmr.msra.gmra.mxu1 %vm711_vm1, %v6800_v34 }
  0xe3   : > { %6091 = vmatprep.mubr.msk.bf16.mxu1 %vm711_vm1, %v6828_v51  ;;  %6154 = vmatpush3.bf16.msra.mxu1 %v2805_v18 }
  0xe4   : > { %v5886_v29 = vpop.f32.mrf.mxu1  ;;  %6470 = vmatprep.subr.msk.bf16.mxu1 %vm760_vm0, %v7537_v49 }
  0xe5   : > { %6010 = vmatmul.mubr.msk.bf16.gmra.mxu0 %vm711_vm1, %v7385_v40 }
  0xe6   : > { %6013 = vmatprep.mubr.msk.bf16.mxu0 %vm711_vm1, %v7392_v5  ;;  %v1093_v32 = vpop.f32.mrf.mxu1 }
  0xe8   : > { %v5889_v47 = vpop.f32.mrf.mxu1 }
  0xea   : > { %v1106_v15 = vpop.f32.mrf.mxu1  ;;  %6092 = vmatmul.mubr.msk.bf16.gmra.mxu1 %vm711_vm1, %v6849_v8 }
  0xeb   : > { %6095 = vmatprep.mubr.msk.bf16.mxu1 %vm711_vm1, %v6881_v59 }
  0xec   : > { %v5890_v11 = vpop.f32.mrf.mxu1 }
  0xed   : > { %6014 = vmatmul.mubr.msk.bf16.gmra.mxu0 %vm711_vm1, %v7396_v7 }
  0xee   : > { %6053 = vmatprep.mubr.msk.bf16.mxu0 %vm711_vm1, %v6775_v24  ;;  %v1109_v54 = vpop.f32.mrf.mxu1  ;;  %v7571_v24 = vld [vmem:[%s9519_s1 + $0x14] sm:$0xf] }
  0xef   : > { %v5851_v12 = vpop.f32.mrf.mxu0 }
  0xf0   : > { %v7557_v35 = vadd.f32 %v5885_v44, %v5851_v12  ;;  %v5893_v6 = vpop.f32.mrf.mxu1 }
  0xf1   : > { %v798_v46 = vpop.f32.mrf.mxu0 }
  0xf2   : > { %v7559_v48 = vadd.f32 %v1090_v13, %v798_v46  ;;  %v1122_v25 = vpop.f32.mrf.mxu1  ;;  %6096 = vmatmul.mubr.msk.bf16.gmra.mxu1 %vm711_vm1, %v9745_v16 }
  0xf3   : > { %v5852_v18 = vpop.f32.mrf.mxu0  ;;  %6099 = vmatprep.mubr.msk.bf16.mxu1 %vm711_vm1, %v9762_v2 }
  0xf4   : > { %v7564_v56 = vadd.f32 %v5886_v29, %v5852_v18  ;;  %v5894_v7 = vpop.f32.mrf.mxu1 }
  0xf5   : > { %6054 = vmatmul.mubr.msk.bf16.vlgmr.msra.gmra.mxu0 %vm711_vm1, %v6800_v34  ;;  %v801_v44 = vpop.f32.mrf.mxu0 }
  0xf6   : > { %6120 = vmatpush3.bf16.msra.mxu0 %v2607_v37  ;;  %v7575_v31 = vadd.f32 %v1093_v32, %v801_v44  ;;  %6057 = vmatprep.mubr.msk.bf16.mxu0 %vm711_vm1, %v6828_v51  ;;  %v1125_v13 = vpop.f32.mrf.mxu1 }
  0xf7   : > { %6469 = vmatprep.subr.msk.bf16.mxu0 %vm760_vm0, %v7571_v24 }
  0xf8   : > { %v5897_v29 = vpop.f32.mrf.mxu1  ;;  %v5855_v12 = vpop.f32.mrf.mxu0 }
  0xf9   : > { %v7581_v46 = vadd.f32 %v5889_v47, %v5855_v12 }
  0xfa   : > { %v1138_v18 = vpop.f32.mrf.mxu1  ;;  %v814_v5 = vpop.f32.mrf.mxu0  ;;  %6100 = vmatmul.mubr.msk.bf16.gmra.mxu1 %vm711_vm1, %v9764_v58 }
  0xfb   : > { %v7585_v34 = vadd.f32 %v1106_v15, %v814_v5  ;;  %6103 = vmatprep.mubr.msk.bf16.mxu1 %vm711_vm1, %v9773_v23 }
  0xfc   : > { %v5898_v32 = vpop.f32.mrf.mxu1  ;;  %v5856_v37 = vpop.f32.mrf.mxu0 }
  0xfd   : > { %6058 = vmatmul.mubr.msk.bf16.gmra.mxu0 %vm711_vm1, %v6849_v8  ;;  %v7591_v44 = vadd.f32 %v5890_v11, %v5856_v37 }
  0xfe   : > { %6061 = vmatprep.mubr.msk.bf16.mxu0 %vm711_vm1, %v6881_v59  ;;  %v1141_v47 = vpop.f32.mrf.mxu1  ;;  %v817_v12 = vpop.f32.mrf.mxu0 }
  0xff   : > { %9798 = vst [vmem:[#allocation44_spill] sm:$0xff] %v7591_v44  ;;  %v7595_v51 = vadd.f32 %v1109_v54, %v817_v12 }
 0x100   : > { %v5901_v40 = vpop.f32.mrf.mxu1 }
 0x101   : > { %9799 = vst [vmem:[#allocation49_spill] sm:$0xff] %v7595_v51  ;;  %v5859_v5 = vpop.f32.mrf.mxu0 }
 0x102   : > { %v7597_v15 = vadd.f32 %v5893_v6, %v5859_v5  ;;  %v1154_v39 = vpop.f32.mrf.mxu1  ;;  %6104 = vmatmul.mubr.msk.bf16.gmra.mxu1 %vm711_vm1, %v9774_v26 }
 0x103   : > { %v830_v45 = vpop.f32.mrf.mxu0  ;;  %6107 = vmatprep.mubr.msk.bf16.mxu1 %vm711_vm1, %v9777_v57 }
 0x104   : > { %9800 = vst [vmem:[#allocation6_spill] sm:$0xff] %v7597_v15  ;;  %v7601_v8 = vadd.f32 %v1122_v25, %v830_v45  ;;  %v5902_v11 = vpop.f32.mrf.mxu1  ;;  %v7770_v15 = vld [vmem:[%s6735_s19 + $0xc8] sm:$0x1] }
 0x105   : > { %6062 = vmatmul.mubr.msk.bf16.gmra.mxu0 %vm711_vm1, %v9745_v16  ;;  %v5860_v54 = vpop.f32.mrf.mxu0  ;;  %9827 = vst [vmem:[#allocation78_spill] sm:$0xff] %v7770_v15 }
 0x106   : > { %9801 = vst [vmem:[#allocation5_spill] sm:$0xff] %v7601_v8  ;;  %v7607_v37 = vadd.f32 %v5894_v7, %v5860_v54  ;;  %6065 = vmatprep.mubr.msk.bf16.mxu0 %vm711_vm1, %v9762_v2  ;;  %v1157_v6 = vpop.f32.mrf.mxu1 }
 0x107   : > { %v833_v12 = vpop.f32.mrf.mxu0 }
 0x108   : > { %9802 = vst [vmem:[#allocation14_spill] sm:$0xff] %v7607_v37  ;;  %v7611_v5 = vadd.f32 %v1125_v13, %v833_v12  ;;  %v5905_v59 = vpop.f32.mrf.mxu1 }
 0x10a   : > { %9803 = vst [vmem:[#allocation9_spill] sm:$0xff] %v7611_v5  ;;  %v5863_v45 = vpop.f32.mrf.mxu0  ;;  %6108 = vmatmul.mubr.msk.bf16.gmra.mxu1 %vm711_vm1, %v9778_v50  ;;  %v1170_v25 = vpop.f32.mrf.mxu1 }
 0x10b   : > { %v7615_v8 = vadd.f32 %v5897_v29, %v5863_v45  ;;  %6111 = vmatprep.mubr.msk.bf16.mxu1 %vm711_vm1, %v9781_v19 }
 0x10c   : > { %v846_v7 = vpop.f32.mrf.mxu0  ;;  %v5906_v54 = vpop.f32.mrf.mxu1 }
 0x10d   : > { %9804 = vst [vmem:[#allocation13_spill] sm:$0xff] %v7615_v8  ;;  %6066 = vmatmul.mubr.msk.bf16.gmra.mxu0 %vm711_vm1, %v9764_v58  ;;  %v7621_v13 = vadd.f32 %v1138_v18, %v846_v7  ;;  %v7636_v18 = vld [vmem:[%s6735_s19 + $0xc0] sm:$0xf]  ;;  %v7639_v7 = vld [vmem:[%s6735_s19 + $0xc4] sm:$0xf] }
 0x10e   : > { %6069 = vmatprep.mubr.msk.bf16.mxu0 %vm711_vm1, %v9773_v23  ;;  %v5864_v12 = vpop.f32.mrf.mxu0  ;;  %v1173_v2 = vpop.f32.mrf.mxu1  ;;  %9809 = vst [vmem:[#allocation60_spill] sm:$0xff] %v7636_v18  ;;  %9810 = vst [vmem:[#allocation61_spill] sm:$0xff] %v7639_v7 }
 0x10f   : > { %9805 = vst [vmem:[#allocation8_spill] sm:$0xff] %v7621_v13  ;;  %v7625_v16 = vadd.f32 %v5898_v32, %v5864_v12 }
 0x110   : > { %v849_v29 = vpop.f32.mrf.mxu0 }
 0x111   : > { %9806 = vst [vmem:[#allocation16_spill] sm:$0xff] %v7625_v16  ;;  %v7627_v45 = vadd.f32 %v1141_v47, %v849_v29  ;;  %v5909_v8 = vpop.f32.mrf.mxu1 }
 0x112   : > { %6112 = vmatmul.mubr.msk.bf16.gmra.mxu1 %vm711_vm1, %v9782_v1 }
 0x113   : > { %9807 = vst [vmem:[#allocation12_spill] sm:$0xff] %v7627_v45  ;;  %v5867_v5 = vpop.f32.mrf.mxu0  ;;  %v1186_v37 = vpop.f32.mrf.mxu1  ;;  %6115 = vmatprep.mubr.msk.bf16.mxu1 %vm711_vm1, %v7169_v53 }
 0x114   : > { %v7631_v58 = vadd.f32 %v5901_v40, %v5867_v5  ;;  %v7649_v5 = vcombine.low %v7636_v18, %v7639_v7 }
 0x115   : > { %6070 = vmatmul.mubr.msk.bf16.gmra.mxu0 %vm711_vm1, %v9774_v26  ;;  %v862_v32 = vpop.f32.mrf.mxu0  ;;  %v5910_v12 = vpop.f32.mrf.mxu1 }
 0x116   : > { %9808 = vst [vmem:[#allocation19_spill] sm:$0xff] %v7631_v58  ;;  %v7643_v47 = vadd.f32 %v1154_v39, %v862_v32  ;;  %6073 = vmatprep.mubr.msk.bf16.mxu0 %vm711_vm1, %v9777_v57  ;;  %9812 = vst [vmem:[#allocation63_spill] sm:$0xff] %v7649_v5 }
 0x117   : > { %v5868_v40 = vpop.f32.mrf.mxu0  ;;  %v1189_v23 = vpop.f32.mrf.mxu1 }
 0x118   : > { %9811 = vst [vmem:[#allocation62_spill] sm:$0xff] %v7643_v47  ;;  %v7651_v29 = vadd.f32 %v5902_v11, %v5868_v40 }
 0x119   : > { %v865_v58 = vpop.f32.mrf.mxu0 }
 0x11a   : > { %9813 = vst [vmem:[#allocation64_spill] sm:$0xff] %v7651_v29  ;;  %v7653_v45 = vadd.f32 %v1157_v6, %v865_v58  ;;  %v5913_v16 = vpop.f32.mrf.mxu1  ;;  %6116 = vmatmul.mubr.msk.bf16.gmra.mxu1 %vm711_vm1, %v7649_v5 }
 0x11b   : > { %6155 = vmatprep.mubr.msk.bf16.mxu1 %vm711_vm1, %v9748_v20 }
 0x11c   : > { %9814 = vst [vmem:[#allocation65_spill] sm:$0xff] %v7653_v45  ;;  %v5871_v39 = vpop.f32.mrf.mxu0  ;;  %v1202_v32 = vpop.f32.mrf.mxu1  ;;  %v3215_v45 = vsel %vm760_vm0, %v7537_v49, 0 }
 0x11d   : > { %6074 = vmatmul.mubr.msk.bf16.gmra.mxu0 %vm711_vm1, %v9778_v50  ;;  %v7661_v57 = vadd.f32 %v5905_v59, %v5871_v39  ;;  %v7674_v50 = vld [vmem:[%s9520_s2 + $0x18] sm:$0xf] }
 0x11e   : > { %6077 = vmatprep.mubr.msk.bf16.mxu0 %vm711_vm1, %v9781_v19  ;;  %v878_v11 = vpop.f32.mrf.mxu0  ;;  %v5914_v58 = vpop.f32.mrf.mxu1 }
 0x11f   : > { %9815 = vst [vmem:[#allocation66_spill] sm:$0xff] %v7661_v57  ;;  %v7665_v6 = vadd.f32 %v1170_v25, %v878_v11 }
 0x120   : > { %v5872_v40 = vpop.f32.mrf.mxu0  ;;  %v1205_v26 = vpop.f32.mrf.mxu1 }
 0x121   : > { %9816 = vst [vmem:[#allocation67_spill] sm:$0xff] %v7665_v6  ;;  %v7669_v29 = vadd.f32 %v5906_v54, %v5872_v40 }
 0x122   : > { %v881_v59 = vpop.f32.mrf.mxu0  ;;  %v5953_v39 = vpop.f32.mrf.mxu1  ;;  %6156 = vmatmul.mubr.msk.bf16.vlgmr.msra.gmra.mxu1 %vm711_vm1, %v9751_v27 }
 0x123   : > { %9817 = vst [vmem:[#allocation68_spill] sm:$0xff] %v7669_v29  ;;  %v7678_v19 = vadd.f32 %v1173_v2, %v881_v59  ;;  %6159 = vmatprep.mubr.msk.bf16.mxu1 %vm711_vm1, %v9766_v33  ;;  %6222 = vmatpush3.bf16.msra.mxu1 %v3215_v45 }
 0x124   : > { %v1420_v49 = vpop.f32.mrf.mxu1  ;;  %6472 = vmatprep.subr.msk.bf16.mxu1 %vm760_vm0, %v7674_v50 }
 0x125   : > { %9818 = vst [vmem:[#allocation69_spill] sm:$0xff] %v7678_v19  ;;  %v5875_v25 = vpop.f32.mrf.mxu0  ;;  %6078 = vmatmul.mubr.msk.bf16.gmra.mxu0 %vm711_vm1, %v9782_v1 }
 0x126   : > { %v7686_v54 = vadd.f32 %v5909_v8, %v5875_v25  ;;  %6081 = vmatprep.mubr.msk.bf16.mxu0 %vm711_vm1, %v7169_v53  ;;  %v5954_v2 = vpop.f32.mrf.mxu1 }
 0x127   : > { %v894_v11 = vpop.f32.mrf.mxu0 }
 0x128   : > { %9819 = vst [vmem:[#allocation70_spill] sm:$0xff] %v7686_v54  ;;  %v7690_v40 = vadd.f32 %v1186_v37, %v894_v11  ;;  %v1423_v19 = vpop.f32.mrf.mxu1 }
 0x129   : > { %v5876_v59 = vpop.f32.mrf.mxu0 }
 0x12a   : > { %9820 = vst [vmem:[#allocation71_spill] sm:$0xff] %v7690_v40  ;;  %v7692_v45 = vadd.f32 %v5910_v12, %v5876_v59  ;;  %v5957_v6 = vpop.f32.mrf.mxu1  ;;  %6160 = vmatmul.mubr.msk.bf16.gmra.mxu1 %vm711_vm1, %v9768_v22 }
 0x12b   : > { %v897_v29 = vpop.f32.mrf.mxu0  ;;  %6163 = vmatprep.mubr.msk.bf16.mxu1 %vm711_vm1, %v9775_v55 }
 0x12c   : > { %9821 = vst [vmem:[#allocation72_spill] sm:$0xff] %v7692_v45  ;;  %v7696_v1 = vadd.f32 %v1189_v23, %v897_v29  ;;  %v1436_v37 = vpop.f32.mrf.mxu1  ;;  %v3017_v45 = vsel %vm760_vm0, %v7571_v24, 0 }
 0x12d   : > { %v5879_v8 = vpop.f32.mrf.mxu0  ;;  %6082 = vmatmul.mubr.msk.bf16.gmra.mxu0 %vm711_vm1, %v7649_v5 }
 0x12e   : > { %9822 = vst [vmem:[#allocation73_spill] sm:$0xff] %v7696_v1  ;;  %v7702_v25 = vadd.f32 %v5913_v16, %v5879_v8  ;;  %6121 = vmatprep.mubr.msk.bf16.mxu0 %vm711_vm1, %v9748_v20  ;;  %v5958_v11 = vpop.f32.mrf.mxu1  ;;  %v7721_v20 = vld [vmem:[%s9519_s1 + $0x18] sm:$0xf] }
 0x12f   : > { %v910_v12 = vpop.f32.mrf.mxu0 }
 0x130   : > { %9823 = vst [vmem:[#allocation74_spill] sm:$0xff] %v7702_v25  ;;  %v7706_v59 = vadd.f32 %v1202_v32, %v910_v12  ;;  %v1439_v23 = vpop.f32.mrf.mxu1 }
 0x131   : > { %v5880_v53 = vpop.f32.mrf.mxu0 }
 0x132   : > { %9824 = vst [vmem:[#allocation75_spill] sm:$0xff] %v7706_v59  ;;  %v7708_v29 = vadd.f32 %v5914_v58, %v5880_v53  ;;  %v5961_v40 = vpop.f32.mrf.mxu1  ;;  %6164 = vmatmul.mubr.msk.bf16.gmra.mxu1 %vm711_vm1, %v9776_v3 }
 0x133   : > { %v913_v1 = vpop.f32.mrf.mxu0  ;;  %6167 = vmatprep.mubr.msk.bf16.mxu1 %vm711_vm1, %v9779_v38 }
 0x134   : > { %9825 = vst [vmem:[#allocation76_spill] sm:$0xff] %v7708_v29  ;;  %v7714_v16 = vadd.f32 %v1205_v26, %v913_v1  ;;  %v1452_v32 = vpop.f32.mrf.mxu1  ;;  %v2575_v29 = vshrl.u32 %v7636_v18, 16 }
 0x135   : > { %v5919_v53 = vpop.f32.mrf.mxu0  ;;  %6122 = vmatmul.mubr.msk.bf16.vlgmr.msra.gmra.mxu0 %vm711_vm1, %v9751_v27 }
 0x136   : > { %9826 = vst [vmem:[#allocation77_spill] sm:$0xff] %v7714_v16  ;;  %v7725_v24 = vadd.f32 %v5953_v39, %v5919_v53  ;;  %6188 = vmatpush3.bf16.msra.mxu0 %v3017_v45  ;;  %6125 = vmatprep.mubr.msk.bf16.mxu0 %vm711_vm1, %v9766_v33  ;;  %v5962_v1 = vpop.f32.mrf.mxu1 }
 0x137   : > { %v1256_v26 = vpop.f32.mrf.mxu0  ;;  %6471 = vmatprep.subr.msk.bf16.mxu0 %vm760_vm0, %v7721_v20 }
 0x138   : > { %v7731_v58 = vadd.f32 %v1420_v49, %v1256_v26  ;;  %v1455_v12 = vpop.f32.mrf.mxu1 }
 0x139   : > { %v5920_v8 = vpop.f32.mrf.mxu0 }
 0x13a   : > { %v7733_v5 = vadd.f32 %v5954_v2, %v5920_v8  ;;  %v5965_v27 = vpop.f32.mrf.mxu1  ;;  %6168 = vmatmul.mubr.msk.bf16.gmra.mxu1 %vm711_vm1, %v9780_v61 }
 0x13b   : > { %v1259_v16 = vpop.f32.mrf.mxu0  ;;  %6171 = vmatprep.mubr.msk.bf16.mxu1 %vm711_vm1, %v9783_v42 }
 0x13c   : > { %v7737_v39 = vadd.f32 %v1423_v19, %v1259_v16  ;;  %v1468_v49 = vpop.f32.mrf.mxu1 }
 0x13d   : > { %v5923_v45 = vpop.f32.mrf.mxu0  ;;  %6126 = vmatmul.mubr.msk.bf16.gmra.mxu0 %vm711_vm1, %v9768_v22 }
 0x13e   : > { %v7743_v53 = vadd.f32 %v5957_v6, %v5923_v45  ;;  %6129 = vmatprep.mubr.msk.bf16.mxu0 %vm711_vm1, %v9775_v55  ;;  %v5966_v26 = vpop.f32.mrf.mxu1  ;;  %v2578_v6 = vshll.u32 %v7636_v18, 16  ;;  %v2588_v45 = vshrl.u32 %v7639_v7, 16 }
 0x13f   : > { %v1272_v2 = vpop.f32.mrf.mxu0 }
 0x140   : > { %v7747_v8 = vadd.f32 %v1436_v37, %v1272_v2  ;;  %v1471_v19 = vpop.f32.mrf.mxu1  ;;  %v2580_v57 = vrot.slane %v2578_v6, 5  ;;  %v2590_v13 = vrot.slane %v2588_v45, 4 }
 0x141   : > { %v5924_v33 = vpop.f32.mrf.mxu0 }
 0x142   : > { %v7749_v16 = vadd.f32 %v5958_v11, %v5924_v33  ;;  %v5969_v25 = vpop.f32.mrf.mxu1  ;;  %6172 = vmatmul.mubr.msk.bf16.gmra.mxu1 %vm711_vm1, %v9785_v10  ;;  %v2584_v33 = vshll.u32 %v7639_v7, 16 }
 0x143   : > { %v1275_v59 = vpop.f32.mrf.mxu0  ;;  %6175 = vmatprep.mubr.msk.bf16.mxu1 %vm711_vm1, %v9789_v63 }
 0x144   : > { %v7756_v55 = vadd.f32 %v1439_v23, %v1275_v59  ;;  %v1484_v11 = vpop.f32.mrf.mxu1  ;;  %v2577_v59 = vrot.slane %v2575_v29, 4  ;;  %v2586_v47 = vrot.slane %v2584_v33, 5 }
 0x145   : > { %v5927_v37 = vpop.f32.mrf.mxu0  ;;  %6130 = vmatmul.mubr.msk.bf16.gmra.mxu0 %vm711_vm1, %v9776_v3 }
 0x146   : > { %v7763_v2 = vadd.f32 %v5961_v40, %v5927_v37  ;;  %6133 = vmatprep.mubr.msk.bf16.mxu0 %vm711_vm1, %v9779_v38  ;;  %v5970_v54 = vpop.f32.mrf.mxu1  ;;  %v2591_v29 = vor.u32 %v2590_v13, %v2586_v47 }
 0x147   : > { %v1288_v22 = vpop.f32.mrf.mxu0 }
 0x148   : > { %v7767_v23 = vadd.f32 %v1452_v32, %v1288_v22  ;;  %v1487_v7 = vpop.f32.mrf.mxu1  ;;  %v2581_v22 = vor.u32 %v2580_v57, %v2577_v59  ;;  %v2594_v32 = vshll.u32 %v7770_v15, 16  ;;  %v2592_v38 = vrot.slane %v2591_v29, 4 }
 0x149   : > { %v5928_v18 = vpop.f32.mrf.mxu0 }
 0x14a   : > { %v7772_v51 = vadd.f32 %v5962_v1, %v5928_v18  ;;  %v5973_v40 = vpop.f32.mrf.mxu1  ;;  %6176 = vmatmul.mubr.msk.bf16.gmra.mxu1 %vm711_vm1, %v7192_v62  ;;  %v2582_v33 = vrot.slane %v2581_v22, 4  ;;  %v2596_v57 = vrot.slane %v2594_v32, 5 }
 0x14b   : > { %v1291_v3 = vpop.f32.mrf.mxu0  ;;  %6179 = vmatprep.mubr.msk.bf16.mxu1 %vm711_vm1, %v7210_v4 }
 0x14c   : > { %v7776_v37 = vadd.f32 %v1455_v12, %v1291_v3  ;;  %v1500_v18 = vpop.f32.mrf.mxu1  ;;  %v2597_v22 = vsel %vm6822_vm4, %v2592_v38, %v2596_v57 }
 0x14d   : > { %v5931_v6 = vpop.f32.mrf.mxu0  ;;  %6134 = vmatmul.mubr.msk.bf16.gmra.mxu0 %vm711_vm1, %v9780_v61  ;;  %v9848_v61 = vld [vmem:[#allocation8_spill] sm:$0xff] }
 0x14e   : > { %v7783_v1 = vadd.f32 %v5965_v27, %v5931_v6  ;;  %6137 = vmatprep.mubr.msk.bf16.mxu0 %vm711_vm1, %v9783_v42  ;;  %v5974_v3 = vpop.f32.mrf.mxu1 }
 0x14f   : > { %v1304_v45 = vpop.f32.mrf.mxu0 }
 0x150   : > { %v7787_v12 = vadd.f32 %v1468_v49, %v1304_v45  ;;  %v1503_v59 = vpop.f32.mrf.mxu1  ;;  %v2587_v49 = vsel %vm6822_vm4, %v2582_v33, %v2586_v47 }
 0x151   : > { %v5932_v13 = vpop.f32.mrf.mxu0  ;;  %v7807_v45 = vcombine.low %v2587_v49, %v2597_v22 }
 0x152   : > { %v7789_v15 = vadd.f32 %v5966_v26, %v5932_v13  ;;  %v5977_v44 = vpop.f32.mrf.mxu1  ;;  %6180 = vmatmul.mubr.msk.bf16.gmra.mxu1 %vm711_vm1, %v7230_v14 }
 0x153   : > { %v1307_v9 = vpop.f32.mrf.mxu0  ;;  %6183 = vmatprep.mubr.msk.bf16.mxu1 %vm711_vm1, %v7264_v17  ;;  %9829 = vst [vmem:[#allocation79_spill] sm:$0xff] %v7807_v45 }
 0x154   : > { %v7793_v27 = vadd.f32 %v1471_v19, %v1307_v9  ;;  %v1516_v26 = vpop.f32.mrf.mxu1 }
 0x155   : > { %v5935_v29 = vpop.f32.mrf.mxu0  ;;  %6138 = vmatmul.mubr.msk.bf16.gmra.mxu0 %vm711_vm1, %v9785_v10 }
 0x156   : > { %v7803_v32 = vadd.f32 %v5969_v25, %v5935_v29  ;;  %6141 = vmatprep.mubr.msk.bf16.mxu0 %vm711_vm1, %v9789_v63  ;;  %v5978_v19 = vpop.f32.mrf.mxu1 }
 0x157   : > { %v1320_v9 = vpop.f32.mrf.mxu0 }
 0x158   : > { %v7809_v13 = vadd.f32 %v1484_v11, %v1320_v9  ;;  %v1519_v33 = vpop.f32.mrf.mxu1 }
 0x159   : > { %v5936_v47 = vpop.f32.mrf.mxu0 }
 0x15a   : > { %v7811_v6 = vadd.f32 %v5970_v54, %v5936_v47  ;;  %v5981_v57 = vpop.f32.mrf.mxu1  ;;  %6184 = vmatmul.mubr.msk.bf16.gmra.mxu1 %vm711_vm1, %v7807_v45 }
 0x15b   : > { %v1323_v38 = vpop.f32.mrf.mxu0  ;;  %6223 = vmatprep.mubr.msk.bf16.mxu1 %vm711_vm1, %v7260_v28 }
 0x15c   : > { %v7815_v25 = vadd.f32 %v1487_v7, %v1323_v38  ;;  %v1532_v11 = vpop.f32.mrf.mxu1  ;;  %v3619_v38 = vsel %vm760_vm0, %v7674_v50, 0 }
 0x15d   : > { %v5939_v29 = vpop.f32.mrf.mxu0  ;;  %6142 = vmatmul.mubr.msk.bf16.gmra.mxu0 %vm711_vm1, %v7192_v62  ;;  %v7834_v62 = vld [vmem:[%s9520_s2 + $0x1c] sm:$0xf] }
 0x15e   : > { %v7821_v49 = vadd.f32 %v5973_v40, %v5939_v29  ;;  %6145 = vmatprep.mubr.msk.bf16.mxu0 %vm711_vm1, %v7210_v4  ;;  %v5982_v22 = vpop.f32.mrf.mxu1 }
 0x15f   : > { %v1336_v54 = vpop.f32.mrf.mxu0 }
 0x160   : > { %v7825_v9 = vadd.f32 %v1500_v18, %v1336_v54  ;;  %v1535_v7 = vpop.f32.mrf.mxu1 }
 0x161   : > { %v5940_v47 = vpop.f32.mrf.mxu0 }
 0x162   : > { %v7829_v63 = vadd.f32 %v5974_v3, %v5940_v47  ;;  %v6021_v29 = vpop.f32.mrf.mxu1  ;;  %6224 = vmatmul.mubr.msk.bf16.vlgmr.msra.gmra.mxu1 %vm711_vm1, %v7439_v36 }
 0x163   : > { %v1339_v40 = vpop.f32.mrf.mxu0  ;;  %v7841_v18 = vadd.f32 %v6021_v29, %v7725_v24  ;;  %6227 = vmatprep.mubr.msk.bf16.mxu1 %vm711_vm1, %v7467_v41  ;;  %6290 = vmatpush3.bf16.msra.mxu1 %v3619_v38 }
 0x164   : > { %v7838_v4 = vadd.f32 %v1503_v59, %v1339_v40  ;;  %v2011_v3 = vpop.f32.mrf.mxu1  ;;  %6474 = vmatprep.subr.msk.bf16.mxu1 %vm760_vm0, %v7834_v62 }
 0x165   : > { %v5943_v50 = vpop.f32.mrf.mxu0  ;;  %6146 = vmatmul.mubr.msk.bf16.gmra.mxu0 %vm711_vm1, %v7230_v14  ;;  %v7854_v24 = vadd.f32 %v2011_v3, %v7731_v58 }
 0x166   : > { %v7849_v54 = vadd.f32 %v5977_v44, %v5943_v50  ;;  %6149 = vmatprep.mubr.msk.bf16.mxu0 %vm711_vm1, %v7264_v17  ;;  %v6022_v47 = vpop.f32.mrf.mxu1 }
 0x167   : > { %v1352_v59 = vpop.f32.mrf.mxu0  ;;  %v7859_v38 = vadd.f32 %v6022_v47, %v7733_v5 }
 0x168   : > { %v7856_v40 = vadd.f32 %v1516_v26, %v1352_v59  ;;  %v2014_v14 = vpop.f32.mrf.mxu1 }
 0x169   : > { %v5944_v29 = vpop.f32.mrf.mxu0  ;;  %v7864_v44 = vadd.f32 %v2014_v14, %v7737_v39 }
 0x16a   : > { %v7861_v10 = vadd.f32 %v5978_v19, %v5944_v29  ;;  %v6025_v42 = vpop.f32.mrf.mxu1  ;;  %6228 = vmatmul.mubr.msk.bf16.gmra.mxu1 %vm711_vm1, %v7469_v52 }
 0x16b   : > { %v1355_v50 = vpop.f32.mrf.mxu0  ;;  %v7871_v26 = vadd.f32 %v6025_v42, %v7743_v53  ;;  %6231 = vmatprep.mubr.msk.bf16.mxu1 %vm711_vm1, %v7290_v43 }
 0x16c   : > { %v7868_v58 = vadd.f32 %v1519_v33, %v1355_v50  ;;  %v2027_v19 = vpop.f32.mrf.mxu1 }
 0x16d   : > { %v5947_v5 = vpop.f32.mrf.mxu0  ;;  %6150 = vmatmul.mubr.msk.bf16.gmra.mxu0 %vm711_vm1, %v7807_v45  ;;  %v7882_v39 = vadd.f32 %v2027_v19, %v7747_v8 }
 0x16e   : > { %v7877_v14 = vadd.f32 %v5981_v57, %v5947_v5  ;;  %6189 = vmatprep.mubr.msk.bf16.mxu0 %vm711_vm1, %v7260_v28  ;;  %v6026_v3 = vpop.f32.mrf.mxu1  ;;  %v3421_v28 = vsel %vm760_vm0, %v7721_v20, 0 }
 0x16f   : > { %v1368_v33 = vpop.f32.mrf.mxu0  ;;  %v7887_v53 = vadd.f32 %v6026_v3, %v7749_v16 }
 0x170   : > { %v7884_v42 = vadd.f32 %v1532_v11, %v1368_v33  ;;  %v2030_v47 = vpop.f32.mrf.mxu1 }
 0x171   : > { %v5948_v59 = vpop.f32.mrf.mxu0  ;;  %v7892_v57 = vadd.f32 %v2030_v47, %v7756_v55  ;;  %v7908_v55 = vld [vmem:[%s9519_s1 + $0x1c] sm:$0xf] }
 0x172   : > { %v7889_v29 = vadd.f32 %v5982_v22, %v5948_v59  ;;  %v6029_v8 = vpop.f32.mrf.mxu1  ;;  %6232 = vmatmul.mubr.msk.bf16.gmra.mxu1 %vm711_vm1, %v7302_v30 }
 0x173   : > { %v1371_v50 = vpop.f32.mrf.mxu0  ;;  %v7901_v16 = vadd.f32 %v6029_v8, %v7763_v2  ;;  %6235 = vmatprep.mubr.msk.bf16.mxu1 %vm711_vm1, %v7315_v0 }
 0x174   : > { %v7898_v11 = vadd.f32 %v1535_v7, %v1371_v50  ;;  %v2043_v20 = vpop.f32.mrf.mxu1 }
 0x175   : > { %v5987_v22 = vpop.f32.mrf.mxu0  ;;  %6190 = vmatmul.mubr.msk.bf16.vlgmr.msra.gmra.mxu0 %vm711_vm1, %v7439_v36  ;;  %v7918_v2 = vadd.f32 %v2043_v20, %v7767_v23 }
 0x176   : > { %v7913_v5 = vadd.f32 %v5987_v22, %v7557_v35  ;;  %6256 = vmatpush3.bf16.msra.mxu0 %v3421_v28  ;;  %6193 = vmatprep.mubr.msk.bf16.mxu0 %vm711_vm1, %v7467_v41  ;;  %v6030_v19 = vpop.f32.mrf.mxu1  ;;  %v9836_v41 = vld [vmem:[#allocation14_spill] sm:$0xff] }
 0x177   : > { %v1813_v7 = vpop.f32.mrf.mxu0  ;;  %6473 = vmatprep.subr.msk.bf16.mxu0 %vm760_vm0, %v7908_v55  ;;  %v7926_v3 = vadd.f32 %v6030_v19, %v7772_v51 }
 0x178   : > { %v7923_v33 = vadd.f32 %v1813_v7, %v7559_v48  ;;  %v2046_v59 = vpop.f32.mrf.mxu1 }
 0x179   : > { %v5988_v35 = vpop.f32.mrf.mxu0  ;;  %v7932_v50 = vadd.f32 %v2046_v59, %v7776_v37  ;;  %v9830_v59 = vld [vmem:[#allocation44_spill] sm:$0xff] }
 0x17a   : > { %v7929_v47 = vadd.f32 %v5988_v35, %v7564_v56  ;;  %v6033_v28 = vpop.f32.mrf.mxu1  ;;  %6236 = vmatmul.mubr.msk.bf16.gmra.mxu1 %vm711_vm1, %v7335_v21 }
 0x17b   : > { %v1816_v23 = vpop.f32.mrf.mxu0  ;;  %v7940_v48 = vadd.f32 %v6033_v28, %v7783_v1  ;;  %6239 = vmatprep.mubr.msk.bf16.mxu1 %vm711_vm1, %v7341_v60 }
 0x17c   : > { %v7937_v8 = vadd.f32 %v1816_v23, %v7575_v31  ;;  %v2059_v56 = vpop.f32.mrf.mxu1 }
 0x17d   : > { %v5991_v51 = vpop.f32.mrf.mxu0  ;;  %6194 = vmatmul.mubr.msk.bf16.gmra.mxu0 %vm711_vm1, %v7469_v52  ;;  %v7952_v31 = vadd.f32 %v2059_v56, %v7787_v12  ;;  %v9831_v12 = vld [vmem:[#allocation27_spill] sm:$0xff]  ;;  %v9832_v56 = vld [vmem:[#allocation49_spill] sm:$0xff] }
 0x17e   : > { %v7947_v37 = vadd.f32 %v5991_v51, %v7581_v46  ;;  %6197 = vmatprep.mubr.msk.bf16.mxu0 %vm711_vm1, %v7290_v43  ;;  %v6034_v1 = vpop.f32.mrf.mxu1 }
 0x17f   : > { %v1829_v22 = vpop.f32.mrf.mxu0  ;;  %v7958_v7 = vadd.f32 %v6034_v1, %v7789_v15  ;;  %v9833_v15 = vld [vmem:[#allocation30_spill] sm:$0xff] }
 0x180   : > { %v7955_v20 = vadd.f32 %v1829_v22, %v7585_v34  ;;  %v2062_v35 = vpop.f32.mrf.mxu1  ;;  %v9834_v1 = vld [vmem:[#allocation6_spill] sm:$0xff] }
 0x181   : > { %v5992_v19 = vpop.f32.mrf.mxu0  ;;  %v7964_v46 = vadd.f32 %v2062_v35, %v7793_v27 }
 0x182   : > { %v7961_v23 = vadd.f32 %v5992_v19, %v9830_v59  ;;  %v6037_v51 = vpop.f32.mrf.mxu1  ;;  %6240 = vmatmul.mubr.msk.bf16.gmra.mxu1 %vm711_vm1, %v9831_v12 }
 0x183   : > { %v1832_v28 = vpop.f32.mrf.mxu0  ;;  %v7972_v34 = vadd.f32 %v6037_v51, %v7803_v32  ;;  %6243 = vmatprep.mubr.msk.bf16.mxu1 %vm711_vm1, %v9833_v15 }
 0x184   : > { %v7969_v43 = vadd.f32 %v1832_v28, %v9832_v56  ;;  %v2075_v27 = vpop.f32.mrf.mxu1  ;;  %v9835_v28 = vld [vmem:[#allocation5_spill] sm:$0xff] }
 0x185   : > { %v5995_v22 = vpop.f32.mrf.mxu0  ;;  %6198 = vmatmul.mubr.msk.bf16.gmra.mxu0 %vm711_vm1, %v7302_v30  ;;  %v7984_v35 = vadd.f32 %v2075_v27, %v7809_v13  ;;  %v9838_v13 = vld [vmem:[#allocation39_spill] sm:$0xff]  ;;  %v9839_v27 = vld [vmem:[#allocation9_spill] sm:$0xff] }
 0x186   : > { %v7979_v19 = vadd.f32 %v5995_v22, %v9834_v1  ;;  %6201 = vmatprep.mubr.msk.bf16.mxu0 %vm711_vm1, %v7315_v0  ;;  %v6038_v32 = vpop.f32.mrf.mxu1 }
 0x187   : > { %v1845_v59 = vpop.f32.mrf.mxu0  ;;  %v7990_v56 = vadd.f32 %v6038_v32, %v7811_v6  ;;  %v9842_v6 = vld [vmem:[#allocation32_spill] sm:$0xff]  ;;  %v9843_v32 = vld [vmem:[#allocation61_spill] sm:$0xff] }
 0x188   : > { %v7987_v51 = vadd.f32 %v1845_v59, %v9835_v28  ;;  %v2078_v30 = vpop.f32.mrf.mxu1 }
 0x189   : > { %v5996_v52 = vpop.f32.mrf.mxu0  ;;  %v7996_v22 = vadd.f32 %v2078_v30, %v7815_v25  ;;  %v9844_v25 = vld [vmem:[#allocation13_spill] sm:$0xff] }
 0x18a   : > { %v7993_v36 = vadd.f32 %v5996_v52, %v9836_v41  ;;  %v6041_v0 = vpop.f32.mrf.mxu1  ;;  %6244 = vmatmul.mubr.msk.bf16.gmra.mxu1 %vm711_vm1, %v9838_v13  ;;  %v3003_v41 = vrot.slane %v9843_v32, 5 }
 0x18b   : > { %9837 = vst [vmem:[#allocation44_spill] sm:$0xff] %v7996_v22  ;;  %v1848_v1 = vpop.f32.mrf.mxu0  ;;  %v8004_v59 = vadd.f32 %v6041_v0, %v7821_v49  ;;  %6247 = vmatprep.mubr.msk.bf16.mxu1 %vm711_vm1, %v9842_v6  ;;  %v9850_v22 = vld [vmem:[#allocation16_spill] sm:$0xff] }
 0x18c   : > { %v8001_v45 = vadd.f32 %v1848_v1, %v9839_v27  ;;  %v2091_v30 = vpop.f32.mrf.mxu1  ;;  %v9847_v27 = vld [vmem:[#allocation60_spill] sm:$0xff] }
 0x18d   : > { %9841 = vst [vmem:[#allocation6_spill] sm:$0xff] %v8004_v59  ;;  %v5999_v52 = vpop.f32.mrf.mxu0  ;;  %6202 = vmatmul.mubr.msk.bf16.gmra.mxu0 %vm711_vm1, %v7335_v21  ;;  %v8017_v1 = vadd.f32 %v2091_v30, %v7825_v9  ;;  %v5234_v17 = vrot.slane %v9847_v27, 9  ;;  %v3005_v21 = vrot.slane %v3003_v41, 4  ;;  %v9852_v27 = vld [vmem:[#allocation33_spill] sm:$0xff] }
 0x18e   : > { %9840 = vst [vmem:[#allocation49_spill] sm:$0xff] %v8001_v45  ;;  %v8012_v28 = vadd.f32 %v5999_v52, %v9844_v25  ;;  %6205 = vmatprep.mubr.msk.bf16.mxu0 %vm711_vm1, %v7341_v60  ;;  %v6042_v49 = vpop.f32.mrf.mxu1  ;;  %v9849_v45 = vld [vmem:[#allocation78_spill] sm:$0xff] }
 0x18f   : > { %9846 = vst [vmem:[#allocation14_spill] sm:$0xff] %v8017_v1  ;;  %v1861_v0 = vpop.f32.mrf.mxu0  ;;  %v8024_v59 = vadd.f32 %v6042_v49, %v7829_v63  ;;  %v3006_v52 = vrot.slane %v9849_v45, 5  ;;  %v9854_v45 = vld [vmem:[#allocation43_spill] sm:$0xff] }
 0x190   : > { %9845 = vst [vmem:[#allocation5_spill] sm:$0xff] %v8012_v28  ;;  %v8021_v32 = vadd.f32 %v1861_v0, %v9848_v61  ;;  %v2094_v28 = vpop.f32.mrf.mxu1  ;;  %v9853_v61 = vld [vmem:[#allocation12_spill] sm:$0xff] }
 0x191   : > { %v6000_v25 = vpop.f32.mrf.mxu0  ;;  %v8031_v9 = vadd.f32 %v2094_v28, %v7838_v4  ;;  %v3007_v4 = vsel %vm7224_vm7, %v3005_v21, %v3006_v52 }
 0x192   : > { %v8028_v60 = vadd.f32 %v6000_v25, %v9850_v22  ;;  %v6045_v1 = vpop.f32.mrf.mxu1  ;;  %6248 = vmatmul.mubr.msk.bf16.gmra.mxu1 %vm711_vm1, %v9852_v27  ;;  %v3004_v22 = vsel %vm7224_vm7, %v5234_v17, %v3003_v41  ;;  %v9858_v41 = vld [vmem:[#allocation62_spill] sm:$0xff] }
 0x193   : > { %9851 = vst [vmem:[#allocation9_spill] sm:$0xff] %v8031_v9  ;;  %v1864_v30 = vpop.f32.mrf.mxu0  ;;  %v8039_v63 = vadd.f32 %v6045_v1, %v7849_v54  ;;  %6251 = vmatprep.mubr.msk.bf16.mxu1 %vm711_vm1, %v9854_v45  ;;  %v9856_v9 = vld [vmem:[#allocation19_spill] sm:$0xff]  ;;  %v8057_v17 = vcombine.low %v3004_v22, %v3007_v4  ;;  %v9860_v22 = vld [vmem:[#allocation65_spill] sm:$0xff] }
 0x194   : > { %v8036_v0 = vadd.f32 %v1864_v30, %v9853_v61  ;;  %v2107_v25 = vpop.f32.mrf.mxu1 }
 0x195   : > { %v6003_v28 = vpop.f32.mrf.mxu0  ;;  %6206 = vmatmul.mubr.msk.bf16.gmra.mxu0 %vm711_vm1, %v9831_v12  ;;  %v8055_v54 = vadd.f32 %v2107_v25, %v7856_v40  ;;  %9857 = vst [vmem:[#allocation61_spill] sm:$0xff] %v8057_v17 }
 0x196   : > { %v8050_v30 = vadd.f32 %v6003_v28, %v9856_v9  ;;  %6209 = vmatprep.mubr.msk.bf16.mxu0 %vm711_vm1, %v9833_v15  ;;  %v6046_v61 = vpop.f32.mrf.mxu1  ;;  %v9859_v9 = vld [vmem:[#allocation64_spill] sm:$0xff] }
 0x197   : > { %v1877_v1 = vpop.f32.mrf.mxu0  ;;  %v8063_v52 = vadd.f32 %v6046_v61, %v7861_v10  ;;  %v9862_v10 = vld [vmem:[#allocation7_spill] sm:$0xff] }
 0x198   : > { %v8060_v21 = vadd.f32 %v1877_v1, %v9858_v41  ;;  %v2110_v12 = vpop.f32.mrf.mxu1 }
 0x199   : > { %v6004_v49 = vpop.f32.mrf.mxu0  ;;  %v8069_v15 = vadd.f32 %v2110_v12, %v7868_v58  ;;  %v9863_v12 = vld [vmem:[#allocation66_spill] sm:$0xff] }
 0x19a   : > { %v8066_v28 = vadd.f32 %v6004_v49, %v9859_v9  ;;  %v6049_v25 = vpop.f32.mrf.mxu1  ;;  %6252 = vmatmul.mubr.msk.bf16.gmra.mxu1 %vm711_vm1, %v8057_v17 }
 0x19b   : > { %v1880_v40 = vpop.f32.mrf.mxu0  ;;  %v8077_v1 = vadd.f32 %v6049_v25, %v7877_v14  ;;  %6291 = vmatprep.mubr.msk.bf16.mxu1 %vm711_vm1, %v9862_v10 }
 0x19c   : > { %v8074_v4 = vadd.f32 %v1880_v40, %v9860_v22  ;;  %v2123_v58 = vpop.f32.mrf.mxu1  ;;  %v9865_v40 = vld [vmem:[#allocation67_spill] sm:$0xff] }
 0x19d   : > { %9861 = vst [vmem:[#allocation13_spill] sm:$0xff] %v8077_v1  ;;  %v6007_v61 = vpop.f32.mrf.mxu0  ;;  %6210 = vmatmul.mubr.msk.bf16.gmra.mxu0 %vm711_vm1, %v9838_v13  ;;  %v8089_v41 = vadd.f32 %v2123_v58, %v7884_v42  ;;  %v8108_v42 = vld [vmem:[%s9520_s2 + $0x20] sm:$0xf] }
 0x19e   : > { %v8084_v49 = vadd.f32 %v6007_v61, %v9863_v12  ;;  %6213 = vmatprep.mubr.msk.bf16.mxu0 %vm711_vm1, %v9842_v6  ;;  %v6050_v14 = vpop.f32.mrf.mxu1  ;;  %v4045_v61 = vsel %vm760_vm0, %v7834_v62, 0  ;;  %v9866_v12 = vld [vmem:[#allocation68_spill] sm:$0xff]  ;;  %9869 = vst [vmem:[#allocation16_spill] sm:$0xff] %v8108_v42 }
 0x19f   : > { %v1893_v9 = vpop.f32.mrf.mxu0  ;;  %v8095_v22 = vadd.f32 %v6050_v14, %v7889_v29  ;;  %v9870_v29 = vld [vmem:[#allocation11_spill] sm:$0xff]  ;;  %v9871_v14 = vld [vmem:[#allocation69_spill] sm:$0xff] }
 0x1a0   : > { %9864 = vst [vmem:[#allocation60_spill] sm:$0xff] %v8084_v49  ;;  %v8092_v25 = vadd.f32 %v1893_v9, %v9865_v40  ;;  %v2126_v13 = vpop.f32.mrf.mxu1 }
 0x1a1   : > { %v6008_v1 = vpop.f32.mrf.mxu0  ;;  %v8103_v6 = vadd.f32 %v2126_v13, %v7898_v11 }
 0x1a2   : > { %v8100_v49 = vadd.f32 %v6008_v1, %v9866_v12  ;;  %v6089_v9 = vpop.f32.mrf.mxu1  ;;  %6292 = vmatmul.mubr.msk.bf16.vlgmr.msra.gmra.mxu1 %vm711_vm1, %v9870_v29  ;;  %v9874_v1 = vld [vmem:[#allocation15_spill] sm:$0xff]  ;;  %v9875_v12 = vld [vmem:[#allocation70_spill] sm:$0xff] }
 0x1a3   : > { %9868 = vst [vmem:[#allocation78_spill] sm:$0xff] %v8103_v6  ;;  %v1896_v58 = vpop.f32.mrf.mxu0  ;;  %v8116_v62 = vadd.f32 %v6089_v9, %v7841_v18  ;;  %6295 = vmatprep.mubr.msk.bf16.mxu1 %vm711_vm1, %v9874_v1  ;;  %6358 = vmatpush3.bf16.msra.mxu1 %v4045_v61  ;;  %v9877_v61 = vld [vmem:[#allocation71_spill] sm:$0xff] }
 0x1a4   : > { %9867 = vst [vmem:[#allocation8_spill] sm:$0xff] %v8100_v49  ;;  %v8113_v40 = vadd.f32 %v1896_v58, %v9871_v14  ;;  %v2415_v13 = vpop.f32.mrf.mxu1  ;;  %6476 = vmatprep.subr.msk.bf16.mxu1 %vm760_vm0, %v8108_v42  ;;  %v9878_v49 = vld [vmem:[#allocation72_spill] sm:$0xff] }
 0x1a5   : > { %9873 = vst [vmem:[#allocation19_spill] sm:$0xff] %v8116_v62  ;;  %v6011_v11 = vpop.f32.mrf.mxu0  ;;  %6214 = vmatmul.mubr.msk.bf16.gmra.mxu0 %vm711_vm1, %v9852_v27  ;;  %v8130_v18 = vadd.f32 %v2415_v13, %v7854_v24  ;;  %v9880_v24 = vld [vmem:[#allocation17_spill] sm:$0xff] }
 0x1a6   : > { %9872 = vst [vmem:[#allocation12_spill] sm:$0xff] %v8113_v40  ;;  %v8125_v6 = vadd.f32 %v6011_v11, %v9875_v12  ;;  %6217 = vmatprep.mubr.msk.bf16.mxu0 %vm711_vm1, %v9854_v45  ;;  %v6090_v9 = vpop.f32.mrf.mxu1  ;;  %v9881_v13 = vld [vmem:[#allocation73_spill] sm:$0xff] }
 0x1a7   : > { %9876 = vst [vmem:[#allocation62_spill] sm:$0xff] %v8130_v18  ;;  %v1909_v58 = vpop.f32.mrf.mxu0  ;;  %v8136_v27 = vadd.f32 %v6090_v9, %v7859_v38  ;;  %v9884_v38 = vld [vmem:[#allocation20_spill] sm:$0xff] }
 0x1a8   : > { %v8133_v14 = vadd.f32 %v1909_v58, %v9877_v61  ;;  %v2418_v40 = vpop.f32.mrf.mxu1 }
 0x1a9   : > { %v6012_v62 = vpop.f32.mrf.mxu0  ;;  %v8142_v11 = vadd.f32 %v2418_v40, %v7864_v44 }
 0x1aa   : > { %v8139_v42 = vadd.f32 %v6012_v62, %v9878_v49  ;;  %v6093_v45 = vpop.f32.mrf.mxu1  ;;  %6296 = vmatmul.mubr.msk.bf16.gmra.mxu1 %vm711_vm1, %v9880_v24  ;;  %v9885_v49 = vld [vmem:[#allocation74_spill] sm:$0xff] }
 0x1ab   : > { %9879 = vst [vmem:[#allocation64_spill] sm:$0xff] %v8142_v11  ;;  %v1912_v12 = vpop.f32.mrf.mxu0  ;;  %v8150_v58 = vadd.f32 %v6093_v45, %v7871_v26  ;;  %6299 = vmatprep.mubr.msk.bf16.mxu1 %vm711_vm1, %v9884_v38  ;;  %v9886_v45 = vld [vmem:[#allocation75_spill] sm:$0xff] }
 0x1ac   : > { %v8147_v18 = vadd.f32 %v1912_v12, %v9881_v13  ;;  %v2431_v44 = vpop.f32.mrf.mxu1 }
 0x1ad   : > { %9883 = vst [vmem:[#allocation7_spill] sm:$0xff] %v8150_v58  ;;  %v6015_v9 = vpop.f32.mrf.mxu0  ;;  %6218 = vmatmul.mubr.msk.bf16.gmra.mxu0 %vm711_vm1, %v8057_v17  ;;  %v8162_v62 = vadd.f32 %v2431_v44, %v7882_v39  ;;  %v3847_v39 = vsel %vm760_vm0, %v7908_v55, 0 }
 0x1ae   : > { %9882 = vst [vmem:[#allocation65_spill] sm:$0xff] %v8147_v18  ;;  %v8157_v40 = vadd.f32 %v6015_v9, %v9885_v49  ;;  %6257 = vmatprep.mubr.msk.bf16.mxu0 %vm711_vm1, %v9862_v10  ;;  %v6094_v26 = vpop.f32.mrf.mxu1  ;;  %v9887_v18 = vld [vmem:[#allocation76_spill] sm:$0xff]  ;;  %v9888_v49 = vld [vmem:[#allocation22_spill] sm:$0xff] }
 0x1af   : > { %v1925_v61 = vpop.f32.mrf.mxu0  ;;  %v8168_v13 = vadd.f32 %v6094_v26, %v7887_v53  ;;  %v9890_v26 = vld [vmem:[#allocation24_spill] sm:$0xff] }
 0x1b0   : > { %v8165_v12 = vadd.f32 %v1925_v61, %v9886_v45  ;;  %v2434_v17 = vpop.f32.mrf.mxu1  ;;  %v9889_v61 = vld [vmem:[#allocation77_spill] sm:$0xff] }
 0x1b1   : > { %v6016_v58 = vpop.f32.mrf.mxu0  ;;  %v8174_v9 = vadd.f32 %v2434_v17, %v7892_v57  ;;  %v8191_v57 = vld [vmem:[%s9519_s1 + $0x20] sm:$0xf] }
 0x1b2   : > { %v8171_v11 = vadd.f32 %v6016_v58, %v9887_v18  ;;  %v6097_v44 = vpop.f32.mrf.mxu1  ;;  %6300 = vmatmul.mubr.msk.bf16.gmra.mxu1 %vm711_vm1, %v9888_v49 }
 0x1b3   : > { %v1928_v10 = vpop.f32.mrf.mxu0  ;;  %v8184_v53 = vadd.f32 %v6097_v44, %v7901_v16  ;;  %6303 = vmatprep.mubr.msk.bf16.mxu1 %vm711_vm1, %v9890_v26 }
 0x1b4   : > { %v8181_v45 = vadd.f32 %v1928_v10, %v9889_v61  ;;  %v2447_v55 = vpop.f32.mrf.mxu1 }
 0x1b5   : > { %v6055_v17 = vpop.f32.mrf.mxu0  ;;  %6258 = vmatmul.mubr.msk.bf16.vlgmr.msra.gmra.mxu0 %vm711_vm1, %v9870_v29  ;;  %v8201_v16 = vadd.f32 %v2447_v55, %v7918_v2  ;;  %v9892_v55 = vld [vmem:[#allocation28_spill] sm:$0xff] }
 0x1b6   : > { %v8196_v18 = vadd.f32 %v6055_v17, %v7913_v5  ;;  %6324 = vmatpush3.bf16.msra.mxu0 %v3847_v39  ;;  %6261 = vmatprep.mubr.msk.bf16.mxu0 %vm711_vm1, %v9874_v1  ;;  %v6098_v10 = vpop.f32.mrf.mxu1 }
 0x1b7   : > { %9891 = vst [vmem:[#allocation66_spill] sm:$0xff] %v8201_v16  ;;  %v2217_v58 = vpop.f32.mrf.mxu0  ;;  %6475 = vmatprep.subr.msk.bf16.mxu0 %vm760_vm0, %v8191_v57  ;;  %v8209_v29 = vadd.f32 %v6098_v10, %v7926_v3  ;;  %v9893_v3 = vld [vmem:[#allocation31_spill] sm:$0xff] }
 0x1b8   : > { %v8206_v44 = vadd.f32 %v2217_v58, %v7923_v33  ;;  %v2450_v61 = vpop.f32.mrf.mxu1 }
 0x1b9   : > { %v6056_v5 = vpop.f32.mrf.mxu0  ;;  %v8215_v1 = vadd.f32 %v2450_v61, %v7932_v50 }
 0x1ba   : > { %v8212_v39 = vadd.f32 %v6056_v5, %v7929_v47  ;;  %v6101_v17 = vpop.f32.mrf.mxu1  ;;  %6304 = vmatmul.mubr.msk.bf16.gmra.mxu1 %vm711_vm1, %v9892_v55 }
 0x1bb   : > { %v2220_v2 = vpop.f32.mrf.mxu0  ;;  %v8223_v33 = vadd.f32 %v6101_v17, %v7940_v48  ;;  %6307 = vmatprep.mubr.msk.bf16.mxu1 %vm711_vm1, %v9893_v3 }
 0x1bc   : > { %v8220_v16 = vadd.f32 %v2220_v2, %v7937_v8  ;;  %v2463_v47 = vpop.f32.mrf.mxu1 }
 0x1bd   : > { %v6059_v58 = vpop.f32.mrf.mxu0  ;;  %6262 = vmatmul.mubr.msk.bf16.gmra.mxu0 %vm711_vm1, %v9880_v24  ;;  %v8235_v8 = vadd.f32 %v2463_v47, %v7952_v31  ;;  %v9894_v31 = vld [vmem:[#allocation36_spill] sm:$0xff] }
 0x1be   : > { %v8230_v50 = vadd.f32 %v6059_v58, %v7947_v37  ;;  %6265 = vmatprep.mubr.msk.bf16.mxu0 %vm711_vm1, %v9884_v38  ;;  %v6102_v48 = vpop.f32.mrf.mxu1 }
 0x1bf   : > { %v2233_v10 = vpop.f32.mrf.mxu0  ;;  %v8241_v61 = vadd.f32 %v6102_v48, %v7958_v7  ;;  %v9895_v7 = vld [vmem:[#allocation40_spill] sm:$0xff] }
 0x1c0   : > { %v8238_v5 = vadd.f32 %v2233_v10, %v7955_v20  ;;  %v2466_v24 = vpop.f32.mrf.mxu1 }
 0x1c1   : > { %v6060_v2 = vpop.f32.mrf.mxu0  ;;  %v8247_v37 = vadd.f32 %v2466_v24, %v7964_v46 }
 0x1c2   : > { %v8244_v17 = vadd.f32 %v6060_v2, %v7961_v23  ;;  %v6105_v58 = vpop.f32.mrf.mxu1  ;;  %6308 = vmatmul.mubr.msk.bf16.gmra.mxu1 %vm711_vm1, %v9894_v31 }
 0x1c3   : > { %v2236_v38 = vpop.f32.mrf.mxu0  ;;  %v8255_v20 = vadd.f32 %v6105_v58, %v7972_v34  ;;  %6311 = vmatprep.mubr.msk.bf16.mxu1 %vm711_vm1, %v9895_v7 }
 0x1c4   : > { %v8252_v47 = vadd.f32 %v2236_v38, %v7969_v43  ;;  %v2479_v23 = vpop.f32.mrf.mxu1 }
 0x1c5   : > { %v6063_v10 = vpop.f32.mrf.mxu0  ;;  %6266 = vmatmul.mubr.msk.bf16.gmra.mxu0 %vm711_vm1, %v9888_v49  ;;  %v8267_v43 = vadd.f32 %v2479_v23, %v7984_v35  ;;  %v9899_v35 = vld [vmem:[#allocation45_spill] sm:$0xff] }
 0x1c6   : > { %v8262_v46 = vadd.f32 %v6063_v10, %v7979_v19  ;;  %6269 = vmatprep.mubr.msk.bf16.mxu0 %vm711_vm1, %v9890_v26  ;;  %v6106_v34 = vpop.f32.mrf.mxu1  ;;  %v9898_v19 = vld [vmem:[#allocation44_spill] sm:$0xff]  ;;  %v9900_v23 = vld [vmem:[#allocation49_spill] sm:$0xff] }
 0x1c7   : > { %9897 = vst [vmem:[#allocation68_spill] sm:$0xff] %v8267_v43  ;;  %v2249_v48 = vpop.f32.mrf.mxu0  ;;  %v8273_v24 = vadd.f32 %v6106_v34, %v7990_v56  ;;  %v9904_v56 = vld [vmem:[#allocation48_spill] sm:$0xff] }
 0x1c8   : > { %9896 = vst [vmem:[#allocation67_spill] sm:$0xff] %v8262_v46  ;;  %v8270_v2 = vadd.f32 %v2249_v48, %v7987_v51  ;;  %v2482_v49 = vpop.f32.mrf.mxu1  ;;  %v9902_v51 = vld [vmem:[#allocation6_spill] sm:$0xff] }
 0x1c9   : > { %v6064_v38 = vpop.f32.mrf.mxu0  ;;  %v8279_v10 = vadd.f32 %v2482_v49, %v9898_v19  ;;  %v9907_v19 = vld [vmem:[#allocation14_spill] sm:$0xff] }
 0x1ca   : > { %v8276_v58 = vadd.f32 %v6064_v38, %v7993_v36  ;;  %v6109_v46 = vpop.f32.mrf.mxu1  ;;  %6312 = vmatmul.mubr.msk.bf16.gmra.mxu1 %vm711_vm1, %v9899_v35  ;;  %v9905_v38 = vld [vmem:[#allocation5_spill] sm:$0xff] }
 0x1cb   : > { %v2252_v26 = vpop.f32.mrf.mxu0  ;;  %v8287_v48 = vadd.f32 %v6109_v46, %v9902_v51  ;;  %6315 = vmatprep.mubr.msk.bf16.mxu1 %vm711_vm1, %v9904_v56 }
 0x1cc   : > { %v8284_v43 = vadd.f32 %v2252_v26, %v9900_v23  ;;  %v2495_v36 = vpop.f32.mrf.mxu1 }
 0x1cd   : > { %9903 = vst [vmem:[#allocation69_spill] sm:$0xff] %v8287_v48  ;;  %v6067_v34 = vpop.f32.mrf.mxu0  ;;  %6270 = vmatmul.mubr.msk.bf16.gmra.mxu0 %vm711_vm1, %v9892_v55  ;;  %v8299_v26 = vadd.f32 %v2495_v36, %v9907_v19  ;;  %v9910_v19 = vld [vmem:[#allocation51_spill] sm:$0xff] }
 0x1ce   : > { %9901 = vst [vmem:[#allocation11_spill] sm:$0xff] %v8284_v43  ;;  %v8294_v49 = vadd.f32 %v6067_v34, %v9905_v38  ;;  %6273 = vmatprep.mubr.msk.bf16.mxu0 %vm711_vm1, %v9893_v3  ;;  %v6110_v23 = vpop.f32.mrf.mxu1  ;;  %v9909_v38 = vld [vmem:[#allocation9_spill] sm:$0xff] }
 0x1cf   : > { %9908 = vst [vmem:[#allocation70_spill] sm:$0xff] %v8299_v26  ;;  %v2265_v46 = vpop.f32.mrf.mxu0  ;;  %v8305_v48 = vadd.f32 %v6110_v23, %v8024_v59  ;;  %v9912_v59 = vld [vmem:[#allocation63_spill] sm:$0xff] }
 0x1d0   : > { %9906 = vst [vmem:[#allocation15_spill] sm:$0xff] %v8294_v49  ;;  %v8302_v51 = vadd.f32 %v2265_v46, %v8021_v32  ;;  %v2498_v43 = vpop.f32.mrf.mxu1  ;;  %v8324_v46 = vld [vmem:[%s6735_s19 + $0xcc] sm:$0xf] }
 0x1d1   : > { %v6068_v55 = vpop.f32.mrf.mxu0  ;;  %v8311_v3 = vadd.f32 %v2498_v43, %v9909_v38  ;;  %9913 = vst [vmem:[#allocation72_spill] sm:$0xff] %v8324_v46 }
 0x1d2   : > { %v8308_v34 = vadd.f32 %v6068_v55, %v8028_v60  ;;  %v6113_v36 = vpop.f32.mrf.mxu1  ;;  %6316 = vmatmul.mubr.msk.bf16.gmra.mxu1 %vm711_vm1, %v9910_v19  ;;  %v8327_v60 = vld [vmem:[%s6735_s19 + $0xd0] sm:$0xf] }
 0x1d3   : > { %v2268_v49 = vpop.f32.mrf.mxu0  ;;  %v8319_v32 = vadd.f32 %v6113_v36, %v8039_v63  ;;  %6319 = vmatprep.mubr.msk.bf16.mxu1 %vm711_vm1, %v9912_v59  ;;  %9914 = vst [vmem:[#allocation17_spill] sm:$0xff] %v8327_v60  ;;  %v5271_v38 = vcombine.low %v8324_v46, %v8327_v60 }
 0x1d4   : > { %v8316_v26 = vadd.f32 %v2268_v49, %v8036_v0  ;;  %v2511_v23 = vpop.f32.mrf.mxu1 }
 0x1d5   : > { %9911 = vst [vmem:[#allocation71_spill] sm:$0xff] %v8319_v32  ;;  %v6071_v43 = vpop.f32.mrf.mxu0  ;;  %6274 = vmatmul.mubr.msk.bf16.gmra.mxu0 %vm711_vm1, %v9894_v31  ;;  %v8337_v0 = vadd.f32 %v2511_v23, %v8055_v54 }
 0x1d6   : > { %v8332_v55 = vadd.f32 %v6071_v43, %v8050_v30  ;;  %6277 = vmatprep.mubr.msk.bf16.mxu0 %vm711_vm1, %v9895_v7  ;;  %v6114_v49 = vpop.f32.mrf.mxu1 }
 0x1d7   : > { %9915 = vst [vmem:[#allocation73_spill] sm:$0xff] %v8337_v0  ;;  %v2281_v63 = vpop.f32.mrf.mxu0  ;;  %v8345_v31 = vadd.f32 %v6114_v49, %v8063_v52  ;;  %v9920_v52 = vld [vmem:[#allocation21_spill] sm:$0xff] }
 0x1d8   : > { %v8342_v36 = vadd.f32 %v2281_v63, %v8060_v21  ;;  %v2514_v30 = vpop.f32.mrf.mxu1  ;;  %v9918_v21 = vld [vmem:[#allocation13_spill] sm:$0xff] }
 0x1d9   : > { %v6072_v32 = vpop.f32.mrf.mxu0  ;;  %v8351_v7 = vadd.f32 %v2514_v30, %v8069_v15  ;;  %v9921_v15 = vld [vmem:[#allocation60_spill] sm:$0xff] }
 0x1da   : > { %v8348_v43 = vadd.f32 %v6072_v32, %v8066_v28  ;;  %v6117_v23 = vpop.f32.mrf.mxu1  ;;  %6320 = vmatmul.mubr.msk.bf16.gmra.mxu1 %vm711_vm1, %v5271_v38 }
 0x1db   : > { %9916 = vst [vmem:[#allocation20_spill] sm:$0xff] %v8351_v7  ;;  %v2284_v54 = vpop.f32.mrf.mxu0  ;;  %v8358_v63 = vadd.f32 %v6117_v23, %v9918_v21  ;;  %6359 = vmatprep.mubr.msk.bf16.mxu1 %vm711_vm1, %v9920_v52 }
 0x1dc   : > { %v8355_v0 = vadd.f32 %v2284_v54, %v8074_v4  ;;  %v2527_v28 = vpop.f32.mrf.mxu1 }
 0x1dd   : > { %9919 = vst [vmem:[#allocation75_spill] sm:$0xff] %v8358_v63  ;;  %v6075_v49 = vpop.f32.mrf.mxu0  ;;  %6278 = vmatmul.mubr.msk.bf16.gmra.mxu0 %vm711_vm1, %v9899_v35  ;;  %v8370_v4 = vadd.f32 %v2527_v28, %v8089_v41 }
 0x1de   : > { %9917 = vst [vmem:[#allocation74_spill] sm:$0xff] %v8355_v0  ;;  %v8365_v32 = vadd.f32 %v6075_v49, %v9921_v15  ;;  %6281 = vmatprep.mubr.msk.bf16.mxu0 %vm711_vm1, %v9904_v56  ;;  %v6118_v54 = vpop.f32.mrf.mxu1  ;;  %v9925_v0 = vld [vmem:[#allocation16_spill] sm:$0xff]  ;;  %v9927_v56 = vld [vmem:[#allocation78_spill] sm:$0xff] }
 0x1df   : > { %9923 = vst [vmem:[#allocation22_spill] sm:$0xff] %v8370_v4  ;;  %v2297_v30 = vpop.f32.mrf.mxu0  ;;  %v8376_v21 = vadd.f32 %v6118_v54, %v8095_v22  ;;  %v4455_v49 = vsel %vm760_vm0, %v9925_v0, 0  ;;  %v9926_v15 = vld [vmem:[#allocation8_spill] sm:$0xff]  ;;  %v9928_v4 = vld [vmem:[#allocation23_spill] sm:$0xff] }
 0x1e0   : > { %9922 = vst [vmem:[#allocation76_spill] sm:$0xff] %v8365_v32  ;;  %v8373_v23 = vadd.f32 %v2297_v30, %v8092_v25  ;;  %v2530_v35 = vpop.f32.mrf.mxu1  ;;  %v9929_v25 = vld [vmem:[#allocation12_spill] sm:$0xff]  ;;  %v9930_v22 = vld [vmem:[#allocation19_spill] sm:$0xff] }
 0x1e1   : > { %9924 = vst [vmem:[#allocation77_spill] sm:$0xff] %v8376_v21  ;;  %v6076_v63 = vpop.f32.mrf.mxu0  ;;  %v8384_v7 = vadd.f32 %v2530_v35, %v9927_v56  ;;  %v9932_v21 = vld [vmem:[#allocation26_spill] sm:$0xff] }
 0x1e2   : > { %v8381_v32 = vadd.f32 %v6076_v63, %v9926_v15  ;;  %v6157_v28 = vpop.f32.mrf.mxu1  ;;  %6360 = vmatmul.mubr.msk.bf16.vlgmr.msra.gmra.mxu1 %vm711_vm1, %v9928_v4  ;;  %v9934_v15 = vld [vmem:[#allocation62_spill] sm:$0xff] }
 0x1e3   : > { %v2300_v41 = vpop.f32.mrf.mxu0  ;;  %v8392_v54 = vadd.f32 %v6157_v28, %v9930_v22  ;;  %6363 = vmatprep.mubr.msk.bf16.mxu1 %vm711_vm1, %v9932_v21  ;;  %6426 = vmatpush3.bf16.msra.mxu1 %v4455_v49 }
 0x1e4   : > { %v8389_v30 = vadd.f32 %v2300_v41, %v9929_v25  ;;  %v2841_v63 = vpop.f32.mrf.mxu1 }
 0x1e5   : > { %9931 = vst [vmem:[#allocation24_spill] sm:$0xff] %v8392_v54  ;;  %v6079_v0 = vpop.f32.mrf.mxu0  ;;  %6282 = vmatmul.mubr.msk.bf16.gmra.mxu0 %vm711_vm1, %v9910_v19  ;;  %v8404_v56 = vadd.f32 %v2841_v63, %v9934_v15  ;;  %v9937_v63 = vld [vmem:[#allocation29_spill] sm:$0xff] }
 0x1e6   : > { %v8399_v35 = vadd.f32 %v6079_v0, %v8125_v6  ;;  %6285 = vmatprep.mubr.msk.bf16.mxu0 %vm711_vm1, %v9912_v59  ;;  %v6158_v28 = vpop.f32.mrf.mxu1  ;;  %v9936_v6 = vld [vmem:[#allocation64_spill] sm:$0xff]  ;;  %v9938_v15 = vld [vmem:[#allocation65_spill] sm:$0xff] }
 0x1e7   : > { %9935 = vst [vmem:[#allocation31_spill] sm:$0xff] %v8404_v56  ;;  %v2313_v41 = vpop.f32.mrf.mxu0  ;;  %v8410_v49 = vadd.f32 %v6158_v28, %v8136_v27  ;;  %v9941_v27 = vld [vmem:[#allocation34_spill] sm:$0xff] }
 0x1e8   : > { %9933 = vst [vmem:[#allocation28_spill] sm:$0xff] %v8399_v35  ;;  %v8407_v25 = vadd.f32 %v2313_v41, %v8133_v14  ;;  %v2844_v19 = vpop.f32.mrf.mxu1  ;;  %v9939_v14 = vld [vmem:[#allocation7_spill] sm:$0xff] }
 0x1e9   : > { %v6080_v22 = vpop.f32.mrf.mxu0  ;;  %v8416_v0 = vadd.f32 %v2844_v19, %v9936_v6 }
 0x1ea   : > { %v8413_v54 = vadd.f32 %v6080_v22, %v8139_v42  ;;  %v6161_v35 = vpop.f32.mrf.mxu1  ;;  %6364 = vmatmul.mubr.msk.bf16.gmra.mxu1 %vm711_vm1, %v9937_v63 }
 0x1eb   : > { %v2316_v59 = vpop.f32.mrf.mxu0  ;;  %v8424_v41 = vadd.f32 %v6161_v35, %v9939_v14  ;;  %6367 = vmatprep.mubr.msk.bf16.mxu1 %vm711_vm1, %v9941_v27 }
 0x1ec   : > { %v8421_v56 = vadd.f32 %v2316_v59, %v9938_v15  ;;  %v2857_v42 = vpop.f32.mrf.mxu1 }
 0x1ed   : > { %9940 = vst [vmem:[#allocation36_spill] sm:$0xff] %v8424_v41  ;;  %v6083_v28 = vpop.f32.mrf.mxu0  ;;  %6286 = vmatmul.mubr.msk.bf16.gmra.mxu0 %vm711_vm1, %v5271_v38  ;;  %v8435_v19 = vadd.f32 %v2857_v42, %v8162_v62  ;;  %v4257_v62 = vsel %vm760_vm0, %v8191_v57, 0  ;;  %v9942_v42 = vld [vmem:[#allocation38_spill] sm:$0xff] }
 0x1ee   : > { %v8430_v22 = vadd.f32 %v6083_v28, %v8157_v40  ;;  %6325 = vmatprep.mubr.msk.bf16.mxu0 %vm711_vm1, %v9920_v52  ;;  %v6162_v59 = vpop.f32.mrf.mxu1 }
 0x1ef   : > { %v2329_v6 = vpop.f32.mrf.mxu0  ;;  %v8441_v15 = vadd.f32 %v6162_v59, %v8168_v13 }
 0x1f0   : > { %v8438_v35 = vadd.f32 %v2329_v6, %v8165_v12  ;;  %v2860_v38 = vpop.f32.mrf.mxu1  ;;  %v9943_v6 = vld [vmem:[#allocation42_spill] sm:$0xff] }
 0x1f1   : > { %v6084_v14 = vpop.f32.mrf.mxu0  ;;  %v8447_v40 = vadd.f32 %v2860_v38, %v8174_v9 }
 0x1f2   : > { %v8444_v41 = vadd.f32 %v6084_v14, %v8171_v11  ;;  %v6165_v28 = vpop.f32.mrf.mxu1  ;;  %6368 = vmatmul.mubr.msk.bf16.gmra.mxu1 %vm711_vm1, %v9942_v42 }
 0x1f3   : > { %v2332_v52 = vpop.f32.mrf.mxu0  ;;  %v8457_v13 = vadd.f32 %v6165_v28, %v8184_v53  ;;  %6371 = vmatprep.mubr.msk.bf16.mxu1 %vm711_vm1, %v9943_v6 }
 0x1f4   : > { %v8454_v12 = vadd.f32 %v2332_v52, %v8181_v45  ;;  %v2873_v9 = vpop.f32.mrf.mxu1  ;;  %v9944_v45 = vld [vmem:[#allocation66_spill] sm:$0xff] }
 0x1f5   : > { %v6123_v11 = vpop.f32.mrf.mxu0  ;;  %6326 = vmatmul.mubr.msk.bf16.vlgmr.msra.gmra.mxu0 %vm711_vm1, %v9928_v4  ;;  %v8469_v59 = vadd.f32 %v2873_v9, %v9944_v45  ;;  %v9945_v9 = vld [vmem:[#allocation46_spill] sm:$0xff] }
 0x1f6   : > { %v8464_v57 = vadd.f32 %v6123_v11, %v8196_v18  ;;  %6392 = vmatpush3.bf16.msra.mxu0 %v4257_v62  ;;  %6329 = vmatprep.mubr.msk.bf16.mxu0 %vm711_vm1, %v9932_v21  ;;  %v6166_v14 = vpop.f32.mrf.mxu1 }
 0x1f7   : > { %v2643_v53 = vpop.f32.mrf.mxu0  ;;  %v8475_v52 = vadd.f32 %v6166_v14, %v8209_v29  ;;  %v9946_v29 = vld [vmem:[#allocation50_spill] sm:$0xff] }
 0x1f8   : > { %v8472_v38 = vadd.f32 %v2643_v53, %v8206_v44  ;;  %v2876_v28 = vpop.f32.mrf.mxu1 }
 0x1f9   : > { %v6124_v4 = vpop.f32.mrf.mxu0  ;;  %v8481_v62 = vadd.f32 %v2876_v28, %v8215_v1 }
 0x1fa   : > { %v8478_v18 = vadd.f32 %v6124_v4, %v8212_v39  ;;  %v6169_v11 = vpop.f32.mrf.mxu1  ;;  %6372 = vmatmul.mubr.msk.bf16.gmra.mxu1 %vm711_vm1, %v9945_v9 }
 0x1fb   : > { %v2646_v21 = vpop.f32.mrf.mxu0  ;;  %v8489_v44 = vadd.f32 %v6169_v11, %v8223_v33  ;;  %6375 = vmatprep.mubr.msk.bf16.mxu1 %vm711_vm1, %v9946_v29 }
 0x1fc   : > { %v8486_v45 = vadd.f32 %v2646_v21, %v8220_v16  ;;  %v2889_v39 = vpop.f32.mrf.mxu1 }
 0x1fd   : > { %v6127_v53 = vpop.f32.mrf.mxu0  ;;  %6330 = vmatmul.mubr.msk.bf16.gmra.mxu0 %vm711_vm1, %v9937_v63  ;;  %v8501_v16 = vadd.f32 %v2889_v39, %v8235_v8  ;;  %v3818_v8 = vshll.u32 %v8324_v46, 16 }
 0x1fe   : > { %v8496_v1 = vadd.f32 %v6127_v53, %v8230_v50  ;;  %6333 = vmatprep.mubr.msk.bf16.mxu0 %vm711_vm1, %v9941_v27  ;;  %v6170_v33 = vpop.f32.mrf.mxu1  ;;  %v3815_v27 = vshrl.u32 %v8324_v46, 16 }
 0x1ff   : > { %9947 = vst [vmem:[#allocation40_spill] sm:$0xff] %v8501_v16  ;;  %v2659_v14 = vpop.f32.mrf.mxu0  ;;  %v8507_v28 = vadd.f32 %v6170_v33, %v8241_v61  ;;  %v9950_v16 = vld [vmem:[#allocation52_spill] sm:$0xff] }
 0x200   : > { %v8504_v4 = vadd.f32 %v2659_v14, %v8238_v5  ;;  %v2892_v63 = vpop.f32.mrf.mxu1  ;;  %v3828_v5 = vshrl.u32 %v8327_v60, 16  ;;  %v9953_v14 = vld [vmem:[#allocation53_spill] sm:$0xff] }
 0x201   : > { %v6128_v21 = vpop.f32.mrf.mxu0  ;;  %v8513_v50 = vadd.f32 %v2892_v63, %v8247_v37  ;;  %v3824_v37 = vshll.u32 %v8327_v60, 16  ;;  %v9954_v63 = vld [vmem:[#allocation67_spill] sm:$0xff] }
 0x202   : > { %v8510_v11 = vadd.f32 %v6128_v21, %v8244_v17  ;;  %v6173_v39 = vpop.f32.mrf.mxu1  ;;  %6376 = vmatmul.mubr.msk.bf16.gmra.mxu1 %vm711_vm1, %v9950_v16 }
 0x203   : > { %9949 = vst [vmem:[#allocation45_spill] sm:$0xff] %v8513_v50  ;;  %v2662_v53 = vpop.f32.mrf.mxu0  ;;  %v8524_v17 = vadd.f32 %v6173_v39, %v8255_v20  ;;  %6379 = vmatprep.mubr.msk.bf16.mxu1 %vm711_vm1, %v9953_v14 }
 0x204   : > { %9948 = vst [vmem:[#allocation44_spill] sm:$0xff] %v8510_v11  ;;  %v8521_v61 = vadd.f32 %v2662_v53, %v8252_v47  ;;  %v2905_v21 = vpop.f32.mrf.mxu1  ;;  %v9956_v47 = vld [vmem:[#allocation68_spill] sm:$0xff]  ;;  %v3830_v11 = vrot.slane %v3828_v5, 4  ;;  %v9962_v5 = vld [vmem:[#allocation69_spill] sm:$0xff] }
 0x205   : > { %9952 = vst [vmem:[#allocation6_spill] sm:$0xff] %v8524_v17  ;;  %v6131_v33 = vpop.f32.mrf.mxu0  ;;  %6334 = vmatmul.mubr.msk.bf16.gmra.mxu0 %vm711_vm1, %v9942_v42  ;;  %v8537_v20 = vadd.f32 %v2905_v21, %v9956_v47  ;;  %v3817_v17 = vrot.slane %v3815_v27, 4  ;;  %v3826_v42 = vrot.slane %v3824_v37, 5  ;;  %v9960_v47 = vld [vmem:[#allocation54_spill] sm:$0xff] }
 0x206   : > { %9951 = vst [vmem:[#allocation49_spill] sm:$0xff] %v8521_v61  ;;  %v8532_v46 = vadd.f32 %v6131_v33, %v9954_v63  ;;  %6337 = vmatprep.mubr.msk.bf16.mxu0 %vm711_vm1, %v9943_v6  ;;  %v6174_v39 = vpop.f32.mrf.mxu1  ;;  %v3820_v61 = vrot.slane %v3818_v8, 5 }
 0x207   : > { %v2675_v53 = vpop.f32.mrf.mxu0  ;;  %v8543_v50 = vadd.f32 %v6174_v39, %v8273_v24  ;;  %v9961_v24 = vld [vmem:[#allocation11_spill] sm:$0xff]  ;;  %v9964_v39 = vld [vmem:[#allocation56_spill] sm:$0xff] }
 0x208   : > { %9955 = vst [vmem:[#allocation48_spill] sm:$0xff] %v8532_v46  ;;  %v8540_v60 = vadd.f32 %v2675_v53, %v8270_v2  ;;  %v2908_v63 = vpop.f32.mrf.mxu1  ;;  %v8546_v46 = vld [vmem:[%s6735_s19 + $0xd4] sm:$0x1]  ;;  %v3821_v2 = vor.u32 %v3820_v61, %v3817_v17  ;;  %v9966_v61 = vld [vmem:[#allocation70_spill] sm:$0xff]  ;;  %s201_s19 = sand.u32 1, %s6613_s13  }
 0x209   : > { %v6132_v33 = vpop.f32.mrf.mxu0  ;;  %9957 = vst [vmem:[#allocation5_spill] sm:$0xff] %v8546_v46  ;;  %v8552_v21 = vadd.f32 %v2908_v63, %v8279_v10  ;;  %s4998_s7 = sshll.u32 %s201_s19, 7  ;;  %s9473_s23 = scalar_lea.sflag [#allocation3], %s201_s19 }
 0x20a   : > { %v8549_v6 = vadd.f32 %v6132_v33, %v8276_v58  ;;  %v6177_v8 = vpop.f32.mrf.mxu1  ;;  %6380 = vmatmul.mubr.msk.bf16.gmra.mxu1 %vm711_vm1, %v9960_v47  ;;  %v3831_v58 = vor.u32 %v3830_v11, %v3826_v42  ;;  %v3834_v33 = vshll.u32 %v8546_v46, 16  ;;  %s9340_s8 = scalar_lea.vmem [#allocation2], %s4998_s7 }
 0x20b   : > { %9959 = vst [vmem:[#allocation9_spill] sm:$0xff] %v8552_v21  ;;  %v2678_v27 = vpop.f32.mrf.mxu0  ;;  %v8560_v37 = vadd.f32 %v6177_v8, %v9962_v5  ;;  %6383 = vmatprep.mubr.msk.bf16.mxu1 %vm711_vm1, %v9964_v39  ;;  %v9965_v21 = vld [vmem:[#allocation15_spill] sm:$0xff]  ;;  %s4889_s10 = sshll.u32 %s9340_s8, 4  ;;  %s9467_s10 = int_to_ptr.vmem [resolvable:$true] %s4889_s10 }
 0x20c   : > { %9958 = vst [vmem:[#allocation14_spill] sm:$0xff] %v8549_v6  ;;  %v8557_v53 = vadd.f32 %v2678_v27, %v9961_v24  ;;  %v2921_v63 = vpop.f32.mrf.mxu1  ;;  %v3822_v24 = vrot.slane %v3821_v2, 4  ;;  %v3836_v46 = vrot.slane %v3834_v33, 5  ;;  %s6553_s15 = scalar_lea.vmem %s9467_s10, 2048  ;;  %p6560_p1 = scmp.lt.s32.totalorder %s9467_s10, %s6558_s27 }
 0x20d   : > { %9963 = vst [vmem:[#allocation51_spill] sm:$0xff] %v8560_v37  ;;  %v6135_v10 = vpop.f32.mrf.mxu0  ;;  %6338 = vmatmul.mubr.msk.bf16.gmra.mxu0 %vm711_vm1, %v9945_v9  ;;  %v8573_v17 = vadd.f32 %v2921_v63, %v9966_v61  ;;  %v3832_v9 = vrot.slane %v3831_v58, 4  ;;  %v9970_v58 = vld [vmem:[#allocation79_spill] sm:$0xff]  ;;  %p6554_p12 = scmp.ne.s32.totalorder %s9467_s10, %s6553_s15  ;;  %p6561_p2 = scmp.lt.s32.totalorder %s6559_s28, %s6553_s15 }
 0x20e   : > { %v8568_v6 = vadd.f32 %v6135_v10, %v9965_v21  ;;  %6341 = vmatprep.mubr.msk.bf16.mxu0 %vm711_vm1, %v9946_v29  ;;  %v6178_v8 = vpop.f32.mrf.mxu1 }
 0x20f   : > { %9967 = vst [vmem:[#allocation63_spill] sm:$0xff] %v8573_v17  ;;  %v2691_v27 = vpop.f32.mrf.mxu0  ;;  %v8579_v5 = vadd.f32 %v6178_v8, %v8305_v48  ;;  %v9968_v17 = vld [vmem:[#allocation57_spill] sm:$0xff]  ;;  %v9969_v48 = vld [vmem:[#allocation71_spill] sm:$0xff]  ;;  %p6555_p13 = pnand %p6554_p12, %p6694_p4  ;;  %p6562_p3 = por %p6561_p2, %p6560_p1 }
 0x210   : > { %v8576_v11 = vadd.f32 %v2691_v27, %v8302_v51  ;;  %v2924_v21 = vpop.f32.mrf.mxu1  ;;  %v9972_v8 = vld [vmem:[#allocation73_spill] sm:$0xff] }
 0x211   : > { %v6136_v37 = vpop.f32.mrf.mxu0  ;;  %v8585_v29 = vadd.f32 %v2924_v21, %v8311_v3  ;;  %v3837_v3 = vsel %vm6822_vm4, %v3832_v9, %v3836_v46  ;;  %p6556_p0 = pneg %p6555_p13 }
 0x212   : > { %v8582_v10 = vadd.f32 %v6136_v37, %v8308_v34  ;;  %v6181_v61 = vpop.f32.mrf.mxu1  ;;  %6384 = vmatmul.mubr.msk.bf16.gmra.mxu1 %vm711_vm1, %v9968_v17  ;;  %v3827_v34 = vsel %vm6822_vm4, %v3822_v24, %v3826_v42 }
 0x213   : > { %v2694_v63 = vpop.f32.mrf.mxu0  ;;  %v8593_v2 = vadd.f32 %v6181_v61, %v9969_v48  ;;  %6387 = vmatprep.mubr.msk.bf16.mxu1 %vm711_vm1, %v9970_v58  ;;  %v5306_v42 = vcombine.low %v3827_v34, %v3837_v3  ;;  %v9973_v48 = vld [vmem:[#allocation20_spill] sm:$0xff]  ;;  %p6563_p5 = pnand %p6562_p3, %p6556_p0 }
 0x214   : > { %v8590_v51 = vadd.f32 %v2694_v63, %v8316_v26  ;;  %v2937_v27 = vpop.f32.mrf.mxu1 }
 0x215   : > { %v6139_v37 = vpop.f32.mrf.mxu0  ;;  %6342 = vmatmul.mubr.msk.bf16.gmra.mxu0 %vm711_vm1, %v9950_v16  ;;  %v8609_v21 = vadd.f32 %v2937_v27, %v9972_v8  ;;  %v9974_v27 = vld [vmem:[#allocation74_spill] sm:$0xff] }
 0x216   : > { %v8604_v26 = vadd.f32 %v6139_v37, %v8332_v55  ;;  %6345 = vmatprep.mubr.msk.bf16.mxu0 %vm711_vm1, %v9953_v14  ;;  %v6182_v61 = vpop.f32.mrf.mxu1 }
 0x217   : > { %v2707_v63 = vpop.f32.mrf.mxu0  ;;  %v8615_v46 = vadd.f32 %v6182_v61, %v8345_v31  ;;  %v9978_v31 = vld [vmem:[#allocation37_spill] sm:$0xff] }
 0x218   : > { %v8612_v24 = vadd.f32 %v2707_v63, %v8342_v36  ;;  %v2940_v9 = vpop.f32.mrf.mxu1  ;;  %v9976_v36 = vld [vmem:[#allocation75_spill] sm:$0xff]  ;;  %v9979_v63 = vld [vmem:[#allocation76_spill] sm:$0xff] }
 0x219   : > { %v6140_v16 = vpop.f32.mrf.mxu0  ;;  %v8621_v33 = vadd.f32 %v2940_v9, %v9973_v48 }
 0x21a   : > { %v8618_v55 = vadd.f32 %v6140_v16, %v8348_v43  ;;  %v6185_v37 = vpop.f32.mrf.mxu1  ;;  %6388 = vmatmul.mubr.msk.bf16.gmra.mxu1 %vm711_vm1, %v5306_v42  ;;  %v9980_v16 = vld [vmem:[#allocation22_spill] sm:$0xff] }
 0x21b   : > { %v2710_v14 = vpop.f32.mrf.mxu0  ;;  %v8628_v3 = vadd.f32 %v6185_v37, %v9976_v36  ;;  %6427 = vmatprep.mubr.msk.bf16.mxu1 %vm711_vm1, %v9978_v31 }
 0x21c   : > { %v8625_v34 = vadd.f32 %v2710_v14, %v9974_v27  ;;  %v2953_v43 = vpop.f32.mrf.mxu1  ;;  %v9981_v27 = vld [vmem:[#allocation77_spill] sm:$0xff] }
 0x21d   : > { %9977 = vst [vmem:[#allocation21_spill] sm:$0xff] %v8628_v3  ;;  %v6143_v8 = vpop.f32.mrf.mxu0  ;;  %6346 = vmatmul.mubr.msk.bf16.gmra.mxu0 %vm711_vm1, %v9960_v47  ;;  %v8640_v9 = vadd.f32 %v2953_v43, %v9980_v16  ;;  %v9983_v43 = vld [vmem:[#allocation47_spill] sm:$0xff] }
 0x21e   : > { %9975 = vst [vmem:[#allocation13_spill] sm:$0xff] %v8625_v34  ;;  %v8635_v61 = vadd.f32 %v6143_v8, %v9979_v63  ;;  %6349 = vmatprep.mubr.msk.bf16.mxu0 %vm711_vm1, %v9964_v39  ;;  %v6186_v14 = vpop.f32.mrf.mxu1 }
 0x21f   : > { %v2723_v48 = vpop.f32.mrf.mxu0  ;;  %v8646_v36 = vadd.f32 %v6186_v14, %v9981_v27  ;;  %v9987_v14 = vld [vmem:[#allocation41_spill] sm:$0xff] }
 0x220   : > { %v8643_v37 = vadd.f32 %v2723_v48, %v8373_v23  ;;  %v2956_v47 = vpop.f32.mrf.mxu1  ;;  %v9985_v23 = vld [vmem:[#allocation24_spill] sm:$0xff] }
 0x221   : > { %v6144_v3 = vpop.f32.mrf.mxu0  ;;  %v8652_v8 = vadd.f32 %v2956_v47, %v8384_v7  ;;  %v9989_v47 = vld [vmem:[#allocation31_spill] sm:$0xff] }
 0x222   : > { %v8649_v34 = vadd.f32 %v6144_v3, %v8381_v32  ;;  %v6225_v63 = vpop.f32.mrf.mxu1  ;;  %6428 = vmatmul.mubr.msk.bf16.vlgmr.msra.gmra.mxu1 %vm711_vm1, %v9983_v43  ;;  %v9988_v32 = vld [vmem:[#allocation28_spill] sm:$0xff] }
 0x223   : > { %9982 = vst [vmem:[#allocation60_spill] sm:$0xff] %v8652_v8  ;;  %v2726_v39 = vpop.f32.mrf.mxu0  ;;  %v8660_v48 = vadd.f32 %v6225_v63, %v9985_v23  ;;  %6431 = vmatprep.mubr.msk.bf16.mxu1 %vm711_vm1, %v9987_v14 }
 0x224   : > { %v8657_v16 = vadd.f32 %v2726_v39, %v8389_v30  ;;  %v3251_v7 = vpop.f32.mrf.mxu1 }
 0x225   : > { %9986 = vst [vmem:[#allocation8_spill] sm:$0xff] %v8660_v48  ;;  %v6147_v27 = vpop.f32.mrf.mxu0  ;;  %6350 = vmatmul.mubr.msk.bf16.gmra.mxu0 %vm711_vm1, %v9968_v17  ;;  %v8672_v30 = vadd.f32 %v3251_v7, %v9989_v47  ;;  %v9990_v7 = vld [vmem:[#allocation58_spill] sm:$0xff] }
 0x226   : > { %9984 = vst [vmem:[#allocation16_spill] sm:$0xff] %v8657_v16  ;;  %v8667_v3 = vadd.f32 %v6147_v27, %v9988_v32  ;;  %6353 = vmatprep.mubr.msk.bf16.mxu0 %vm711_vm1, %v9970_v58  ;;  %v6226_v63 = vpop.f32.mrf.mxu1 }
 0x227   : > { %v2739_v39 = vpop.f32.mrf.mxu0  ;;  %v8678_v48 = vadd.f32 %v6226_v63, %v8410_v49  ;;  %v9993_v49 = vld [vmem:[#allocation59_spill] sm:$0xff] }
 0x228   : > { %v8675_v23 = vadd.f32 %v2739_v39, %v8407_v25  ;;  %v3254_v17 = vpop.f32.mrf.mxu1  ;;  %v9991_v25 = vld [vmem:[#allocation36_spill] sm:$0xff] }
 0x229   : > { %v6148_v16 = vpop.f32.mrf.mxu0  ;;  %v8684_v27 = vadd.f32 %v3254_v17, %v8416_v0 }
 0x22a   : > { %v8681_v8 = vadd.f32 %v6148_v16, %v8413_v54  ;;  %v6229_v32 = vpop.f32.mrf.mxu1  ;;  %6432 = vmatmul.mubr.msk.bf16.gmra.mxu1 %vm711_vm1, %v9990_v7 }
 0x22b   : > { %v2742_v58 = vpop.f32.mrf.mxu0  ;;  %v8692_v39 = vadd.f32 %v6229_v32, %v9991_v25  ;;  %6435 = vmatprep.mubr.msk.bf16.mxu1 %vm711_vm1, %v9993_v49 }
 0x22c   : > { %v8689_v47 = vadd.f32 %v2742_v58, %v8421_v56  ;;  %v3267_v54 = vpop.f32.mrf.mxu1 }
 0x22d   : > { %9992 = vst [vmem:[#allocation78_spill] sm:$0xff] %v8692_v39  ;;  %v6151_v63 = vpop.f32.mrf.mxu0  ;;  %6354 = vmatmul.mubr.msk.bf16.gmra.mxu0 %vm711_vm1, %v5306_v42  ;;  %v8703_v16 = vadd.f32 %v3267_v54, %v8435_v19  ;;  %v9994_v19 = vld [vmem:[#allocation25_spill] sm:$0xff] }
 0x22e   : > { %v8698_v0 = vadd.f32 %v6151_v63, %v8430_v22  ;;  %6393 = vmatprep.mubr.msk.bf16.mxu0 %vm711_vm1, %v9978_v31  ;;  %v6230_v17 = vpop.f32.mrf.mxu1 }
 0x22f   : > { %v2755_v56 = vpop.f32.mrf.mxu0  ;;  %v8709_v32 = vadd.f32 %v6230_v17, %v8441_v15  ;;  %v9995_v15 = vld [vmem:[#allocation35_spill] sm:$0xff] }
 0x230   : > { %v8706_v58 = vadd.f32 %v2755_v56, %v8438_v35  ;;  %v3270_v42 = vpop.f32.mrf.mxu1 }
 0x231   : > { %v6152_v25 = vpop.f32.mrf.mxu0  ;;  %v8715_v22 = vadd.f32 %v3270_v42, %v8447_v40 }
 0x232   : > { %v8712_v39 = vadd.f32 %v6152_v25, %v8444_v41  ;;  %v6233_v63 = vpop.f32.mrf.mxu1  ;;  %6436 = vmatmul.mubr.msk.bf16.gmra.mxu1 %vm711_vm1, %v9994_v19 }
 0x233   : > { %v2758_v31 = vpop.f32.mrf.mxu0  ;;  %v8723_v35 = vadd.f32 %v6233_v63, %v8457_v13  ;;  %6439 = vmatprep.mubr.msk.bf16.mxu1 %vm711_vm1, %v9995_v15 }
 0x234   : > { %v8720_v54 = vadd.f32 %v2758_v31, %v8454_v12  ;;  %v3283_v41 = vpop.f32.mrf.mxu1 }
 0x235   : > { %v6191_v56 = vpop.f32.mrf.mxu0  ;;  %6394 = vmatmul.mubr.msk.bf16.vlgmr.msra.gmra.mxu0 %vm711_vm1, %v9983_v43  ;;  %v8735_v12 = vadd.f32 %v3283_v41, %v8469_v59  ;;  %v9996_v59 = vld [vmem:[#allocation18_spill] sm:$0xff] }
 0x236   : > { %v8730_v40 = vadd.f32 %v6191_v56, %v8464_v57  ;;  %6397 = vmatprep.mubr.msk.bf16.mxu0 %vm711_vm1, %v9987_v14  ;;  %v6234_v13 = vpop.f32.mrf.mxu1 }
 0x237   : > { %v3053_v17 = vpop.f32.mrf.mxu0  ;;  %v8741_v42 = vadd.f32 %v6234_v13, %v8475_v52  ;;  %v9999_v52 = vld [vmem:[#allocation27_spill] sm:$0xff]  ;;  %v10001_v13 = vld [vmem:[#allocation40_spill] sm:$0xff] }
 0x238   : > { %v8738_v25 = vadd.f32 %v3053_v17, %v8472_v38  ;;  %v3286_v43 = vpop.f32.mrf.mxu1 }
 0x239   : > { %v6192_v31 = vpop.f32.mrf.mxu0  ;;  %v8747_v57 = vadd.f32 %v3286_v43, %v8481_v62 }
 0x23a   : > { %v8744_v63 = vadd.f32 %v6192_v31, %v8478_v18  ;;  %v6237_v56 = vpop.f32.mrf.mxu1  ;;  %6440 = vmatmul.mubr.msk.bf16.gmra.mxu1 %vm711_vm1, %v9996_v59 }
 0x23b   : > { %v3056_v14 = vpop.f32.mrf.mxu0  ;;  %v8755_v38 = vadd.f32 %v6237_v56, %v8489_v44  ;;  %6443 = vmatprep.mubr.msk.bf16.mxu1 %vm711_vm1, %v9999_v52 }
 0x23c   : > { %v8752_v41 = vadd.f32 %v3056_v14, %v8486_v45  ;;  %v3299_v18 = vpop.f32.mrf.mxu1 }
 0x23d   : > { %9998 = vst [vmem:[#allocation12_spill] sm:$0xff] %v8755_v38  ;;  %v6195_v17 = vpop.f32.mrf.mxu0  ;;  %6398 = vmatmul.mubr.msk.bf16.gmra.mxu0 %vm711_vm1, %v9990_v7  ;;  %v8767_v45 = vadd.f32 %v3299_v18, %v10001_v13  ;;  %v10003_v38 = vld [vmem:[#allocation44_spill] sm:$0xff]  ;;  %v10006_v18 = vld [vmem:[#allocation30_spill] sm:$0xff]  ;;  %v10007_v13 = vld [vmem:[#allocation49_spill] sm:$0xff] }
 0x23e   : > { %9997 = vst [vmem:[#allocation23_spill] sm:$0xff] %v8752_v41  ;;  %v8762_v62 = vadd.f32 %v6195_v17, %v8496_v1  ;;  %6401 = vmatprep.mubr.msk.bf16.mxu0 %vm711_vm1, %v9993_v49  ;;  %v6238_v44 = vpop.f32.mrf.mxu1  ;;  %v10004_v1 = vld [vmem:[#allocation45_spill] sm:$0xff] }
 0x23f   : > { %10002 = vst [vmem:[#allocation26_spill] sm:$0xff] %v8767_v45  ;;  %v3069_v31 = vpop.f32.mrf.mxu0  ;;  %v8773_v14 = vadd.f32 %v6238_v44, %v8507_v28  ;;  %v10011_v28 = vld [vmem:[#allocation39_spill] sm:$0xff] }
 0x240   : > { %10000 = vst [vmem:[#allocation19_spill] sm:$0xff] %v8762_v62  ;;  %v8770_v43 = vadd.f32 %v3069_v31, %v8504_v4  ;;  %v3302_v7 = vpop.f32.mrf.mxu1  ;;  %v10009_v4 = vld [vmem:[#allocation6_spill] sm:$0xff] }
 0x241   : > { %v6196_v56 = vpop.f32.mrf.mxu0  ;;  %v8779_v17 = vadd.f32 %v3302_v7, %v10004_v1 }
 0x242   : > { %v8776_v41 = vadd.f32 %v6196_v56, %v10003_v38  ;;  %v6241_v62 = vpop.f32.mrf.mxu1  ;;  %6444 = vmatmul.mubr.msk.bf16.gmra.mxu1 %vm711_vm1, %v10006_v18  ;;  %v10012_v56 = vld [vmem:[#allocation48_spill] sm:$0xff] }
 0x243   : > { %10005 = vst [vmem:[#allocation62_spill] sm:$0xff] %v8779_v17  ;;  %v3072_v49 = vpop.f32.mrf.mxu0  ;;  %v8787_v31 = vadd.f32 %v6241_v62, %v10009_v4  ;;  %6447 = vmatprep.mubr.msk.bf16.mxu1 %vm711_vm1, %v10011_v28 }
 0x244   : > { %v8784_v45 = vadd.f32 %v3072_v49, %v10007_v13  ;;  %v3315_v38 = vpop.f32.mrf.mxu1 }
 0x245   : > { %10010 = vst [vmem:[#allocation29_spill] sm:$0xff] %v8787_v31  ;;  %v6199_v44 = vpop.f32.mrf.mxu0  ;;  %6402 = vmatmul.mubr.msk.bf16.gmra.mxu0 %vm711_vm1, %v9994_v19  ;;  %v8799_v1 = vadd.f32 %v3315_v38, %v8537_v20  ;;  %v10018_v20 = vld [vmem:[#allocation32_spill] sm:$0xff] }
 0x246   : > { %10008 = vst [vmem:[#allocation64_spill] sm:$0xff] %v8784_v45  ;;  %v8794_v7 = vadd.f32 %v6199_v44, %v10012_v56  ;;  %6405 = vmatprep.mubr.msk.bf16.mxu0 %vm711_vm1, %v9995_v15  ;;  %v6242_v62 = vpop.f32.mrf.mxu1  ;;  %v10014_v45 = vld [vmem:[#allocation14_spill] sm:$0xff]  ;;  %v10016_v44 = vld [vmem:[#allocation9_spill] sm:$0xff] }
 0x247   : > { %v3085_v49 = vpop.f32.mrf.mxu0  ;;  %v8805_v4 = vadd.f32 %v6242_v62, %v8543_v50  ;;  %v10022_v50 = vld [vmem:[#allocation33_spill] sm:$0xff] }
 0x248   : > { %10013 = vst [vmem:[#allocation65_spill] sm:$0xff] %v8794_v7  ;;  %v8802_v13 = vadd.f32 %v3085_v49, %v8540_v60  ;;  %v3318_v19 = vpop.f32.mrf.mxu1  ;;  %v10020_v60 = vld [vmem:[#allocation51_spill] sm:$0xff]  ;;  %v10023_v62 = vld [vmem:[#allocation17_spill] sm:$0xff] }
 0x249   : > { %v6200_v31 = vpop.f32.mrf.mxu0  ;;  %v8811_v56 = vadd.f32 %v3318_v19, %v10016_v44 }
 0x24a   : > { %v8808_v17 = vadd.f32 %v6200_v31, %v10014_v45  ;;  %v6245_v7 = vpop.f32.mrf.mxu1  ;;  %6448 = vmatmul.mubr.msk.bf16.gmra.mxu1 %vm711_vm1, %v10018_v20  ;;  %v4243_v45 = vrot.slane %v10023_v62, 5 }
 0x24b   : > { %10017 = vst [vmem:[#allocation34_spill] sm:$0xff] %v8811_v56  ;;  %v3088_v15 = vpop.f32.mrf.mxu0  ;;  %v8819_v49 = vadd.f32 %v6245_v7, %v10020_v60  ;;  %6451 = vmatprep.mubr.msk.bf16.mxu1 %vm711_vm1, %v10022_v50 }
 0x24c   : > { %10015 = vst [vmem:[#allocation7_spill] sm:$0xff] %v8808_v17  ;;  %v8816_v38 = vadd.f32 %v3088_v15, %v8557_v53  ;;  %v3331_v19 = vpop.f32.mrf.mxu1  ;;  %v10025_v53 = vld [vmem:[#allocation63_spill] sm:$0xff]  ;;  %v10028_v17 = vld [vmem:[#allocation5_spill] sm:$0xff] }
 0x24d   : > { %10021 = vst [vmem:[#allocation42_spill] sm:$0xff] %v8819_v49  ;;  %v6203_v31 = vpop.f32.mrf.mxu0  ;;  %6406 = vmatmul.mubr.msk.bf16.gmra.mxu0 %vm711_vm1, %v9996_v59  ;;  %v8832_v15 = vadd.f32 %v3331_v19, %v10025_v53  ;;  %v10027_v49 = vld [vmem:[#allocation72_spill] sm:$0xff]  ;;  %v4245_v59 = vrot.slane %v4243_v45, 4 }
 0x24e   : > { %10019 = vst [vmem:[#allocation38_spill] sm:$0xff] %v8816_v38  ;;  %v8827_v44 = vadd.f32 %v6203_v31, %v8568_v6  ;;  %6409 = vmatprep.mubr.msk.bf16.mxu0 %vm711_vm1, %v9999_v52  ;;  %v6246_v60 = vpop.f32.mrf.mxu1  ;;  %v5340_v38 = vrot.slane %v10027_v49, 9  ;;  %v4246_v6 = vrot.slane %v10028_v17, 5  ;;  %v10029_v49 = vld [vmem:[#allocation43_spill] sm:$0xff]  ;;  %v10030_v17 = vld [vmem:[#allocation61_spill] sm:$0xff] }
 0x24f   : > { %10026 = vst [vmem:[#allocation46_spill] sm:$0xff] %v8832_v15  ;;  %v3101_v7 = vpop.f32.mrf.mxu0  ;;  %v8839_v56 = vadd.f32 %v6246_v60, %v8579_v5 }
 0x250   : > { %10024 = vst [vmem:[#allocation66_spill] sm:$0xff] %v8827_v44  ;;  %v8836_v62 = vadd.f32 %v3101_v7, %v8576_v11  ;;  %v3334_v44 = vpop.f32.mrf.mxu1  ;;  %v10032_v7 = vld [vmem:[#allocation13_spill] sm:$0xff] }
 0x251   : > { %v6204_v31 = vpop.f32.mrf.mxu0  ;;  %v8846_v19 = vadd.f32 %v3334_v44, %v8585_v29  ;;  %v4247_v29 = vsel %vm7224_vm7, %v4245_v59, %v4246_v6 }
 0x252   : > { %v8843_v52 = vadd.f32 %v6204_v31, %v8582_v10  ;;  %v6249_v15 = vpop.f32.mrf.mxu1  ;;  %6452 = vmatmul.mubr.msk.bf16.gmra.mxu1 %vm711_vm1, %v10029_v49  ;;  %v4244_v10 = vsel %vm7224_vm7, %v5340_v38, %v4243_v45 }
 0x253   : > { %v3104_v53 = vpop.f32.mrf.mxu0  ;;  %v8854_v5 = vadd.f32 %v6249_v15, %v8593_v2  ;;  %6455 = vmatprep.mubr.msk.bf16.mxu1 %vm711_vm1, %v10030_v17  ;;  %v5342_v38 = vcombine.low %v4244_v10, %v4247_v29 }
 0x254   : > { %v8851_v11 = vadd.f32 %v3104_v53, %v8590_v51  ;;  %v3347_v60 = vpop.f32.mrf.mxu1 }
 0x255   : > { %v6207_v44 = vpop.f32.mrf.mxu0  ;;  %6410 = vmatmul.mubr.msk.bf16.gmra.mxu0 %vm711_vm1, %v10006_v18  ;;  %v8870_v2 = vadd.f32 %v3347_v60, %v8609_v21 }
 0x256   : > { %v8865_v51 = vadd.f32 %v6207_v44, %v8604_v26  ;;  %6413 = vmatprep.mubr.msk.bf16.mxu0 %vm711_vm1, %v10011_v28  ;;  %v6250_v31 = vpop.f32.mrf.mxu1 }
 0x257   : > { %v3117_v15 = vpop.f32.mrf.mxu0  ;;  %v8876_v59 = vadd.f32 %v6250_v31, %v8615_v46 }
 0x258   : > { %v8873_v45 = vadd.f32 %v3117_v15, %v8612_v24  ;;  %v3350_v6 = vpop.f32.mrf.mxu1  ;;  %v10033_v24 = vld [vmem:[#allocation21_spill] sm:$0xff] }
 0x259   : > { %v6208_v18 = vpop.f32.mrf.mxu0  ;;  %v8882_v53 = vadd.f32 %v3350_v6, %v8621_v33 }
 0x25a   : > { %v8879_v26 = vadd.f32 %v6208_v18, %v8618_v55  ;;  %v6253_v21 = vpop.f32.mrf.mxu1  ;;  %6456 = vmatmul.mubr.msk.bf16.gmra.mxu1 %vm711_vm1, %v5342_v38 }
 0x25b   : > { %v3120_v28 = vpop.f32.mrf.mxu0  ;;  %v8889_v29 = vadd.f32 %v6253_v21, %v10033_v24 }
 0x25c   : > { %v8886_v10 = vadd.f32 %v3120_v28, %v10032_v7  ;;  %v3363_v44 = vpop.f32.mrf.mxu1 }
 0x25d   : > { %v6211_v46 = vpop.f32.mrf.mxu0  ;;  %6414 = vmatmul.mubr.msk.bf16.gmra.mxu0 %vm711_vm1, %v10018_v20  ;;  %v8899_v33 = vadd.f32 %v3363_v44, %v8640_v9  ;;  %v10035_v9 = vld [vmem:[#allocation16_spill] sm:$0xff] }
 0x25e   : > { %v8894_v55 = vadd.f32 %v6211_v46, %v8635_v61  ;;  %6417 = vmatprep.mubr.msk.bf16.mxu0 %vm711_vm1, %v10022_v50  ;;  %v6254_v15 = vpop.f32.mrf.mxu1  ;;  %v10034_v61 = vld [vmem:[#allocation60_spill] sm:$0xff] }
 0x25f   : > { %v3133_v60 = vpop.f32.mrf.mxu0  ;;  %v8905_v18 = vadd.f32 %v6254_v15, %v8646_v36  ;;  %v10036_v46 = vld [vmem:[#allocation8_spill] sm:$0xff] }
 0x260   : > { %v8902_v31 = vadd.f32 %v3133_v60, %v8643_v37  ;;  %v3366_v20 = vpop.f32.mrf.mxu1 }
 0x261   : > { %v6212_v6 = vpop.f32.mrf.mxu0  ;;  %v8911_v21 = vadd.f32 %v3366_v20, %v10034_v61 }
 0x262   : > { %v8908_v28 = vadd.f32 %v6212_v6, %v8649_v34  ;;  %v6293_v7 = vpop.f32.mrf.mxu1 }
 0x263   : > { %v3136_v50 = vpop.f32.mrf.mxu0  ;;  %v8917_v44 = vadd.f32 %v6293_v7, %v10036_v46  ;;  %v10038_v46 = vld [vmem:[#allocation78_spill] sm:$0xff] }
 0x264   : > { %v8914_v24 = vadd.f32 %v3136_v50, %v10035_v9  ;;  %v3655_v36 = vpop.f32.mrf.mxu1 }
 0x265   : > { %v6215_v37 = vpop.f32.mrf.mxu0  ;;  %6418 = vmatmul.mubr.msk.bf16.gmra.mxu0 %vm711_vm1, %v10029_v49  ;;  %v8927_v34 = vadd.f32 %v3655_v36, %v8672_v30 }
 0x266   : > { %v8922_v60 = vadd.f32 %v6215_v37, %v8667_v3  ;;  %6421 = vmatprep.mubr.msk.bf16.mxu0 %vm711_vm1, %v10030_v17  ;;  %v6294_v6 = vpop.f32.mrf.mxu1 }
 0x267   : > { %v3149_v15 = vpop.f32.mrf.mxu0  ;;  %v8933_v61 = vadd.f32 %v6294_v6, %v8678_v48 }
 0x268   : > { %v8930_v20 = vadd.f32 %v3149_v15, %v8675_v23  ;;  %v3658_v49 = vpop.f32.mrf.mxu1 }
 0x269   : > { %v6216_v50 = vpop.f32.mrf.mxu0  ;;  %v8939_v3 = vadd.f32 %v3658_v49, %v8684_v27 }
 0x26a   : > { %v8936_v7 = vadd.f32 %v6216_v50, %v8681_v8  ;;  %v6297_v9 = vpop.f32.mrf.mxu1 }
 0x26b   : > { %10037 = vst [vmem:[#allocation50_spill] sm:$0xff] %v8939_v3  ;;  %v3152_v17 = vpop.f32.mrf.mxu0  ;;  %v8945_v37 = vadd.f32 %v6297_v9, %v10038_v46 }
 0x26c   : > { %v8942_v30 = vadd.f32 %v3152_v17, %v8689_v47  ;;  %v3671_v48 = vpop.f32.mrf.mxu1 }
 0x26d   : > { %v6219_v23 = vpop.f32.mrf.mxu0  ;;  %6422 = vmatmul.mubr.msk.bf16.gmra.mxu0 %vm711_vm1, %v5342_v38  ;;  %v8952_v8 = vadd.f32 %v3671_v48, %v8703_v16 }
 0x26e   : > { %v8949_v36 = vadd.f32 %v6219_v23, %v8698_v0  ;;  %v6298_v15 = vpop.f32.mrf.mxu1 }
 0x26f   : > { %v3165_v27 = vpop.f32.mrf.mxu0  ;;  %v8958_v47 = vadd.f32 %v6298_v15, %v8709_v32 }
 0x270   : > { %v8955_v6 = vadd.f32 %v3165_v27, %v8706_v58  ;;  %v3674_v49 = vpop.f32.mrf.mxu1 }
 0x271   : > { %10039 = vst [vmem:[#allocation52_spill] sm:$0xff] %v8958_v47  ;;  %v6220_v50 = vpop.f32.mrf.mxu0  ;;  %v8964_v38 = vadd.f32 %v3674_v49, %v8715_v22  ;;  %v10055_v47 = vld [vmem:[#allocation29_spill] sm:$0xff] }
 0x272   : > { %v8961_v17 = vadd.f32 %v6220_v50, %v8712_v39  ;;  %v6301_v9 = vpop.f32.mrf.mxu1 }
 0x273   : > { %10040 = vst [vmem:[#allocation53_spill] sm:$0xff] %v8964_v38  ;;  %v3168_v0 = vpop.f32.mrf.mxu0  ;;  %v8970_v46 = vadd.f32 %v6301_v9, %v8723_v35 }
 0x274   : > { %v8967_v16 = vadd.f32 %v3168_v0, %v8720_v54  ;;  %v3687_v23 = vpop.f32.mrf.mxu1 }
 0x275   : > { %v6259_v58 = vpop.f32.mrf.mxu0  ;;  %v8976_v48 = vadd.f32 %v3687_v23, %v8735_v12  ;;  %v10044_v12 = vld [vmem:[#allocation23_spill] sm:$0xff] }
 0x276   : > { %v8973_v32 = vadd.f32 %v6259_v58, %v8730_v40  ;;  %v6302_v27 = vpop.f32.mrf.mxu1  ;;  %v10046_v58 = vld [vmem:[#allocation12_spill] sm:$0xff] }
 0x277   : > { %v3457_v39 = vpop.f32.mrf.mxu0  ;;  %v8982_v15 = vadd.f32 %v6302_v27, %v8741_v42  ;;  %v10047_v42 = vld [vmem:[#allocation19_spill] sm:$0xff] }
 0x278   : > { %v8979_v22 = vadd.f32 %v3457_v39, %v8738_v25  ;;  %v3690_v50 = vpop.f32.mrf.mxu1 }
 0x279   : > { %10041 = vst [vmem:[#allocation67_spill] sm:$0xff] %v8982_v15  ;;  %v6260_v54 = vpop.f32.mrf.mxu0  ;;  %v8988_v49 = vadd.f32 %v3690_v50, %v8747_v57  ;;  %v10048_v15 = vld [vmem:[#allocation26_spill] sm:$0xff] }
 0x27a   : > { %v8985_v35 = vadd.f32 %v6260_v54, %v8744_v63  ;;  %v6305_v0 = vpop.f32.mrf.mxu1 }
 0x27b   : > { %10043 = vst [vmem:[#allocation54_spill] sm:$0xff] %v8988_v49  ;;  %v3460_v40 = vpop.f32.mrf.mxu0  ;;  %v8994_v23 = vadd.f32 %v6305_v0, %v10046_v58  ;;  %v10051_v58 = vld [vmem:[#allocation62_spill] sm:$0xff] }
 0x27c   : > { %10042 = vst [vmem:[#allocation68_spill] sm:$0xff] %v8985_v35  ;;  %v8991_v9 = vadd.f32 %v3460_v40, %v10044_v12  ;;  %v3703_v39 = vpop.f32.mrf.mxu1 }
 0x27d   : > { %v6263_v25 = vpop.f32.mrf.mxu0  ;;  %v9000_v38 = vadd.f32 %v3703_v39, %v10048_v15  ;;  %v10053_v15 = vld [vmem:[#allocation64_spill] sm:$0xff] }
 0x27e   : > { %10045 = vst [vmem:[#allocation11_spill] sm:$0xff] %v8991_v9  ;;  %v8997_v27 = vadd.f32 %v6263_v25, %v10047_v42  ;;  %v6306_v54 = vpop.f32.mrf.mxu1 }
 0x27f   : > { %v3473_v63 = vpop.f32.mrf.mxu0  ;;  %v9006_v50 = vadd.f32 %v6306_v54, %v8773_v14  ;;  %v10056_v14 = vld [vmem:[#allocation65_spill] sm:$0xff] }
 0x280   : > { %v9003_v57 = vadd.f32 %v3473_v63, %v8770_v43  ;;  %v3706_v12 = vpop.f32.mrf.mxu1 }
 0x281   : > { %10049 = vst [vmem:[#allocation69_spill] sm:$0xff] %v9006_v50  ;;  %v6264_v40 = vpop.f32.mrf.mxu0  ;;  %v9012_v49 = vadd.f32 %v3706_v12, %v10051_v58 }
 0x282   : > { %v9009_v0 = vadd.f32 %v6264_v40, %v8776_v41  ;;  %v6309_v42 = vpop.f32.mrf.mxu1 }
 0x283   : > { %10052 = vst [vmem:[#allocation15_spill] sm:$0xff] %v9012_v49  ;;  %v3476_v25 = vpop.f32.mrf.mxu0  ;;  %v9018_v9 = vadd.f32 %v6309_v42, %v10055_v47  ;;  %v10058_v47 = vld [vmem:[#allocation7_spill] sm:$0xff]  ;;  %v10059_v49 = vld [vmem:[#allocation34_spill] sm:$0xff] }
 0x284   : > { %10050 = vst [vmem:[#allocation56_spill] sm:$0xff] %v9009_v0  ;;  %v9015_v39 = vadd.f32 %v3476_v25, %v10053_v15  ;;  %v3719_v63 = vpop.f32.mrf.mxu1  ;;  %v10062_v0 = vld [vmem:[#allocation42_spill] sm:$0xff] }
 0x285   : > { %v6267_v43 = vpop.f32.mrf.mxu0  ;;  %v9024_v50 = vadd.f32 %v3719_v63, %v8799_v1  ;;  %v10061_v1 = vld [vmem:[#allocation38_spill] sm:$0xff] }
 0x286   : > { %10054 = vst [vmem:[#allocation70_spill] sm:$0xff] %v9015_v39  ;;  %v9021_v54 = vadd.f32 %v6267_v43, %v10056_v14  ;;  %v6310_v40 = vpop.f32.mrf.mxu1 }
 0x287   : > { %v3489_v41 = vpop.f32.mrf.mxu0  ;;  %v9030_v58 = vadd.f32 %v6310_v40, %v8805_v4  ;;  %v10063_v4 = vld [vmem:[#allocation66_spill] sm:$0xff] }
 0x288   : > { %v9027_v12 = vadd.f32 %v3489_v41, %v8802_v13  ;;  %v3722_v15 = vpop.f32.mrf.mxu1 }
 0x289   : > { %10057 = vst [vmem:[#allocation57_spill] sm:$0xff] %v9030_v58  ;;  %v6268_v25 = vpop.f32.mrf.mxu0  ;;  %v9036_v39 = vadd.f32 %v3722_v15, %v10059_v49  ;;  %v10064_v58 = vld [vmem:[#allocation46_spill] sm:$0xff] }
 0x28a   : > { %v9033_v42 = vadd.f32 %v6268_v25, %v10058_v47  ;;  %v6313_v14 = vpop.f32.mrf.mxu1 }
 0x28b   : > { %10060 = vst [vmem:[#allocation71_spill] sm:$0xff] %v9036_v39  ;;  %v3492_v43 = vpop.f32.mrf.mxu0  ;;  %v9042_v3 = vadd.f32 %v6313_v14, %v10062_v0 }
 0x28c   : > { %v9039_v63 = vadd.f32 %v3492_v43, %v10061_v1  ;;  %v3735_v41 = vpop.f32.mrf.mxu1 }
 0x28d   : > { %v6271_v13 = vpop.f32.mrf.mxu0  ;;  %v9048_v35 = vadd.f32 %v3735_v41, %v10064_v58 }
 0x28e   : > { %v9045_v40 = vadd.f32 %v6271_v13, %v10063_v4  ;;  %v6314_v47 = vpop.f32.mrf.mxu1 }
 0x28f   : > { %v3505_v25 = vpop.f32.mrf.mxu0  ;;  %v9054_v15 = vadd.f32 %v6314_v47, %v8839_v56 }
 0x290   : > { %v9051_v49 = vadd.f32 %v3505_v25, %v8836_v62  ;;  %v3738_v1 = vpop.f32.mrf.mxu1 }
 0x291   : > { %10065 = vst [vmem:[#allocation79_spill] sm:$0xff] %v9054_v15  ;;  %v6272_v43 = vpop.f32.mrf.mxu0  ;;  %v9060_v14 = vadd.f32 %v3738_v1, %v8846_v19 }
 0x292   : > { %v9057_v0 = vadd.f32 %v6272_v43, %v8843_v52  ;;  %v6317_v4 = vpop.f32.mrf.mxu1 }
 0x293   : > { %10066 = vst [vmem:[#allocation10_spill] sm:$0xff] %v9060_v14  ;;  %v3508_v13 = vpop.f32.mrf.mxu0  ;;  %v9066_v41 = vadd.f32 %v6317_v4, %v8854_v5 }
 0x294   : > { %v9063_v58 = vadd.f32 %v3508_v13, %v8851_v11  ;;  %v3751_v25 = vpop.f32.mrf.mxu1 }
 0x295   : > { %v6275_v62 = vpop.f32.mrf.mxu0  ;;  %v9072_v47 = vadd.f32 %v3751_v25, %v8870_v2 }
 0x296   : > { %v9069_v56 = vadd.f32 %v6275_v62, %v8865_v51  ;;  %v6318_v43 = vpop.f32.mrf.mxu1 }
 0x297   : > { %v3521_v52 = vpop.f32.mrf.mxu0  ;;  %v9078_v1 = vadd.f32 %v6318_v43, %v8876_v59 }
 0x298   : > { %v9075_v19 = vadd.f32 %v3521_v52, %v8873_v45  ;;  %v3754_v13 = vpop.f32.mrf.mxu1 }
 0x299   : > { %10067 = vst [vmem:[#allocation73_spill] sm:$0xff] %v9078_v1  ;;  %v6276_v11 = vpop.f32.mrf.mxu0  ;;  %v9084_v4 = vadd.f32 %v3754_v13, %v8882_v53 }
 0x29a   : > { %v9081_v5 = vadd.f32 %v6276_v11, %v8879_v26  ;;  %v6321_v62 = vpop.f32.mrf.mxu1 }
 0x29b   : > { %10069 = vst [vmem:[#allocation74_spill] sm:$0xff] %v9084_v4  ;;  %v3524_v51 = vpop.f32.mrf.mxu0  ;;  %v9090_v25 = vadd.f32 %v6321_v62, %v8889_v29 }
 0x29c   : > { %10068 = vst [vmem:[#allocation20_spill] sm:$0xff] %v9081_v5  ;;  %v9087_v2 = vadd.f32 %v3524_v51, %v8886_v10  ;;  %v3767_v52 = vpop.f32.mrf.mxu1 }
 0x29d   : > { %v6279_v45 = vpop.f32.mrf.mxu0  ;;  %v9096_v43 = vadd.f32 %v3767_v52, %v8899_v33 }
 0x29e   : > { %10070 = vst [vmem:[#allocation75_spill] sm:$0xff] %v9087_v2  ;;  %v9093_v59 = vadd.f32 %v6279_v45, %v8894_v55  ;;  %v6322_v11 = vpop.f32.mrf.mxu1 }
 0x29f   : > { %v3537_v26 = vpop.f32.mrf.mxu0  ;;  %v9102_v13 = vadd.f32 %v6322_v11, %v8905_v18 }
 0x2a0   : > { %v9099_v53 = vadd.f32 %v3537_v26, %v8902_v31  ;;  %v3770_v51 = vpop.f32.mrf.mxu1 }
 0x2a1   : > { %10071 = vst [vmem:[#allocation37_spill] sm:$0xff] %v9102_v13  ;;  %v6280_v10 = vpop.f32.mrf.mxu0  ;;  %v9108_v62 = vadd.f32 %v3770_v51, %v8911_v21 }
 0x2a2   : > { %v9105_v29 = vadd.f32 %v6280_v10, %v8908_v28  ;;  %v6361_v45 = vpop.f32.mrf.mxu1 }
 0x2a3   : > { %10073 = vst [vmem:[#allocation22_spill] sm:$0xff] %v9108_v62  ;;  %v3540_v55 = vpop.f32.mrf.mxu0  ;;  %v9114_v52 = vadd.f32 %v6361_v45, %v8917_v44 }
 0x2a4   : > { %10072 = vst [vmem:[#allocation76_spill] sm:$0xff] %v9105_v29  ;;  %v9111_v33 = vadd.f32 %v3540_v55, %v8914_v24  ;;  %v4081_v26 = vpop.f32.mrf.mxu1 }
 0x2a5   : > { %v6283_v31 = vpop.f32.mrf.mxu0  ;;  %v9120_v11 = vadd.f32 %v4081_v26, %v8927_v34 }
 0x2a6   : > { %10074 = vst [vmem:[#allocation77_spill] sm:$0xff] %v9111_v33  ;;  %v9117_v18 = vadd.f32 %v6283_v31, %v8922_v60  ;;  %v9122_v10 = vpop.f32.mrf.mxu1 }
 0x2a7   : > { %v3553_v28 = vpop.f32.mrf.mxu0 }
 0x2a8   : > { %v9125_v21 = vadd.f32 %v3553_v28, %v8930_v20  ;;  %v9127_v24 = vpop.f32.mrf.mxu1 }
 0x2a9   : > { %v6284_v51 = vpop.f32.mrf.mxu0 }
 0x2aa   : > { %v9130_v44 = vadd.f32 %v6284_v51, %v8936_v7  ;;  %v6365_v45 = vpop.f32.mrf.mxu1 }
 0x2ab   : > { %v3556_v55 = vpop.f32.mrf.mxu0  ;;  %v9136_v34 = vadd.f32 %v6365_v45, %v8945_v37 }
 0x2ac   : > { %10075 = vst [vmem:[#allocation47_spill] sm:$0xff] %v9130_v44  ;;  %v9133_v60 = vadd.f32 %v3556_v55, %v8942_v30  ;;  %v4097_v26 = vpop.f32.mrf.mxu1 }
 0x2ad   : > { %v6287_v31 = vpop.f32.mrf.mxu0  ;;  %v9142_v20 = vadd.f32 %v4097_v26, %v8952_v8 }
 0x2ae   : > { %10076 = vst [vmem:[#allocation24_spill] sm:$0xff] %v9133_v60  ;;  %v9139_v62 = vadd.f32 %v6287_v31, %v8949_v36  ;;  %v9144_v13 = vpop.f32.mrf.mxu1 }
 0x2af   : > { %v3569_v28 = vpop.f32.mrf.mxu0 }
 0x2b0   : > { %v9147_v7 = vadd.f32 %v3569_v28, %v8955_v6  ;;  %v9149_v30 = vpop.f32.mrf.mxu1 }
 0x2b1   : > { %v6288_v51 = vpop.f32.mrf.mxu0 }
 0x2b2   : > { %v9152_v37 = vadd.f32 %v6288_v51, %v8961_v17  ;;  %v6369_v45 = vpop.f32.mrf.mxu1 }
 0x2b3   : > { %v3572_v55 = vpop.f32.mrf.mxu0  ;;  %v9158_v8 = vadd.f32 %v6369_v45, %v8970_v46 }
 0x2b4   : > { %10077 = vst [vmem:[#allocation41_spill] sm:$0xff] %v9152_v37  ;;  %v9155_v36 = vadd.f32 %v3572_v55, %v8967_v16  ;;  %v4113_v26 = vpop.f32.mrf.mxu1 }
 0x2b5   : > { %v6327_v31 = vpop.f32.mrf.mxu0  ;;  %v9164_v6 = vadd.f32 %v4113_v26, %v8976_v48 }
 0x2b6   : > { %10078 = vst [vmem:[#allocation28_spill] sm:$0xff] %v9155_v36  ;;  %v9161_v60 = vadd.f32 %v6327_v31, %v8973_v32  ;;  %v9166_v4 = vpop.f32.mrf.mxu1 }
 0x2b7   : > { %v3883_v28 = vpop.f32.mrf.mxu0 }
 0x2b8   : > { %v9169_v17 = vadd.f32 %v3883_v28, %v8979_v22  ;;  %v9173_v16 = vpop.f32.mrf.mxu1 }
 0x2b9   : > { %v9171_v51 = vpop.f32.mrf.mxu0 }
 0x2ba   : > { %v6373_v55 = vpop.f32.mrf.mxu1 }
 0x2bb   : > { %v9175_v46 = vpop.f32.mrf.mxu0  ;;  %v9178_v45 = vadd.f32 %v6373_v55, %v8994_v23 }
 0x2bc   : > { %v4129_v31 = vpop.f32.mrf.mxu1 }
 0x2bd   : > { %v6331_v32 = vpop.f32.mrf.mxu0  ;;  %v9184_v26 = vadd.f32 %v4129_v31, %v9000_v38 }
 0x2be   : > { %v9181_v48 = vadd.f32 %v6331_v32, %v8997_v27  ;;  %v9186_v28 = vpop.f32.mrf.mxu1 }
 0x2bf   : > { %v3899_v22 = vpop.f32.mrf.mxu0 }
 0x2c0   : > { %v9189_v36 = vadd.f32 %v3899_v22, %v9003_v57  ;;  %v9193_v44 = vpop.f32.mrf.mxu1 }
 0x2c1   : > { %v9191_v37 = vpop.f32.mrf.mxu0 }
 0x2c2   : > { %v6377_v55 = vpop.f32.mrf.mxu1 }
 0x2c3   : > { %v9195_v23 = vpop.f32.mrf.mxu0  ;;  %v9198_v1 = vadd.f32 %v6377_v55, %v9018_v9 }
 0x2c4   : > { %v4145_v32 = vpop.f32.mrf.mxu1 }
 0x2c5   : > { %v6335_v27 = vpop.f32.mrf.mxu0  ;;  %v9204_v31 = vadd.f32 %v4145_v32, %v9024_v50 }
 0x2c6   : > { %v9201_v38 = vadd.f32 %v6335_v27, %v9021_v54  ;;  %v9206_v22 = vpop.f32.mrf.mxu1 }
 0x2c7   : > { %10079 = vst [vmem:[#allocation31_spill] sm:$0xff] %v9204_v31  ;;  %v3915_v57 = vpop.f32.mrf.mxu0  ;;  %10080 = vst [vmem:[#allocation58_spill] sm:$0xff] %v9206_v22  ;;  %v10110_v31 = vld [vmem:[#allocation50_spill] sm:$0xff] }
 0x2c8   : > { %v9209_v33 = vadd.f32 %v3915_v57, %v9027_v12  ;;  %v9213_v29 = vpop.f32.mrf.mxu1 }
 0x2c9   : > { %v9211_v14 = vpop.f32.mrf.mxu0  ;;  %10081 = vst [vmem:[#allocation36_spill] sm:$0xff] %v9213_v29 }
 0x2ca   : > { %v6381_v55 = vpop.f32.mrf.mxu1 }
 0x2cb   : > { %v9215_v9 = vpop.f32.mrf.mxu0  ;;  %v9218_v15 = vadd.f32 %v6381_v55, %v9042_v3 }
 0x2cc   : > { %v4161_v27 = vpop.f32.mrf.mxu1 }
 0x2cd   : > { %10082 = vst [vmem:[#allocation59_spill] sm:$0xff] %v9218_v15  ;;  %v6339_v54 = vpop.f32.mrf.mxu0  ;;  %v9224_v32 = vadd.f32 %v4161_v27, %v9048_v35 }
 0x2ce   : > { %v9221_v50 = vadd.f32 %v6339_v54, %v9045_v40  ;;  %v9226_v57 = vpop.f32.mrf.mxu1 }
 0x2cf   : > { %10083 = vst [vmem:[#allocation25_spill] sm:$0xff] %v9224_v32  ;;  %v3931_v12 = vpop.f32.mrf.mxu0  ;;  %10084 = vst [vmem:[#allocation35_spill] sm:$0xff] %v9226_v57 }
 0x2d0   : > { %v9229_v2 = vadd.f32 %v3931_v12, %v9051_v49  ;;  %v9233_v39 = vpop.f32.mrf.mxu1 }
 0x2d1   : > { %v9231_v29 = vpop.f32.mrf.mxu0  ;;  %10085 = vst [vmem:[#allocation18_spill] sm:$0xff] %v9233_v39 }
 0x2d2   : > { %v6385_v55 = vpop.f32.mrf.mxu1 }
 0x2d3   : > { %v9235_v3 = vpop.f32.mrf.mxu0  ;;  %v9238_v15 = vadd.f32 %v6385_v55, %v9066_v41 }
 0x2d4   : > { %v4177_v54 = vpop.f32.mrf.mxu1 }
 0x2d5   : > { %10086 = vst [vmem:[#allocation27_spill] sm:$0xff] %v9238_v15  ;;  %v6343_v40 = vpop.f32.mrf.mxu0  ;;  %v9244_v27 = vadd.f32 %v4177_v54, %v9072_v47 }
 0x2d6   : > { %v9241_v35 = vadd.f32 %v6343_v40, %v9069_v56  ;;  %v9246_v12 = vpop.f32.mrf.mxu1 }
 0x2d7   : > { %10087 = vst [vmem:[#allocation40_spill] sm:$0xff] %v9244_v27  ;;  %v3947_v49 = vpop.f32.mrf.mxu0  ;;  %10088 = vst [vmem:[#allocation44_spill] sm:$0xff] %v9246_v12 }
 0x2d8   : > { %v9249_v32 = vadd.f32 %v3947_v49, %v9075_v19  ;;  %v9253_v57 = vpop.f32.mrf.mxu1 }
 0x2d9   : > { %v9251_v39 = vpop.f32.mrf.mxu0  ;;  %10091 = vst [vmem:[#allocation49_spill] sm:$0xff] %v9253_v57 }
 0x2da   : > { %10089 = vst [vmem:[#allocation45_spill] sm:$0xff] %v9249_v32  ;;  %10090 = vst [vmem:[#allocation30_spill] sm:$0xff] %v9251_v39  ;;  %v6389_v55 = vpop.f32.mrf.mxu1 }
 0x2db   : > { %v9255_v41 = vpop.f32.mrf.mxu0  ;;  %v9258_v15 = vadd.f32 %v6389_v55, %v9090_v25 }
 0x2dc   : > { %10092 = vst [vmem:[#allocation6_spill] sm:$0xff] %v9255_v41  ;;  %v4193_v40 = vpop.f32.mrf.mxu1 }
 0x2dd   : > { %10093 = vst [vmem:[#allocation39_spill] sm:$0xff] %v9258_v15  ;;  %v6347_v56 = vpop.f32.mrf.mxu0  ;;  %v9264_v54 = vadd.f32 %v4193_v40, %v9096_v43 }
 0x2de   : > { %v9261_v47 = vadd.f32 %v6347_v56, %v9093_v59  ;;  %v9266_v49 = vpop.f32.mrf.mxu1 }
 0x2df   : > { %10095 = vst [vmem:[#allocation14_spill] sm:$0xff] %v9264_v54  ;;  %v3963_v19 = vpop.f32.mrf.mxu0  ;;  %10096 = vst [vmem:[#allocation9_spill] sm:$0xff] %v9266_v49 }
 0x2e0   : > { %10094 = vst [vmem:[#allocation48_spill] sm:$0xff] %v9261_v47  ;;  %v9269_v27 = vadd.f32 %v3963_v19, %v9099_v53  ;;  %v9273_v12 = vpop.f32.mrf.mxu1 }
 0x2e1   : > { %v9271_v57 = vpop.f32.mrf.mxu0  ;;  %10099 = vst [vmem:[#allocation33_spill] sm:$0xff] %v9273_v12 }
 0x2e2   : > { %10097 = vst [vmem:[#allocation32_spill] sm:$0xff] %v9269_v27  ;;  %10098 = vst [vmem:[#allocation51_spill] sm:$0xff] %v9271_v57  ;;  %v6429_v55 = vpop.f32.mrf.mxu1 }
 0x2e3   : > { %v9275_v25 = vpop.f32.mrf.mxu0 }
 0x2e4   : > { %10100 = vst [vmem:[#allocation17_spill] sm:$0xff] %v9275_v25  ;;  %v4491_v41 = vpop.f32.mrf.mxu1 }
 0x2e5   : > { %v6351_v15 = vpop.f32.mrf.mxu0 }
 0x2e6   : > { %v9278_v59 = vadd.f32 %v6351_v15, %v9117_v18  ;;  %v6430_v56 = vpop.f32.mrf.mxu1 }
 0x2e7   : > { %v3979_v43 = vpop.f32.mrf.mxu0 }
 0x2e8   : > { %10101 = vst [vmem:[#allocation63_spill] sm:$0xff] %v9278_v59  ;;  %v9281_v40 = vadd.f32 %v3979_v43, %v9125_v21  ;;  %v4494_v53 = vpop.f32.mrf.mxu1  ;;  %v4620_v59 = vadd.f32 %v6429_v55, %v9114_v52  ;;  %v4209_v52 = vadd.f32 %v9127_v24, %v10110_v31  ;;  %v10111_v55 = vld [vmem:[#allocation11_spill] sm:$0xff] }
 0x2e9   : > { %v9283_v54 = vpop.f32.mrf.mxu0 }
 0x2ea   : > { %10102 = vst [vmem:[#allocation72_spill] sm:$0xff] %v9281_v40  ;;  %10103 = vst [vmem:[#allocation5_spill] sm:$0xff] %v9283_v54  ;;  %v6433_v49 = vpop.f32.mrf.mxu1 }
 0x2eb   : > { %v9285_v19 = vpop.f32.mrf.mxu0 }
 0x2ec   : > { %10104 = vst [vmem:[#allocation43_spill] sm:$0xff] %v9285_v19  ;;  %v4507_v27 = vpop.f32.mrf.mxu1 }
 0x2ed   : > { %v6355_v12 = vpop.f32.mrf.mxu0 }
 0x2ee   : > { %v9288_v25 = vadd.f32 %v6355_v12, %v9139_v62  ;;  %v6434_v47 = vpop.f32.mrf.mxu1  ;;  %v4211_v12 = vadd.f32 %v9122_v10, %v8933_v61 }
 0x2ef   : > { %v3995_v57 = vpop.f32.mrf.mxu0 }
 0x2f0   : > { %10105 = vst [vmem:[#allocation61_spill] sm:$0xff] %v9288_v25  ;;  %v9291_v15 = vadd.f32 %v3995_v57, %v9147_v7  ;;  %v4510_v21 = vpop.f32.mrf.mxu1 }
 0x2f1   : > { %v9293_v18 = vpop.f32.mrf.mxu0 }
 0x2f2   : > { %10106 = vst [vmem:[#allocation55_spill] sm:$0xff] %v9291_v15  ;;  %10107 = vst [vmem:[#allocation13_spill] sm:$0xff] %v9293_v18  ;;  %v9297_v40 = vpop.f32.mrf.mxu1  ;;  %v10109_v15 = vld [vmem:[#allocation68_spill] sm:$0xff] }
 0x2f3   : > { %v9295_v43 = vpop.f32.mrf.mxu0  ;;  %v4013_v18 = vadd.f32 %v9171_v51, %v10109_v15 }
 0x2f4   : > { %10108 = vst [vmem:[#allocation21_spill] sm:$0xff] %v9295_v43  ;;  %v9299_v54 = vpop.f32.mrf.mxu1  ;;  %v4618_v43 = vadd.f32 %v4491_v41, %v9120_v11  ;;  %v4619_v41 = vadd.f32 %v4494_v53, %v4209_v52 }
 0x2f5   : > { %v6395_v19 = vpop.f32.mrf.mxu0 }
 0x2f6   : > { %v4422_v62 = vadd.f32 %v6395_v19, %v9161_v60  ;;  %v9305_v57 = vpop.f32.mrf.mxu1  ;;  %v4011_v60 = vadd.f32 %v9175_v46, %v10111_v55  ;;  %v4621_v19 = vadd.f32 %v6430_v56, %v4211_v12  ;;  %v4624_v46 = vadd.f32 %v6433_v49, %v9136_v34  ;;  %v10112_v56 = vld [vmem:[#allocation52_spill] sm:$0xff]  ;;  %v10114_v49 = vld [vmem:[#allocation53_spill] sm:$0xff] }
 0x2f7   : > { %v4293_v7 = vpop.f32.mrf.mxu0 }
 0x2f8   : > { %v4652_v25 = vmul.f32 %v4620_v59, %v4422_v62  ;;  %v4420_v32 = vadd.f32 %v4293_v7, %v9169_v17  ;;  %v9316_v10 = vpop.f32.mrf.mxu1 }
 0x2f9   : > { %v6396_v61 = vpop.f32.mrf.mxu0 }
 0x2fa   : > { %v4684_v39 = vadd.f32 %v4652_v25, %v4422_v62  ;;  %v4650_v5 = vmul.f32 %v4618_v43, %v4420_v32  ;;  %v4423_v51 = vadd.f32 %v6396_v61, %v4013_v18  ;;  %v9318_v11 = vpop.f32.mrf.mxu1  ;;  %v4215_v18 = vadd.f32 %v9144_v13, %v10112_v56  ;;  %v10113_v43 = vld [vmem:[#allocation56_spill] sm:$0xff] }
 0x2fb   : > { %v4296_v15 = vpop.f32.mrf.mxu0  ;;  %v4017_v53 = vadd.f32 %v9191_v37, %v10113_v43  ;;  %v4213_v61 = vadd.f32 %v9149_v30, %v10114_v49 }
 0x2fc   : > { %v4682_v59 = vadd.f32 %v4650_v5, %v4420_v32  ;;  %v4653_v17 = vmul.f32 %v4621_v19, %v4423_v51  ;;  %v4421_v24 = vadd.f32 %v4296_v15, %v4011_v60  ;;  %v9322_v7 = vpop.f32.mrf.mxu1  ;;  %v4622_v5 = vadd.f32 %v4507_v27, %v9142_v20 }
 0x2fd   : > { %v6399_v31 = vpop.f32.mrf.mxu0  ;;  %v4625_v13 = vadd.f32 %v6434_v47, %v4215_v18  ;;  %v4623_v30 = vadd.f32 %v4510_v21, %v4213_v61  ;;  %v4021_v21 = vadd.f32 %v9211_v14, %v9033_v42  ;;  %v4626_v18 = vadd.f32 %v9299_v54, %v9164_v6 }
 0x2fe   : > { %v4685_v55 = vadd.f32 %v4653_v17, %v4423_v51  ;;  %v4651_v22 = vmul.f32 %v4619_v41, %v4421_v24  ;;  %v4426_v25 = vadd.f32 %v6399_v31, %v9181_v48  ;;  %v9331_v62 = vpop.f32.mrf.mxu1  ;;  %v10115_v48 = vld [vmem:[#allocation70_spill] sm:$0xff]  ;;  %v4628_v31 = vadd.f32 %v9297_v40, %v9158_v8 }
 0x2ff   : > { %v4309_v32 = vpop.f32.mrf.mxu0  ;;  %v4015_v19 = vadd.f32 %v9195_v23, %v10115_v48 }
 0x300   : > { %v5454_v12 = vpack.c.bf16 %v4685_v55, %v4684_v39  ;;  %v4683_v52 = vadd.f32 %v4651_v22, %v4421_v24  ;;  %v4656_v60 = vmul.f32 %v4624_v46, %v4426_v25  ;;  %v4424_v34 = vadd.f32 %v4309_v32, %v9189_v36  ;;  %v9338_v15 = vpop.f32.mrf.mxu1 }
 0x301   : > { %v6400_v51 = vpop.f32.mrf.mxu0 }
 0x302   : > { %5526 = vst [vmem:[%s9340_s8 + $0x8] sm:$0xff] %v5454_v12   ;;  %v5449_v39 = vpack.c.bf16 %v4683_v52, %v4682_v59  ;;  %v4688_v20 = vadd.f32 %v4656_v60, %v4426_v25  ;;  %v4654_v37 = vmul.f32 %v4622_v5, %v4424_v34  ;;  %v4427_v22 = vadd.f32 %v6400_v51, %v4017_v53  ;;  %v9343_v27 = vpop.f32.mrf.mxu1  ;;  %v10116_v25 = vld [vmem:[#allocation67_spill] sm:$0xff]  ;;  %v10117_v12 = vld [vmem:[#allocation54_spill] sm:$0xff] }
 0x303   : > { %v4312_v36 = vpop.f32.mrf.mxu0  ;;  %v4219_v56 = vadd.f32 %v9166_v4, %v10116_v25  ;;  %v4019_v4 = vadd.f32 %v9215_v9, %v9039_v63 }
 0x304   : > { %5450 = vst [vmem:[%s9340_s8] sm:$0xff] %v5449_v39   ;;  %v4686_v41 = vadd.f32 %v4654_v37, %v4424_v34  ;;  %v4657_v23 = vmul.f32 %v4625_v13, %v4427_v22  ;;  %v4425_v47 = vadd.f32 %v4312_v36, %v4015_v19  ;;  %v9346_v24 = vpop.f32.mrf.mxu1 }
 0x305   : > { %v6403_v17 = vpop.f32.mrf.mxu0  ;;  %v4629_v42 = vadd.f32 %v9305_v57, %v4219_v56  ;;  %v4632_v57 = vadd.f32 %v9318_v11, %v9178_v45 }
 0x306   : > { %v4689_v46 = vadd.f32 %v4657_v23, %v4427_v22  ;;  %v4655_v55 = vmul.f32 %v4623_v30, %v4425_v47  ;;  %v4430_v59 = vadd.f32 %v6403_v17, %v9201_v38  ;;  %v9357_v53 = vpop.f32.mrf.mxu1  ;;  %v4217_v38 = vadd.f32 %v9173_v16, %v10117_v12  ;;  %v10124_v12 = vld [vmem:[#allocation31_spill] sm:$0xff] }
 0x307   : > { %v4325_v43 = vpop.f32.mrf.mxu0  ;;  %v4630_v22 = vadd.f32 %v9322_v7, %v9184_v26 }
 0x308   : > { %v5464_v5 = vpack.c.bf16 %v4689_v46, %v4688_v20  ;;  %v4687_v32 = vadd.f32 %v4655_v55, %v4425_v47  ;;  %v4660_v8 = vmul.f32 %v4628_v31, %v4430_v59  ;;  %v4428_v40 = vadd.f32 %v4325_v43, %v9209_v33  ;;  %v9365_v52 = vpop.f32.mrf.mxu1  ;;  %v10118_v20 = vld [vmem:[#allocation69_spill] sm:$0xff]  ;;  %v10119_v47 = vld [vmem:[#allocation15_spill] sm:$0xff] }
 0x309   : > { %v6404_v14 = vpop.f32.mrf.mxu0  ;;  %v4627_v33 = vadd.f32 %v9316_v10, %v4217_v38  ;;  %v4223_v37 = vadd.f32 %v9186_v28, %v10118_v20  ;;  %v4025_v10 = vadd.f32 %v9231_v29, %v9057_v0  ;;  %v4023_v28 = vadd.f32 %v9235_v3, %v9063_v58  ;;  %v10120_v43 = vld [vmem:[#allocation57_spill] sm:$0xff] }
 0x30a   : > { %5528 = vst [vmem:[%s9340_s8 + $0x18] sm:$0xff] %v5464_v5   ;;  %v5459_v6 = vpack.c.bf16 %v4687_v32, %v4686_v41  ;;  %v4692_v54 = vadd.f32 %v4660_v8, %v4430_v59  ;;  %v4658_v60 = vmul.f32 %v4626_v18, %v4428_v40  ;;  %v4431_v34 = vadd.f32 %v6404_v14, %v4021_v21  ;;  %v9368_v61 = vpop.f32.mrf.mxu1  ;;  %v10121_v5 = vld [vmem:[#allocation58_spill] sm:$0xff]  ;;  %v10122_v8 = vld [vmem:[#allocation20_spill] sm:$0xff] }
 0x30b   : > { %v4328_v49 = vpop.f32.mrf.mxu0  ;;  %v4633_v0 = vadd.f32 %v9331_v62, %v4223_v37  ;;  %v4636_v58 = vadd.f32 %v9343_v27, %v9198_v1  ;;  %v4227_v32 = vadd.f32 %v10121_v5, %v10120_v43  ;;  %v4634_v38 = vadd.f32 %v9346_v24, %v10124_v12  ;;  %v10125_v1 = vld [vmem:[#allocation45_spill] sm:$0xff] }
 0x30c   : > { %5527 = vst [vmem:[%s9340_s8 + $0x10] sm:$0xff] %v5459_v6   ;;  %v4690_v16 = vadd.f32 %v4658_v60, %v4428_v40  ;;  %v4661_v48 = vmul.f32 %v4629_v42, %v4431_v34  ;;  %v4429_v19 = vadd.f32 %v4328_v49, %v4019_v4  ;;  %v9372_v9 = vpop.f32.mrf.mxu1  ;;  %v10123_v40 = vld [vmem:[#allocation30_spill] sm:$0xff]  ;;  %v10127_v60 = vld [vmem:[#allocation36_spill] sm:$0xff] }
 0x30d   : > { %v6407_v63 = vpop.f32.mrf.mxu0  ;;  %v10129_v49 = vld [vmem:[#allocation6_spill] sm:$0xff] }
 0x30e   : > { %v4693_v13 = vadd.f32 %v4661_v48, %v4431_v34  ;;  %v4659_v51 = vmul.f32 %v4627_v33, %v4429_v19  ;;  %v4434_v39 = vadd.f32 %v6407_v63, %v9221_v50  ;;  %v9383_v30 = vpop.f32.mrf.mxu1  ;;  %v4221_v50 = vadd.f32 %v9193_v44, %v10119_v47 }
 0x30f   : > { %v4341_v36 = vpop.f32.mrf.mxu0 }
 0x310   : > { %v5474_v41 = vpack.c.bf16 %v4693_v13, %v4692_v54  ;;  %v4691_v45 = vadd.f32 %v4659_v51, %v4429_v19  ;;  %v4664_v11 = vmul.f32 %v4632_v57, %v4434_v39  ;;  %v4432_v23 = vadd.f32 %v4341_v36, %v9229_v2  ;;  %v9391_v17 = vpop.f32.mrf.mxu1  ;;  %v10126_v54 = vld [vmem:[#allocation71_spill] sm:$0xff] }
 0x311   : > { %v6408_v29 = vpop.f32.mrf.mxu0  ;;  %v4631_v59 = vadd.f32 %v9338_v15, %v4221_v50  ;;  %v4029_v15 = vadd.f32 %v10123_v40, %v10122_v8  ;;  %v4225_v34 = vadd.f32 %v10127_v60, %v10126_v54  ;;  %v10132_v50 = vld [vmem:[#allocation79_spill] sm:$0xff] }
 0x312   : > { %5530 = vst [vmem:[%s9340_s8 + $0x28] sm:$0xff] %v5474_v41   ;;  %v5469_v26 = vpack.c.bf16 %v4691_v45, %v4690_v16  ;;  %v4696_v7 = vadd.f32 %v4664_v11, %v4434_v39  ;;  %v4662_v31 = vmul.f32 %v4630_v22, %v4432_v23  ;;  %v4435_v46 = vadd.f32 %v6408_v29, %v4025_v10  ;;  %v6453_v21 = vpop.f32.mrf.mxu1  ;;  %v10130_v41 = vld [vmem:[#allocation59_spill] sm:$0xff]  ;;  %v10134_v29 = vld [vmem:[#allocation76_spill] sm:$0xff] }
 0x313   : > { %v4344_v55 = vpop.f32.mrf.mxu0  ;;  %v4637_v16 = vadd.f32 %v9357_v53, %v4227_v32  ;;  %v4635_v39 = vadd.f32 %v9365_v52, %v4225_v34  ;;  %v4640_v45 = vadd.f32 %v9368_v61, %v10130_v41  ;;  %v10137_v61 = vld [vmem:[#allocation32_spill] sm:$0xff]  ;;  %v10143_v34 = vld [vmem:[#allocation63_spill] sm:$0xff] }
 0x314   : > { %5529 = vst [vmem:[%s9340_s8 + $0x20] sm:$0xff] %v5469_v26   ;;  %v4694_v2 = vadd.f32 %v4662_v31, %v4432_v23  ;;  %v4665_v25 = vmul.f32 %v4633_v0, %v4435_v46  ;;  %v4433_v44 = vadd.f32 %v4344_v55, %v4023_v28  ;;  %v4587_v19 = vpop.f32.mrf.mxu1  ;;  %v10131_v23 = vld [vmem:[#allocation48_spill] sm:$0xff]  ;;  %v10133_v28 = vld [vmem:[#allocation35_spill] sm:$0xff] }
 0x315   : > { %v6411_v56 = vpop.f32.mrf.mxu0  ;;  %v4231_v0 = vadd.f32 %v10133_v28, %v10132_v50  ;;  %v10135_v26 = vld [vmem:[#allocation51_spill] sm:$0xff] }
 0x316   : > { %v4697_v3 = vadd.f32 %v4665_v25, %v4435_v46  ;;  %v4663_v62 = vmul.f32 %v4631_v59, %v4433_v44  ;;  %v4438_v18 = vadd.f32 %v6411_v56, %v9241_v35  ;;  %v10128_v35 = vld [vmem:[#allocation75_spill] sm:$0xff]  ;;  %v6454_v36 = vpop.f32.mrf.mxu1  ;;  %v4033_v52 = vadd.f32 %v10135_v26, %v10134_v29  ;;  %v10139_v56 = vld [vmem:[#allocation18_spill] sm:$0xff] }
 0x317   : > { %v4357_v4 = vpop.f32.mrf.mxu0  ;;  %v4027_v33 = vadd.f32 %v10129_v49, %v10128_v35  ;;  %v4641_v43 = vadd.f32 %v9383_v30, %v4231_v0  ;;  %v10144_v49 = vld [vmem:[#allocation73_spill] sm:$0xff] }
 0x318   : > { %v5484_v42 = vpack.c.bf16 %v4697_v3, %v4696_v7  ;;  %v4695_v14 = vadd.f32 %v4663_v62, %v4433_v44  ;;  %v4668_v6 = vmul.f32 %v4636_v58, %v4438_v18  ;;  %v4436_v27 = vadd.f32 %v4357_v4, %v10125_v1  ;;  %v10136_v7 = vld [vmem:[#allocation25_spill] sm:$0xff]  ;;  %v10138_v44 = vld [vmem:[#allocation10_spill] sm:$0xff]  ;;  %v4590_v32 = vpop.f32.mrf.mxu1 }
 0x319   : > { %v6412_v48 = vpop.f32.mrf.mxu0  ;;  %v4638_v31 = vadd.f32 %v9372_v9, %v10136_v7  ;;  %v4229_v58 = vadd.f32 %v10139_v56, %v10138_v44  ;;  %v10140_v3 = vld [vmem:[#allocation77_spill] sm:$0xff] }
 0x31a   : > { %5532 = vst [vmem:[%s9340_s8 + $0x38] sm:$0xff] %v5484_v42   ;;  %v5479_v63 = vpack.c.bf16 %v4695_v14, %v4694_v2  ;;  %v4700_v24 = vadd.f32 %v4668_v6, %v4438_v18  ;;  %v4666_v57 = vmul.f32 %v4634_v38, %v4436_v27  ;;  %v4439_v13 = vadd.f32 %v6412_v48, %v4029_v15  ;;  %v10141_v62 = vld [vmem:[#allocation17_spill] sm:$0xff]  ;;  %v6457_v6 = vpop.f32.mrf.mxu1  ;;  %v10146_v48 = vld [vmem:[#allocation47_spill] sm:$0xff] }
 0x31b   : > { %v4360_v51 = vpop.f32.mrf.mxu0  ;;  %v4031_v18 = vadd.f32 %v10141_v62, %v10140_v3  ;;  %v4639_v38 = vadd.f32 %v9391_v17, %v4229_v58  ;;  %v10148_v17 = vld [vmem:[#allocation40_spill] sm:$0xff]  ;;  %v10155_v44 = vld [vmem:[#allocation61_spill] sm:$0xff] }
 0x31c   : > { %5531 = vst [vmem:[%s9340_s8 + $0x30] sm:$0xff] %v5479_v63   ;;  %v4698_v20 = vadd.f32 %v4666_v57, %v4436_v27  ;;  %v4669_v37 = vmul.f32 %v4637_v16, %v4439_v13  ;;  %v4437_v10 = vadd.f32 %v4360_v51, %v4027_v33  ;;  %v10142_v27 = vld [vmem:[#allocation27_spill] sm:$0xff]  ;;  %v10145_v33 = vld [vmem:[#allocation44_spill] sm:$0xff]  ;;  %v10147_v63 = vld [vmem:[#allocation5_spill] sm:$0xff]  ;;  %v4642_v57 = vadd.f32 %v4587_v19, %v10148_v17 }
 0x31d   : > { %v6415_v22 = vpop.f32.mrf.mxu0  ;;  %v4644_v54 = vadd.f32 %v6453_v21, %v10142_v27  ;;  %v4235_v16 = vadd.f32 %v10145_v33, %v10144_v49  ;;  %v10156_v58 = vld [vmem:[#allocation37_spill] sm:$0xff] }
 0x31e   : > { %v4701_v53 = vadd.f32 %v4669_v37, %v4439_v13  ;;  %v4667_v11 = vmul.f32 %v4635_v39, %v4437_v10  ;;  %v4442_v47 = vadd.f32 %v6415_v22, %v10131_v23  ;;  %v10149_v37 = vld [vmem:[#allocation72_spill] sm:$0xff]  ;;  %v10151_v22 = vld [vmem:[#allocation49_spill] sm:$0xff] }
 0x31f   : > { %v4373_v46 = vpop.f32.mrf.mxu0  ;;  %v4645_v23 = vadd.f32 %v6454_v36, %v4235_v16  ;;  %v10157_v3 = vld [vmem:[#allocation9_spill] sm:$0xff] }
 0x320   : > { %v5494_v55 = vpack.c.bf16 %v4701_v53, %v4700_v24  ;;  %v4699_v59 = vadd.f32 %v4667_v11, %v4437_v10  ;;  %v4672_v2 = vmul.f32 %v4640_v45, %v4442_v47  ;;  %v4440_v25 = vadd.f32 %v4373_v46, %v10137_v61  ;;  %v10150_v10 = vld [vmem:[#allocation74_spill] sm:$0xff]  ;;  %v10152_v45 = vld [vmem:[#allocation24_spill] sm:$0xff]  ;;  %v10153_v53 = vld [vmem:[#allocation43_spill] sm:$0xff] }
 0x321   : > { %v6416_v5 = vpop.f32.mrf.mxu0  ;;  %v4037_v24 = vadd.f32 %v10147_v63, %v10146_v48  ;;  %v4233_v41 = vadd.f32 %v10151_v22, %v10150_v10  ;;  %v4035_v11 = vadd.f32 %v10153_v53, %v10152_v45  ;;  %v4239_v62 = vadd.f32 %v10157_v3, %v10156_v58  ;;  %v10165_v27 = vld [vmem:[#allocation21_spill] sm:$0xff] }
 0x322   : > { %5534 = vst [vmem:[%s9340_s8 + $0x48] sm:$0xff] %v5494_v55   ;;  %v5489_v8 = vpack.c.bf16 %v4699_v59, %v4698_v20  ;;  %v4704_v9 = vadd.f32 %v4672_v2, %v4442_v47  ;;  %v4670_v40 = vmul.f32 %v4638_v31, %v4440_v25  ;;  %v4443_v15 = vadd.f32 %v6416_v5, %v4033_v52  ;;  %v4603_v47 = vpop.f32.mrf.mxu1  ;;  %v10154_v2 = vld [vmem:[#allocation39_spill] sm:$0xff] }
 0x323   : > { %v4376_v12 = vpop.f32.mrf.mxu0  ;;  %v4643_v52 = vadd.f32 %v4590_v32, %v4233_v41  ;;  %v4648_v61 = vadd.f32 %v6457_v6, %v10154_v2  ;;  %v10160_v32 = vld [vmem:[#allocation14_spill] sm:$0xff] }
 0x324   : > { %5533 = vst [vmem:[%s9340_s8 + $0x40] sm:$0xff] %v5489_v8   ;;  %v4702_v4 = vadd.f32 %v4670_v40, %v4440_v25  ;;  %v4673_v42 = vmul.f32 %v4641_v43, %v4443_v15  ;;  %v4441_v14 = vadd.f32 %v4376_v12, %v4031_v18  ;;  %v6458_v55 = vpop.f32.mrf.mxu1  ;;  %v10158_v18 = vld [vmem:[#allocation41_spill] sm:$0xff]  ;;  %v4646_v8 = vadd.f32 %v4603_v47, %v10160_v32 }
 0x325   : > { %v6419_v1 = vpop.f32.mrf.mxu0  ;;  %v10159_v43 = vld [vmem:[#allocation13_spill] sm:$0xff] }
 0x326   : > { %v4705_v60 = vadd.f32 %v4673_v42, %v4443_v15  ;;  %v4671_v30 = vmul.f32 %v4639_v38, %v4441_v14  ;;  %v4446_v35 = vadd.f32 %v6419_v1, %v10143_v34  ;;  %v4041_v5 = vadd.f32 %v10159_v43, %v10158_v18  ;;  %v10161_v38 = vld [vmem:[#allocation55_spill] sm:$0xff]  ;;  %v10162_v42 = vld [vmem:[#allocation22_spill] sm:$0xff]  ;;  %v10164_v1 = vld [vmem:[#allocation28_spill] sm:$0xff] }
 0x327   : > { %v4389_v13 = vpop.f32.mrf.mxu0 }
 0x328   : > { %v5504_v51 = vpack.c.bf16 %v4705_v60, %v4704_v9  ;;  %v4703_v39 = vadd.f32 %v4671_v30, %v4441_v14  ;;  %v4676_v20 = vmul.f32 %v4644_v54, %v4446_v35  ;;  %v4444_v21 = vadd.f32 %v4389_v13, %v10149_v37  ;;  %v10163_v14 = vld [vmem:[#allocation33_spill] sm:$0xff]  ;;  %v4606_v30 = vpop.f32.mrf.mxu1 }
 0x329   : > { %v6420_v50 = vpop.f32.mrf.mxu0  ;;  %v4237_v6 = vadd.f32 %v10163_v14, %v10162_v42  ;;  %v4039_v54 = vadd.f32 %v10165_v27, %v10164_v1  ;;  %v4649_v60 = vadd.f32 %v6458_v55, %v4239_v62 }
 0x32a   : > { %5536 = vst [vmem:[%s9340_s8 + $0x58] sm:$0xff] %v5504_v51   ;;  %v5499_v28 = vpack.c.bf16 %v4703_v39, %v4702_v4  ;;  %v4708_v0 = vadd.f32 %v4676_v20, %v4446_v35  ;;  %v4674_v19 = vmul.f32 %v4642_v57, %v4444_v21  ;;  %v4447_v29 = vadd.f32 %v6420_v50, %v4037_v24 }
 0x32b   : > { %v4392_v26 = vpop.f32.mrf.mxu0  ;;  %v4647_v63 = vadd.f32 %v4606_v30, %v4237_v6 }
 0x32c   : > { %5535 = vst [vmem:[%s9340_s8 + $0x50] sm:$0xff] %v5499_v28   ;;  %v4706_v7 = vadd.f32 %v4674_v19, %v4444_v21  ;;  %v4677_v31 = vmul.f32 %v4645_v23, %v4447_v29  ;;  %v4445_v46 = vadd.f32 %v4392_v26, %v4035_v11 }
 0x32d   : > { %v6423_v59 = vpop.f32.mrf.mxu0 }
 0x32e   : > { %v4709_v25 = vadd.f32 %v4677_v31, %v4447_v29  ;;  %v4675_v36 = vmul.f32 %v4643_v52, %v4445_v46  ;;  %v4450_v56 = vadd.f32 %v6423_v59, %v10155_v44 }
 0x32f   : > { %v4405_v9 = vpop.f32.mrf.mxu0 }
 0x330   : > { %v5514_v40 = vpack.c.bf16 %v4709_v25, %v4708_v0  ;;  %v4707_v15 = vadd.f32 %v4675_v36, %v4445_v46  ;;  %v4680_v12 = vmul.f32 %v4648_v61, %v4450_v56  ;;  %v4448_v4 = vadd.f32 %v4405_v9, %v10161_v38 }
 0x331   : > { %v6424_v34 = vpop.f32.mrf.mxu0 }
 0x332   : > { %5538 = vst [vmem:[%s9340_s8 + $0x68] sm:$0xff] %v5514_v40   ;;  %v5509_v35 = vpack.c.bf16 %v4707_v15, %v4706_v7  ;;  %v4712_v49 = vadd.f32 %v4680_v12, %v4450_v56  ;;  %v4678_v33 = vmul.f32 %v4646_v8, %v4448_v4  ;;  %v4451_v16 = vadd.f32 %v6424_v34, %v4041_v5 }
 0x333   : > { %v4408_v48 = vpop.f32.mrf.mxu0 }
 0x334   : > { %5537 = vst [vmem:[%s9340_s8 + $0x60] sm:$0xff] %v5509_v35   ;;  %v4710_v24 = vadd.f32 %v4678_v33, %v4448_v4  ;;  %v4681_v17 = vmul.f32 %v4649_v60, %v4451_v16  ;;  %v4449_v57 = vadd.f32 %v4408_v48, %v4039_v54 }
 0x336   : > { %v4713_v13 = vadd.f32 %v4681_v17, %v4451_v16  ;;  %v4679_v51 = vmul.f32 %v4647_v63, %v4449_v57 }
 0x338   : > { %v5524_v39 = vpack.c.bf16 %v4713_v13, %v4712_v49  ;;  %v4711_v20 = vadd.f32 %v4679_v51, %v4449_v57 }
 0x33a   : > { %5540 = vst [vmem:[%s9340_s8 + $0x78] sm:$0xff] %v5524_v39   ;;  %v5519_v37 = vpack.c.bf16 %v4711_v20, %v4710_v24 }
 0x33c   : > { %5539 = vst [vmem:[%s9340_s8 + $0x70] sm:$0xff] %v5519_v37  }
 0x33d   : > { %6566 = shalt.err (!%p6563_p5)
}
 0x33e   : > { %s6567_s29 = scalar_lea.hbm %s9465_s21, 2048  ;;  %s6571_s5 = scalar_lea.hbm %s9521_s3, 4096 }
 0x33f   : > { %p6568_p6 = scmp.ne.s32.totalorder %s9465_s21, %s6567_s29  ;;  %p6572_p10 = scmp.lt.s32.totalorder %s9465_s21, %s9521_s3 }
 0x340   : > { %p6573_p11 = scmp.lt.s32.totalorder %s6571_s5, %s6567_s29 }
 0x341   : > { %p6569_p7 = pnand %p6568_p6, %p6694_p4 }
 0x342   : > { %p6574_p12 = por %p6573_p11, %p6572_p10 }
 0x343   : > { %p6570_p9 = pneg %p6569_p7 }
 0x345   : > { %p6575_p13 = pnand %p6574_p12, %p6570_p9 }
 0x347   : > { %6578 = shalt.err (!%p6575_p13)
}
 0x348   : > { %s6632_s7 = smov 64   ;;  %s6633_s8 = smov 4  }
 0x349   : > { %6478 = dma.vmem_to_hbm [thread:$0]  (%p6694_p4), %s9467_s10, 2048, %s9465_s21, %s9473_s23, %s6632_s7, %s6632_s7, %s6633_s8  }
 0x34a PF: > { %p6484_p0 = scmp.ge.s32.totalorder %s6629_s17, 2  ;;  %s4904_s9 = sand.u32 1, %s6609_s12  }
 0x34b   : > { %s4905_s11 = scalar_lea.sflag [#allocation3], %s4904_s9 }
 0x34c   : > { %p6481_p1 = pnand %p6484_p0, %p6701_p8 }
 0x34e   : > { %p6482_p2 = pneg %p6481_p1 }
 0x350   : > { %6604 = dma.done.wait (%p6482_p2), %s4905_s11, 2048  }
 0x351   : > { %6606 = vsyncadd (%p6482_p2), %s4905_s11, 4294965248  ;;  %s16_s17 = sadd.s32 1, %s6629_s17   ;;  %s10166_s12 = smov %s6613_s13 }
 0x352   : > { %p13_p3 = scmp.ge.s32.totalorder %s16_s17, 4   ;;  %s10167_s13 = smov %s6617_s14 }
 0x353   : > { %s10168_s14 = smov %s6707_s25  ;;  %s10169_s15 = smov %s6625_s16 }
 0x354   : > { %s10170_s16 = smov %s10172_s20  ;;  %15 = sbr.rel (!%p13_p3) target bundleno = 4 (0x4), region = 89 }
 0x359   :  { %4910 = vsyncpa [#allocation3], 1 }
 0x35a   :  { %4912 = vsyncpa [#allocation3 + $0x1], 1 }

</bundles_post_ra>
